<compile_context>
chip_gen: v7x
topology: tpu7x:2x2x1
jax: 0.10.0
libtpu: 0.0.40
codegen_flags: <defaults>
</compile_context>

<pallas_src>
import numpy as np
import jax
import jax.numpy as jnp
from jax import lax
from jax.experimental import pallas as pl
from jax.experimental.pallas import tpu as pltpu

# ------------------------- model hyper-parameters ---------------------------
LEVELS      = 2              # cfg.levels
DOWNS_T     = (1, 1)         # cfg.downs_t
STRIDES_T   = (2, 2)         # cfg.strides_t
EMB_WIDTH   = 32             # cfg.emb_width
L_BINS      = 32             # cfg.l_bins
WIDTH       = 32             # block_kwargs['width']
DEPTH       = 1              # block_kwargs['depth']
COMMIT_W    = 0.02           # cfg.commit
RECON_W     = 1.0            # cfg.recon
MULTIPLIERS = (1, 1)

B, L, C = 2, 16, 4           # batch, dataset.max_path_nums, dataset.x_channels

_VMEM = pl.BlockSpec(memory_space=pltpu.MemorySpace.VMEM)

# scalar-output slot layout (lane-packed into one row of the output)
_S_RL     = 0                # recons l2, per level
_S_COMMIT = LEVELS
_S_FIT    = 2 * LEVELS
_S_PN     = 3 * LEVELS
_S_L1     = 4 * LEVELS       # l1 loss on the level-0 reconstruction
_NS       = 4 * LEVELS + 8

OUT_ROWS = B * L + 8         # rows 0..B*L-1: x_out, row B*L: packed scalars

# TODO(synk): training-time codebook init/EMA updates (init_k/update_k),
# straight-through estimator gradients, the 'linf' top-k loss branch,
# use_modified_block and return_all_quantized_res are not implemented — this
# reproduces eval-mode forward semantics only.
# TODO(synk): the kernel structure (and the F.pad no-op) is specialised to
# levels=2, downs_t=(1,1), strides_t=(2,2); generalising needs a plan rebuild.


# --------------------------- host-side packing -------------------------------
class _Slab:
    """Packs 2-D blocks into one lane-dense slab with static row offsets."""

    def __init__(self, lanes, row_align):
        self.lanes = lanes
        self.row_align = row_align
        self._row = 0
        self._items = []

    def add(self, arr):
        arr = np.asarray(arr, np.float32)
        assert arr.ndim == 2 and arr.shape[1] <= self.lanes, arr.shape
        off = self._row
        self._items.append((off, arr))
        self._row = off + (-(-arr.shape[0] // self.row_align)) * self.row_align
        return off

    def build(self):
        rows = max(self._row, self.row_align)
        slab = np.zeros((rows, self.lanes), np.float32)
        for off, a in self._items:
            slab[off:off + a.shape[0], :a.shape[1]] = a
        return slab


def _single_taps(conv_p):
    w = np.asarray(conv_p['w'], np.float32)            # (K, Cin, Cout)
    b = np.asarray(conv_p['b'], np.float32)
    return [w[k] for k in range(w.shape[0])], b


def _fuse_shared_input(conv_ps):
    """Fuse convs that consume the SAME input: concat along Cout per tap."""
    ws = [np.asarray(c['w'], np.float32) for c in conv_ps]
    K = ws[0].shape[0]
    taps = [np.concatenate([w[k] for w in ws], axis=1) for k in range(K)]
    b = np.concatenate([np.asarray(c['b'], np.float32) for c in conv_ps], axis=1)
    return taps, b


def _fuse_block_diag(conv_ps):
    """Fuse independent convs on a lane-concatenated activation: block-diag."""
    ws = [np.asarray(c['w'], np.float32) for c in conv_ps]
    K = ws[0].shape[0]
    ci = sum(w.shape[1] for w in ws)
    co = sum(w.shape[2] for w in ws)
    taps = []
    for k in range(K):
        m = np.zeros((ci, co), np.float32)
        ro = cc = 0
        for w in ws:
            m[ro:ro + w.shape[1], cc:cc + w.shape[2]] = w[k]
            ro += w.shape[1]
            cc += w.shape[2]
        taps.append(m)
    b = np.concatenate([np.asarray(c['b'], np.float32) for c in conv_ps], axis=1)
    return taps, b


def _gather_mats(t_out, t_in, stride, pad, K, transpose):
    """Per-tap 0/1 selection matrices, block-diagonal over the batch.

    forward : row (b,i) pulls col (b, i*stride + k - pad)
    transpose: row (b,i) gets col (b,j) iff i == j*stride + k - pad
    Out-of-range taps stay zero == implicit zero padding.
    """
    mats = []
    for k in range(K):
        shift = k - pad
        g = np.zeros((B * t_out, B * t_in), np.float32)
        for bb in range(B):
            for i in range(t_out):
                if transpose:
                    num = i - shift
                    if num % stride == 0:
                        j = num // stride
                        if 0 <= j < t_in:
                            g[bb * t_out + i, bb * t_in + j] = 1.0
                else:
                    j = i * stride + shift
                    if 0 <= j < t_in:
                        g[bb * t_out + i, bb * t_in + j] = 1.0
        mats.append(g)
    return mats


def _pack_model(params):
    """Pack every weight/bias/codebook into two slabs + a static offset plan."""
    wpk = _Slab(256, 16)     # -> bf16: W_cat matrices + gather matrices
    fpk = _Slab(128, 8)      # -> f32 : biases, codebooks, codebook norms

    def add_conv(taps, bias, *, kind, pad, stride=1, t_in=None, t_out=None,
                 transpose=False):
        K = len(taps)
        cin, cout = taps[0].shape
        d = dict(kind=kind, K=K, cin=cin, cout=cout, pad=pad,
                 w_off=wpk.add(np.concatenate(taps, axis=1)),
                 b_off=fpk.add(np.asarray(bias, np.float32).reshape(1, -1)))
        if kind == 'gather':
            d['n_in'] = B * t_in
            d['n_out'] = B * t_out
            d['g_offs'] = [wpk.add(g) for g in
                           _gather_mats(t_out, t_in, stride, pad, K, transpose)]
        return d

    enc0 = params['encoders'][0][0]        # level-0 encoder (single sub-block)
    enc1a = params['encoders'][1][0]       # level-1 encoder, sub-block 0
    enc1b = params['encoders'][1][1]       # level-1 encoder, sub-block 1
    dec0 = params['decoders'][0]
    dec1 = params['decoders'][1]

    s0, s1 = STRIDES_T
    plan = {}

    # fused encoder trunk: level-0 encoder || level-1 sub-block 0 (shared x_n)
    seg = {}
    taps, bias = _fuse_shared_input([enc0['downs'][0]['down'],
                                     enc1a['downs'][0]['down']])
    seg['down'] = add_conv(taps, bias, kind='gather', pad=s0 // 2, stride=s0,
                           t_in=L, t_out=L // s0)
    seg['res'] = []
    for r0, r1 in zip(enc0['downs'][0]['res'], enc1a['downs'][0]['res']):
        tc3, bc3 = _fuse_block_diag([r0['c3'], r1['c3']])
        tc1, bc1 = _fuse_block_diag([r0['c1'], r1['c1']])
        seg['res'].append((add_conv(tc3, bc3, kind='roll', pad=1),
                           add_conv(tc1, bc1, kind='roll', pad=0)))
    taps, bias = _fuse_block_diag([enc0['proj'], enc1a['proj']])
    seg['proj'] = add_conv(taps, bias, kind='roll', pad=1)
    plan['enc_f'] = seg

    # level-1 encoder, sub-block 1
    seg = {}
    taps, bias = _single_taps(enc1b['downs'][0]['down'])
    seg['down'] = add_conv(taps, bias, kind='gather', pad=s1 // 2, stride=s1,
                           t_in=L // s0, t_out=L // (s0 * s1))
    seg['res'] = []
    for r in enc1b['downs'][0]['res']:
        seg['res'].append((add_conv(*_single_taps(r['c3']), kind='roll', pad=1),
                           add_conv(*_single_taps(r['c1']), kind='roll', pad=0)))
    seg['proj'] = add_conv(*_single_taps(enc1b['proj']), kind='roll', pad=1)
    plan['enc1b'] = seg

    # codebooks + precomputed squared norms
    plan['vq'] = []
    for level in range(LEVELS):
        kb = np.asarray(params['codebooks'][level], np.float32)
        plan['vq'].append(dict(
            n_bins=kb.shape[0],
            kb_off=fpk.add(kb),
            k2_off=fpk.add(np.sum(kb * kb, axis=1, keepdims=True).T)))

    # level-1 decoder, deepest block (unfused)
    blk = dec1['blocks'][1]
    seg = {}
    seg['proj'] = add_conv(*_single_taps(blk['proj']), kind='roll', pad=1)
    seg['res'] = []
    for r in blk['ups'][0]['res']:
        seg['res'].append((add_conv(*_single_taps(r['c3']), kind='roll', pad=1),
                           add_conv(*_single_taps(r['c1']), kind='roll', pad=0)))
    seg['up'] = add_conv(*_single_taps(blk['ups'][0]['up']), kind='gather',
                         pad=s1 // 2, stride=s1,
                         t_in=L // (s0 * s1), t_out=L // s0, transpose=True)
    plan['dec1b'] = seg

    # fused decoder tail: level-0 decoder || level-1 block 0, plus both `out` convs
    b0blk, b1blk = dec0['blocks'][0], dec1['blocks'][0]
    seg = {}
    taps, bias = _fuse_block_diag([b0blk['proj'], b1blk['proj']])
    seg['proj'] = add_conv(taps, bias, kind='roll', pad=1)
    seg['res'] = []
    for r0, r1 in zip(b0blk['ups'][0]['res'], b1blk['ups'][0]['res']):
        tc3, bc3 = _fuse_block_diag([r0['c3'], r1['c3']])
        tc1, bc1 = _fuse_block_diag([r0['c1'], r1['c1']])
        seg['res'].append((add_conv(tc3, bc3, kind='roll', pad=1),
                           add_conv(tc1, bc1, kind='roll', pad=0)))
    taps, bias = _fuse_block_diag([b0blk['ups'][0]['up'], b1blk['ups'][0]['up']])
    seg['up'] = add_conv(taps, bias, kind='gather', pad=s0 // 2, stride=s0,
                         t_in=L // s0, t_out=L, transpose=True)
    taps, bias = _fuse_block_diag([dec0['out'], dec1['out']])
    seg['out'] = add_conv(taps, bias, kind='roll', pad=1)
    plan['dec_f'] = seg

    wslab = jnp.asarray(wpk.build(), dtype=jnp.bfloat16)
    fslab = jnp.asarray(fpk.build(), dtype=jnp.float32)
    return wslab, fslab, plan


# --------------------------- fused forward kernel ---------------------------
def _build_kernel(plan):
    def kernel(xin_ref, w_ref, f_ref, out_ref):
        f32 = jnp.float32
        _mask_cache = {}

        def edge_mask(n, s):
            """(n,1) 1/0 mask: 1 where the shifted row stays inside its batch."""
            key = (n, s)
            if key not in _mask_cache:
                t_loc = n // B
                r = lax.broadcasted_iota(jnp.int32, (n, 1), 0)
                rb = jnp.zeros((n, 1), jnp.int32)
                for bb in range(1, B):                    # batch id without div
                    rb = rb + (r >= bb * t_loc).astype(jnp.int32)
                rt = r - rb * t_loc
                ok = jnp.logical_and(rt + s >= 0, rt + s < t_loc)
                _mask_cache[key] = ok.astype(f32)
            return _mask_cache[key]

        def conv(x, d, relu_in=False):
            """Conv1d / ConvTranspose1d as ONE W_cat matmul + tap combining."""
            if relu_in:
                x = jnp.maximum(x, 0.0)                   # once per conv input
            cin, cout, K, pad = d['cin'], d['cout'], d['K'], d['pad']
            wcat = w_ref[d['w_off']:d['w_off'] + cin, 0:K * cout]       # bf16
            ycat = jnp.dot(x.astype(jnp.bfloat16), wcat,
                           preferred_element_type=f32)    # (n_in, K*cout) f32
            if d['kind'] == 'roll':                       # stride-1 conv
                n = x.shape[0]
                acc = None
                for k in range(K):
                    yk = ycat[:, k * cout:(k + 1) * cout]
                    s = k - pad
                    if s != 0:
                        yk = pltpu.roll(yk, (-s) % n, axis=0) * edge_mask(n, s)
                    acc = yk if acc is None else acc + yk
            else:                                         # strided / transposed
                n_in, n_out = d['n_in'], d['n_out']
                ycb = ycat.astype(jnp.bfloat16)
                acc = None
                for k, g_off in enumerate(d['g_offs']):
                    gk = w_ref[g_off:g_off + n_out, 0:n_in]             # bf16 0/1
                    term = jnp.dot(gk, ycb[:, k * cout:(k + 1) * cout],
                                   preferred_element_type=f32)
                    acc = term if acc is None else acc + term
            return acc + f_ref[d['b_off']:d['b_off'] + 1, 0:cout]

        def resblock(x, d3, d1):                          # ReLU->c3->ReLU->c1->+x
            h = conv(x, d3, relu_in=True)
            h = conv(h, d1, relu_in=True)
            return x + h

        def vq(xl, vd):                                   # xl:(n,D) f32
            n, dd = xl.shape
            kb = f_ref[vd['kb_off']:vd['kb_off'] + vd['n_bins'], 0:dd]
            k2 = f_ref[vd['k2_off']:vd['k2_off'] + 1, 0:vd['n_bins']]
            nt = (((1,), (1,)), ((), ()))
            # default-precision dot (bf16-rounded on the MXU); drift vs the f32
            # torch reference accepted — argmin ties are vanishingly unlikely.
            scores = lax.dot_general(xl, kb, nt, preferred_element_type=f32)
            x2 = jnp.sum(xl * xl, axis=1, keepdims=True)
            dist = x2 - 2.0 * scores + k2
            min_d = jnp.min(dist, axis=1, keepdims=True)
            lane = lax.broadcasted_iota(jnp.int32, dist.shape, 1)
            idx = jnp.min(jnp.where(dist == min_d, lane, vd['n_bins']),
                          axis=1, keepdims=True)
            onehot = (lane == idx).astype(jnp.bfloat16)
            xq = jnp.dot(onehot, kb.astype(jnp.bfloat16),
                         preferred_element_type=f32)
            commit = jnp.sum((xq - xl) ** 2) * (1.0 / float(n * dd))
            fit = jnp.mean(min_d)
            mu = jnp.mean(xl)
            pn = jnp.sqrt(jnp.sum((xl - mu) ** 2)) * (1.0 / np.sqrt(float(n * dd)))
            return xq, commit, fit, pn

        # ------------------------------ forward -----------------------------
        x_n = xin_ref[:, 0:C] * (1.0 / 100.0) - 1.0       # normalize_func(0, 200)
        mask = xin_ref[:, C:C + 1]                        # (B*L, 1) in {0, 1}

        # fused encoder trunk: level-0 encoder || level-1 sub-block 0
        p = plan['enc_f']
        h = conv(x_n, p['down'])
        for d3, d1 in p['res']:
            h = resblock(h, d3, d1)
        h = conv(h, p['proj'])                            # (B*L/2, 2*EMB)
        xs0 = h[:, 0:EMB_WIDTH]
        h1 = h[:, EMB_WIDTH:2 * EMB_WIDTH]

        # level-1 encoder, sub-block 1
        p = plan['enc1b']
        h1 = conv(h1, p['down'])
        for d3, d1 in p['res']:
            h1 = resblock(h1, d3, d1)
        xs1 = conv(h1, p['proj'])                         # (B*L/4, EMB)

        # VQ bottleneck
        xq0, commit0, fit0, pn0 = vq(xs0, plan['vq'][0])
        xq1, commit1, fit1, pn1 = vq(xs1, plan['vq'][1])

        # level-1 decoder, deepest block
        p = plan['dec1b']
        hd = conv(xq1, p['proj'])
        for d3, d1 in p['res']:
            hd = resblock(hd, d3, d1)
        h1m = conv(hd, p['up'])                           # (B*L/2, EMB)

        # fused decoder tail: level-0 decoder || level-1 block 0 + both outs
        p = plan['dec_f']
        hf = jnp.concatenate([xq0, h1m], axis=1)          # (B*L/2, 2*EMB)
        hf = conv(hf, p['proj'])
        for d3, d1 in p['res']:
            hf = resblock(hf, d3, d1)
        hf = conv(hf, p['up'])                            # (B*L, 2*EMB)
        xo = conv(hf, p['out'])                           # (B*L, 2*C) [lvl0|lvl1]
        # NOTE: decoder output length == L for this config, so torch's F.pad
        # branch is a no-op here.

        # masked losses (expanded-mask normalization sum(mask)*C, as in torch)
        msum = jnp.sum(mask) * float(C)
        inv_msum = 1.0 / jnp.where(msum > 0.0, msum, 1.0)  # all-pad guard
        d0 = (xo[:, 0:C] - x_n) * mask
        d1v = (xo[:, C:2 * C] - x_n) * mask
        rl0 = jnp.sum(d0 * d0) * inv_msum
        rl1 = jnp.sum(d1v * d1v) * inv_msum
        l1 = jnp.sum(jnp.abs(d0)) * inv_msum              # final x_out == level 0

        slot = lax.broadcasted_iota(jnp.int32, (1, _NS), 1)

        def put(vec, i, val):
            return vec + val * (slot == i).astype(f32)

        scal = jnp.zeros((1, _NS), f32)
        scal = put(scal, _S_RL + 0, rl0)
        scal = put(scal, _S_RL + 1, rl1)
        scal = put(scal, _S_COMMIT + 0, commit0)
        scal = put(scal, _S_COMMIT + 1, commit1)
        scal = put(scal, _S_FIT + 0, fit0)
        scal = put(scal, _S_FIT + 1, fit1)
        scal = put(scal, _S_PN + 0, pn0)
        scal = put(scal, _S_PN + 1, pn1)
        scal = put(scal, _S_L1, l1)

        out_ref[...] = jnp.zeros(out_ref.shape, f32)
        out_ref[0:B * L, 0:C] = xo[:, 0:C]                # level-0 reconstruction
        out_ref[B * L:B * L + 1, 0:_NS] = scal            # packed scalar metrics

    return kernel


# --------------------------- forward-pass wrapper ---------------------------
def make_forward(plan):
    kernel = _build_kernel(plan)

    def forward(wslab, fslab, x, padding_mask):
        """x: [B, L, C] raw input; padding_mask: [B, L] in {0,1}.  loss_fn='l2'."""
        xin = jnp.concatenate(
            [x.astype(jnp.float32).reshape(B * L, C),
             padding_mask.astype(jnp.float32).reshape(B * L, 1)], axis=1)

        out = pl.pallas_call(
            kernel,
            out_shape=jax.ShapeDtypeStruct((OUT_ROWS, 128), jnp.float32),
            in_specs=[_VMEM, _VMEM, _VMEM],
            out_specs=_VMEM,
        )(xin, wslab, fslab)

        x_out = out[0:B * L, 0:C].reshape(B, L, C)
        s = out[B * L, 0:_NS]

        metrics = {}
        for level in range(LEVELS):
            metrics[f'recons_loss_l{level + 1}'] = s[_S_RL + level]
        recons_loss = sum(s[_S_RL + lvl] for lvl in range(LEVELS))
        commit_loss = sum(s[_S_COMMIT + lvl] for lvl in range(LEVELS))
        loss = RECON_W * recons_loss + COMMIT_W * commit_loss
        metrics.update(
            recons_loss=recons_loss,
            l2_loss=s[_S_RL + 0],             # identical to recons_loss_l1 in torch
            l1_loss=s[_S_L1],
            commit_loss=commit_loss,
            fit=sum(s[_S_FIT + lvl] for lvl in range(LEVELS)) / LEVELS,
            pn=sum(s[_S_PN + lvl] for lvl in range(LEVELS)) / LEVELS,
        )
        return x_out, loss, metrics

    return forward


# ------------------------- deterministic parameters --------------------------
def init_params(key):
    keys = jax.random.split(key, 512)
    counter = [0]

    def nxt():
        k = keys[counter[0]]
        counter[0] += 1
        return k

    def conv(cin, cout, ksize):
        bound = 1.0 / np.sqrt(cin * ksize)
        w = jax.random.uniform(nxt(), (ksize, cin, cout), jnp.float32, -bound, bound)
        b = jax.random.uniform(nxt(), (1, cout), jnp.float32, -bound, bound)
        return {'w': w, 'b': b}

    def resblock(width):
        return {'c3': conv(width, width, 3), 'c1': conv(width, width, 1)}

    def enc_block(cin, cout, down_t, stride_t, width, depth):
        downs = []
        for i in range(down_t):
            downs.append({'down': conv(cin if i == 0 else width, width, stride_t * 2),
                          'res': [resblock(width) for _ in range(depth)]})
        return {'downs': downs, 'proj': conv(width, cout, 3)}

    def dec_block(emb, down_t, stride_t, width, depth):
        ups = []
        for i in range(down_t):
            out_ch = emb if i == down_t - 1 else width
            ups.append({'res': [resblock(width) for _ in range(depth)],
                        'up': conv(width, out_ch, stride_t * 2)})
        return {'proj': conv(emb, width, 3), 'ups': ups}

    encoders, decoders = [], []
    for level in range(LEVELS):
        w_l = WIDTH * MULTIPLIERS[level]
        d_l = DEPTH * MULTIPLIERS[level]
        enc = []
        for sub in range(level + 1):
            cin = C if sub == 0 else EMB_WIDTH
            enc.append(enc_block(cin, EMB_WIDTH, DOWNS_T[sub], STRIDES_T[sub], w_l, d_l))
        encoders.append(enc)
        decoders.append({'blocks': [dec_block(EMB_WIDTH, DOWNS_T[sub], STRIDES_T[sub],
                                              w_l, d_l) for sub in range(level + 1)],
                         'out': conv(EMB_WIDTH, C, 3)})
    codebooks = [0.5 * jax.random.normal(nxt(), (L_BINS, EMB_WIDTH), jnp.float32)
                 for _ in range(LEVELS)]
    return {'encoders': encoders, 'decoders': decoders, 'codebooks': codebooks}


if __name__ == "__main__":
    key = jax.random.PRNGKey(0)
    kp, kx = jax.random.split(key)
    params = init_params(kp)

    # one-time host-side packing into two lane-dense slabs + static plan
    wslab, fslab, plan = _pack_model(params)

    x = jax.random.uniform(kx, (B, L, C), jnp.float32, 0.0, 200.0)
    lengths = jnp.array([L, L - 4])[:, None]
    padding_mask = (jnp.arange(L)[None, :] < lengths).astype(jnp.float32)

    fwd = jax.jit(make_forward(plan))
    x_out, loss, metrics = fwd(wslab, fslab, x, padding_mask)
    jax.block_until_ready((x_out, loss, metrics))
    assert x_out.shape == (B, L, C)
    assert bool(jnp.isfinite(loss))
    print("KERNEL_OK")
</pallas_src>

<mosaic_0001>
module attributes {stable_mosaic.version = 11 : i64} {
  func.func @kernel(%arg0: memref<32x5xf32, #tpu.memory_space<vmem>>, %arg1: memref<1104x256xbf16, #tpu.memory_space<vmem>>, %arg2: memref<216x128xf32, #tpu.memory_space<vmem>>, %arg3: memref<40x128xf32, #tpu.memory_space<vmem>>) attributes {dimension_semantics = [], scalar_prefetch = 0 : i64, scratch_operands = 0 : i64, tpu.core_type = #tpu.core_type<tc>} {
    %c0 = arith.constant 0 : index
    %c0_0 = arith.constant 0 : index
    %0 = vector.load %arg0[%c0, %c0_0] : memref<32x5xf32, #tpu.memory_space<vmem>>, vector<32x4xf32>
    %cst = arith.constant 0.00999999977 : f32
    %1 = vector.broadcast %cst : f32 to vector<32x4xf32>
    %2 = arith.mulf %0, %1 : vector<32x4xf32>
    %cst_1 = arith.constant 1.000000e+00 : f32
    %3 = vector.broadcast %cst_1 : f32 to vector<32x4xf32>
    %4 = arith.subf %2, %3 : vector<32x4xf32>
    %c0_2 = arith.constant 0 : index
    %c4 = arith.constant 4 : index
    %5 = vector.load %arg0[%c0_2, %c4] : memref<32x5xf32, #tpu.memory_space<vmem>>, vector<32x1xf32>
    %c0_3 = arith.constant 0 : index
    %c0_4 = arith.constant 0 : index
    %6 = vector.load %arg1[%c0_3, %c0_4] : memref<1104x256xbf16, #tpu.memory_space<vmem>>, vector<4x256xbf16>
    %7 = arith.truncf %4 : vector<32x4xf32> to vector<32x4xbf16>
    %cst_5 = arith.constant dense<0.000000e+00> : vector<32x256xf32>
    %8 = tpu.matmul %7, %6, %cst_5 {dimension_numbers = #tpu.dot_dimension_numbers<[1], [0], [0], [1], [0, 0, 1, 1], [], []>} : vector<32x4xbf16>, vector<4x256xbf16>, vector<32x256xf32> -> vector<32x256xf32>
    %9 = arith.truncf %8 : vector<32x256xf32> to vector<32x256xbf16>
    %c16 = arith.constant 16 : index
    %c0_6 = arith.constant 0 : index
    %10 = vector.load %arg1[%c16, %c0_6] : memref<1104x256xbf16, #tpu.memory_space<vmem>>, vector<16x32xbf16>
    %11 = vector.extract_strided_slice %9 {offsets = [0, 0], sizes = [32, 64], strides = [1, 1]} : vector<32x256xbf16> to vector<32x64xbf16>
    %cst_7 = arith.constant dense<0.000000e+00> : vector<16x64xf32>
    %12 = tpu.matmul %10, %11, %cst_7 {dimension_numbers = #tpu.dot_dimension_numbers<[1], [0], [0], [1], [0, 0, 1, 1], [], []>} : vector<16x32xbf16>, vector<32x64xbf16>, vector<16x64xf32> -> vector<16x64xf32>
    %c32 = arith.constant 32 : index
    %c0_8 = arith.constant 0 : index
    %13 = vector.load %arg1[%c32, %c0_8] : memref<1104x256xbf16, #tpu.memory_space<vmem>>, vector<16x32xbf16>
    %14 = vector.extract_strided_slice %9 {offsets = [0, 64], sizes = [32, 64], strides = [1, 1]} : vector<32x256xbf16> to vector<32x64xbf16>
    %cst_9 = arith.constant dense<0.000000e+00> : vector<16x64xf32>
    %15 = tpu.matmul %13, %14, %cst_9 {dimension_numbers = #tpu.dot_dimension_numbers<[1], [0], [0], [1], [0, 0, 1, 1], [], []>} : vector<16x32xbf16>, vector<32x64xbf16>, vector<16x64xf32> -> vector<16x64xf32>
    %16 = arith.addf %12, %15 : vector<16x64xf32>
    %c48 = arith.constant 48 : index
    %c0_10 = arith.constant 0 : index
    %17 = vector.load %arg1[%c48, %c0_10] : memref<1104x256xbf16, #tpu.memory_space<vmem>>, vector<16x32xbf16>
    %18 = vector.extract_strided_slice %9 {offsets = [0, 128], sizes = [32, 64], strides = [1, 1]} : vector<32x256xbf16> to vector<32x64xbf16>
    %cst_11 = arith.constant dense<0.000000e+00> : vector<16x64xf32>
    %19 = tpu.matmul %17, %18, %cst_11 {dimension_numbers = #tpu.dot_dimension_numbers<[1], [0], [0], [1], [0, 0, 1, 1], [], []>} : vector<16x32xbf16>, vector<32x64xbf16>, vector<16x64xf32> -> vector<16x64xf32>
    %20 = arith.addf %16, %19 : vector<16x64xf32>
    %c64 = arith.constant 64 : index
    %c0_12 = arith.constant 0 : index
    %21 = vector.load %arg1[%c64, %c0_12] : memref<1104x256xbf16, #tpu.memory_space<vmem>>, vector<16x32xbf16>
    %22 = vector.extract_strided_slice %9 {offsets = [0, 192], sizes = [32, 64], strides = [1, 1]} : vector<32x256xbf16> to vector<32x64xbf16>
    %cst_13 = arith.constant dense<0.000000e+00> : vector<16x64xf32>
    %23 = tpu.matmul %21, %22, %cst_13 {dimension_numbers = #tpu.dot_dimension_numbers<[1], [0], [0], [1], [0, 0, 1, 1], [], []>} : vector<16x32xbf16>, vector<32x64xbf16>, vector<16x64xf32> -> vector<16x64xf32>
    %24 = arith.addf %20, %23 : vector<16x64xf32>
    %c0_14 = arith.constant 0 : index
    %c0_15 = arith.constant 0 : index
    %25 = vector.load %arg2[%c0_14, %c0_15] : memref<216x128xf32, #tpu.memory_space<vmem>>, vector<1x64xf32>
    %26 = vector.broadcast %25 : vector<1x64xf32> to vector<16x64xf32>
    %27 = arith.addf %24, %26 : vector<16x64xf32>
    %cst_16 = arith.constant 0.000000e+00 : f32
    %28 = vector.broadcast %cst_16 : f32 to vector<16x64xf32>
    %29 = arith.maximumf %27, %28 : vector<16x64xf32>
    %c80 = arith.constant 80 : index
    %c0_17 = arith.constant 0 : index
    %30 = vector.load %arg1[%c80, %c0_17] : memref<1104x256xbf16, #tpu.memory_space<vmem>>, vector<64x192xbf16>
    %31 = arith.truncf %29 : vector<16x64xf32> to vector<16x64xbf16>
    %cst_18 = arith.constant dense<0.000000e+00> : vector<16x192xf32>
    %32 = tpu.matmul %31, %30, %cst_18 {dimension_numbers = #tpu.dot_dimension_numbers<[1], [0], [0], [1], [0, 0, 1, 1], [], []>} : vector<16x64xbf16>, vector<64x192xbf16>, vector<16x192xf32> -> vector<16x192xf32>
    %33 = vector.extract_strided_slice %32 {offsets = [0, 0], sizes = [16, 64], strides = [1, 1]} : vector<16x192xf32> to vector<16x64xf32>
    %c1_i32 = arith.constant 1 : i32
    %34 = tpu.dynamic_rotate %33 by %c1_i32 dim 0 : vector<16x64xf32>, i32 -> vector<16x64xf32>
    %35 = tpu.iota {dimensions = array<i32: 0>} : vector<16x1xi32>
    %c0_i32 = arith.constant 0 : i32
    %36 = vector.broadcast %c0_i32 : i32 to vector<16x1xi32>
    %c8_i32 = arith.constant 8 : i32
    %37 = vector.broadcast %c8_i32 : i32 to vector<16x1xi32>
    %38 = arith.cmpi sge, %35, %37 : vector<16x1xi32>
    %39 = arith.extui %38 : vector<16x1xi1> to vector<16x1xi32>
    %40 = arith.addi %36, %39 : vector<16x1xi32>
    %c8_i32_19 = arith.constant 8 : i32
    %41 = vector.broadcast %c8_i32_19 : i32 to vector<16x1xi32>
    %42 = arith.muli %40, %41 : vector<16x1xi32>
    %43 = arith.subi %35, %42 : vector<16x1xi32>
    %c-1_i32 = arith.constant -1 : i32
    %44 = vector.broadcast %c-1_i32 : i32 to vector<16x1xi32>
    %45 = arith.addi %43, %44 : vector<16x1xi32>
    %c0_i32_20 = arith.constant 0 : i32
    %46 = vector.broadcast %c0_i32_20 : i32 to vector<16x1xi32>
    %47 = arith.cmpi sge, %45, %46 : vector<16x1xi32>
    %c-1_i32_21 = arith.constant -1 : i32
    %48 = vector.broadcast %c-1_i32_21 : i32 to vector<16x1xi32>
    %49 = arith.addi %43, %48 : vector<16x1xi32>
    %c8_i32_22 = arith.constant 8 : i32
    %50 = vector.broadcast %c8_i32_22 : i32 to vector<16x1xi32>
    %51 = arith.cmpi slt, %49, %50 : vector<16x1xi32>
    %52 = arith.andi %47, %51 : vector<16x1xi1>
    %53 = arith.extui %52 : vector<16x1xi1> to vector<16x1xi32>
    %54 = arith.sitofp %53 : vector<16x1xi32> to vector<16x1xf32>
    %55 = vector.broadcast %54 : vector<16x1xf32> to vector<16x64xf32>
    %56 = arith.mulf %34, %55 : vector<16x64xf32>
    %57 = vector.extract_strided_slice %32 {offsets = [0, 64], sizes = [16, 64], strides = [1, 1]} : vector<16x192xf32> to vector<16x64xf32>
    %58 = arith.addf %56, %57 : vector<16x64xf32>
    %59 = vector.extract_strided_slice %32 {offsets = [0, 128], sizes = [16, 64], strides = [1, 1]} : vector<16x192xf32> to vector<16x64xf32>
    %c15_i32 = arith.constant 15 : i32
    %60 = tpu.dynamic_rotate %59 by %c15_i32 dim 0 : vector<16x64xf32>, i32 -> vector<16x64xf32>
    %61 = tpu.iota {dimensions = array<i32: 0>} : vector<16x1xi32>
    %c0_i32_23 = arith.constant 0 : i32
    %62 = vector.broadcast %c0_i32_23 : i32 to vector<16x1xi32>
    %c8_i32_24 = arith.constant 8 : i32
    %63 = vector.broadcast %c8_i32_24 : i32 to vector<16x1xi32>
    %64 = arith.cmpi sge, %61, %63 : vector<16x1xi32>
    %65 = arith.extui %64 : vector<16x1xi1> to vector<16x1xi32>
    %66 = arith.addi %62, %65 : vector<16x1xi32>
    %c8_i32_25 = arith.constant 8 : i32
    %67 = vector.broadcast %c8_i32_25 : i32 to vector<16x1xi32>
    %68 = arith.muli %66, %67 : vector<16x1xi32>
    %69 = arith.subi %61, %68 : vector<16x1xi32>
    %c1_i32_26 = arith.constant 1 : i32
    %70 = vector.broadcast %c1_i32_26 : i32 to vector<16x1xi32>
    %71 = arith.addi %69, %70 : vector<16x1xi32>
    %c0_i32_27 = arith.constant 0 : i32
    %72 = vector.broadcast %c0_i32_27 : i32 to vector<16x1xi32>
    %73 = arith.cmpi sge, %71, %72 : vector<16x1xi32>
    %c1_i32_28 = arith.constant 1 : i32
    %74 = vector.broadcast %c1_i32_28 : i32 to vector<16x1xi32>
    %75 = arith.addi %69, %74 : vector<16x1xi32>
    %c8_i32_29 = arith.constant 8 : i32
    %76 = vector.broadcast %c8_i32_29 : i32 to vector<16x1xi32>
    %77 = arith.cmpi slt, %75, %76 : vector<16x1xi32>
    %78 = arith.andi %73, %77 : vector<16x1xi1>
    %79 = arith.extui %78 : vector<16x1xi1> to vector<16x1xi32>
    %80 = arith.sitofp %79 : vector<16x1xi32> to vector<16x1xf32>
    %81 = vector.broadcast %80 : vector<16x1xf32> to vector<16x64xf32>
    %82 = arith.mulf %60, %81 : vector<16x64xf32>
    %83 = arith.addf %58, %82 : vector<16x64xf32>
    %c8 = arith.constant 8 : index
    %c0_30 = arith.constant 0 : index
    %84 = vector.load %arg2[%c8, %c0_30] : memref<216x128xf32, #tpu.memory_space<vmem>>, vector<1x64xf32>
    %85 = vector.broadcast %84 : vector<1x64xf32> to vector<16x64xf32>
    %86 = arith.addf %83, %85 : vector<16x64xf32>
    %cst_31 = arith.constant 0.000000e+00 : f32
    %87 = vector.broadcast %cst_31 : f32 to vector<16x64xf32>
    %88 = arith.maximumf %86, %87 : vector<16x64xf32>
    %c144 = arith.constant 144 : index
    %c0_32 = arith.constant 0 : index
    %89 = vector.load %arg1[%c144, %c0_32] : memref<1104x256xbf16, #tpu.memory_space<vmem>>, vector<64x64xbf16>
    %90 = arith.truncf %88 : vector<16x64xf32> to vector<16x64xbf16>
    %cst_33 = arith.constant dense<0.000000e+00> : vector<16x64xf32>
    %91 = tpu.matmul %90, %89, %cst_33 {dimension_numbers = #tpu.dot_dimension_numbers<[1], [0], [0], [1], [0, 0, 1, 1], [], []>} : vector<16x64xbf16>, vector<64x64xbf16>, vector<16x64xf32> -> vector<16x64xf32>
    %c16_34 = arith.constant 16 : index
    %c0_35 = arith.constant 0 : index
    %92 = vector.load %arg2[%c16_34, %c0_35] : memref<216x128xf32, #tpu.memory_space<vmem>>, vector<1x64xf32>
    %93 = vector.broadcast %92 : vector<1x64xf32> to vector<16x64xf32>
    %94 = arith.addf %91, %93 : vector<16x64xf32>
    %95 = arith.addf %27, %94 : vector<16x64xf32>
    %c208 = arith.constant 208 : index
    %c0_36 = arith.constant 0 : index
    %96 = vector.load %arg1[%c208, %c0_36] : memref<1104x256xbf16, #tpu.memory_space<vmem>>, vector<64x192xbf16>
    %97 = arith.truncf %95 : vector<16x64xf32> to vector<16x64xbf16>
    %cst_37 = arith.constant dense<0.000000e+00> : vector<16x192xf32>
    %98 = tpu.matmul %97, %96, %cst_37 {dimension_numbers = #tpu.dot_dimension_numbers<[1], [0], [0], [1], [0, 0, 1, 1], [], []>} : vector<16x64xbf16>, vector<64x192xbf16>, vector<16x192xf32> -> vector<16x192xf32>
    %99 = vector.extract_strided_slice %98 {offsets = [0, 0], sizes = [16, 64], strides = [1, 1]} : vector<16x192xf32> to vector<16x64xf32>
    %c1_i32_38 = arith.constant 1 : i32
    %100 = tpu.dynamic_rotate %99 by %c1_i32_38 dim 0 : vector<16x64xf32>, i32 -> vector<16x64xf32>
    %101 = vector.broadcast %54 : vector<16x1xf32> to vector<16x64xf32>
    %102 = arith.mulf %100, %101 : vector<16x64xf32>
    %103 = vector.extract_strided_slice %98 {offsets = [0, 64], sizes = [16, 64], strides = [1, 1]} : vector<16x192xf32> to vector<16x64xf32>
    %104 = arith.addf %102, %103 : vector<16x64xf32>
    %105 = vector.extract_strided_slice %98 {offsets = [0, 128], sizes = [16, 64], strides = [1, 1]} : vector<16x192xf32> to vector<16x64xf32>
    %c15_i32_39 = arith.constant 15 : i32
    %106 = tpu.dynamic_rotate %105 by %c15_i32_39 dim 0 : vector<16x64xf32>, i32 -> vector<16x64xf32>
    %107 = vector.broadcast %80 : vector<16x1xf32> to vector<16x64xf32>
    %108 = arith.mulf %106, %107 : vector<16x64xf32>
    %109 = arith.addf %104, %108 : vector<16x64xf32>
    %c24 = arith.constant 24 : index
    %c0_40 = arith.constant 0 : index
    %110 = vector.load %arg2[%c24, %c0_40] : memref<216x128xf32, #tpu.memory_space<vmem>>, vector<1x64xf32>
    %111 = vector.broadcast %110 : vector<1x64xf32> to vector<16x64xf32>
    %112 = arith.addf %109, %111 : vector<16x64xf32>
    %113 = vector.extract_strided_slice %112 {offsets = [0, 0], sizes = [16, 32], strides = [1, 1]} : vector<16x64xf32> to vector<16x32xf32>
    %114 = vector.extract_strided_slice %112 {offsets = [0, 32], sizes = [16, 32], strides = [1, 1]} : vector<16x64xf32> to vector<16x32xf32>
    %c272 = arith.constant 272 : index
    %c0_41 = arith.constant 0 : index
    %115 = vector.load %arg1[%c272, %c0_41] : memref<1104x256xbf16, #tpu.memory_space<vmem>>, vector<32x128xbf16>
    %116 = arith.truncf %114 : vector<16x32xf32> to vector<16x32xbf16>
    %cst_42 = arith.constant dense<0.000000e+00> : vector<16x128xf32>
    %117 = tpu.matmul %116, %115, %cst_42 {dimension_numbers = #tpu.dot_dimension_numbers<[1], [0], [0], [1], [0, 0, 1, 1], [], []>} : vector<16x32xbf16>, vector<32x128xbf16>, vector<16x128xf32> -> vector<16x128xf32>
    %118 = arith.truncf %117 : vector<16x128xf32> to vector<16x128xbf16>
    %c304 = arith.constant 304 : index
    %c0_43 = arith.constant 0 : index
    %119 = vector.load %arg1[%c304, %c0_43] : memref<1104x256xbf16, #tpu.memory_space<vmem>>, vector<8x16xbf16>
    %120 = vector.extract_strided_slice %118 {offsets = [0, 0], sizes = [16, 32], strides = [1, 1]} : vector<16x128xbf16> to vector<16x32xbf16>
    %cst_44 = arith.constant dense<0.000000e+00> : vector<8x32xf32>
    %121 = tpu.matmul %119, %120, %cst_44 {dimension_numbers = #tpu.dot_dimension_numbers<[1], [0], [0], [1], [0, 0, 1, 1], [], []>} : vector<8x16xbf16>, vector<16x32xbf16>, vector<8x32xf32> -> vector<8x32xf32>
    %c320 = arith.constant 320 : index
    %c0_45 = arith.constant 0 : index
    %122 = vector.load %arg1[%c320, %c0_45] : memref<1104x256xbf16, #tpu.memory_space<vmem>>, vector<8x16xbf16>
    %123 = vector.extract_strided_slice %118 {offsets = [0, 32], sizes = [16, 32], strides = [1, 1]} : vector<16x128xbf16> to vector<16x32xbf16>
    %cst_46 = arith.constant dense<0.000000e+00> : vector<8x32xf32>
    %124 = tpu.matmul %122, %123, %cst_46 {dimension_numbers = #tpu.dot_dimension_numbers<[1], [0], [0], [1], [0, 0, 1, 1], [], []>} : vector<8x16xbf16>, vector<16x32xbf16>, vector<8x32xf32> -> vector<8x32xf32>
    %125 = arith.addf %121, %124 : vector<8x32xf32>
    %c336 = arith.constant 336 : index
    %c0_47 = arith.constant 0 : index
    %126 = vector.load %arg1[%c336, %c0_47] : memref<1104x256xbf16, #tpu.memory_space<vmem>>, vector<8x16xbf16>
    %127 = vector.extract_strided_slice %118 {offsets = [0, 64], sizes = [16, 32], strides = [1, 1]} : vector<16x128xbf16> to vector<16x32xbf16>
    %cst_48 = arith.constant dense<0.000000e+00> : vector<8x32xf32>
    %128 = tpu.matmul %126, %127, %cst_48 {dimension_numbers = #tpu.dot_dimension_numbers<[1], [0], [0], [1], [0, 0, 1, 1], [], []>} : vector<8x16xbf16>, vector<16x32xbf16>, vector<8x32xf32> -> vector<8x32xf32>
    %129 = arith.addf %125, %128 : vector<8x32xf32>
    %c352 = arith.constant 352 : index
    %c0_49 = arith.constant 0 : index
    %130 = vector.load %arg1[%c352, %c0_49] : memref<1104x256xbf16, #tpu.memory_space<vmem>>, vector<8x16xbf16>
    %131 = vector.extract_strided_slice %118 {offsets = [0, 96], sizes = [16, 32], strides = [1, 1]} : vector<16x128xbf16> to vector<16x32xbf16>
    %cst_50 = arith.constant dense<0.000000e+00> : vector<8x32xf32>
    %132 = tpu.matmul %130, %131, %cst_50 {dimension_numbers = #tpu.dot_dimension_numbers<[1], [0], [0], [1], [0, 0, 1, 1], [], []>} : vector<8x16xbf16>, vector<16x32xbf16>, vector<8x32xf32> -> vector<8x32xf32>
    %133 = arith.addf %129, %132 : vector<8x32xf32>
    %c32_51 = arith.constant 32 : index
    %c0_52 = arith.constant 0 : index
    %134 = vector.load %arg2[%c32_51, %c0_52] : memref<216x128xf32, #tpu.memory_space<vmem>>, vector<1x32xf32>
    %135 = vector.broadcast %134 : vector<1x32xf32> to vector<8x32xf32>
    %136 = arith.addf %133, %135 : vector<8x32xf32>
    %cst_53 = arith.constant 0.000000e+00 : f32
    %137 = vector.broadcast %cst_53 : f32 to vector<8x32xf32>
    %138 = arith.maximumf %136, %137 : vector<8x32xf32>
    %c368 = arith.constant 368 : index
    %c0_54 = arith.constant 0 : index
    %139 = vector.load %arg1[%c368, %c0_54] : memref<1104x256xbf16, #tpu.memory_space<vmem>>, vector<32x96xbf16>
    %140 = arith.truncf %138 : vector<8x32xf32> to vector<8x32xbf16>
    %cst_55 = arith.constant dense<0.000000e+00> : vector<8x96xf32>
    %141 = tpu.matmul %140, %139, %cst_55 {dimension_numbers = #tpu.dot_dimension_numbers<[1], [0], [0], [1], [0, 0, 1, 1], [], []>} : vector<8x32xbf16>, vector<32x96xbf16>, vector<8x96xf32> -> vector<8x96xf32>
    %142 = vector.extract_strided_slice %141 {offsets = [0, 0], sizes = [8, 32], strides = [1, 1]} : vector<8x96xf32> to vector<8x32xf32>
    %c1_i32_56 = arith.constant 1 : i32
    %143 = tpu.dynamic_rotate %142 by %c1_i32_56 dim 0 : vector<8x32xf32>, i32 -> vector<8x32xf32>
    %144 = tpu.iota {dimensions = array<i32: 0>} : vector<8x1xi32>
    %c0_i32_57 = arith.constant 0 : i32
    %145 = vector.broadcast %c0_i32_57 : i32 to vector<8x1xi32>
    %c4_i32 = arith.constant 4 : i32
    %146 = vector.broadcast %c4_i32 : i32 to vector<8x1xi32>
    %147 = arith.cmpi sge, %144, %146 : vector<8x1xi32>
    %148 = arith.extui %147 : vector<8x1xi1> to vector<8x1xi32>
    %149 = arith.addi %145, %148 : vector<8x1xi32>
    %c4_i32_58 = arith.constant 4 : i32
    %150 = vector.broadcast %c4_i32_58 : i32 to vector<8x1xi32>
    %151 = arith.muli %149, %150 : vector<8x1xi32>
    %152 = arith.subi %144, %151 : vector<8x1xi32>
    %c-1_i32_59 = arith.constant -1 : i32
    %153 = vector.broadcast %c-1_i32_59 : i32 to vector<8x1xi32>
    %154 = arith.addi %152, %153 : vector<8x1xi32>
    %c0_i32_60 = arith.constant 0 : i32
    %155 = vector.broadcast %c0_i32_60 : i32 to vector<8x1xi32>
    %156 = arith.cmpi sge, %154, %155 : vector<8x1xi32>
    %c-1_i32_61 = arith.constant -1 : i32
    %157 = vector.broadcast %c-1_i32_61 : i32 to vector<8x1xi32>
    %158 = arith.addi %152, %157 : vector<8x1xi32>
    %c4_i32_62 = arith.constant 4 : i32
    %159 = vector.broadcast %c4_i32_62 : i32 to vector<8x1xi32>
    %160 = arith.cmpi slt, %158, %159 : vector<8x1xi32>
    %161 = arith.andi %156, %160 : vector<8x1xi1>
    %162 = arith.extui %161 : vector<8x1xi1> to vector<8x1xi32>
    %163 = arith.sitofp %162 : vector<8x1xi32> to vector<8x1xf32>
    %164 = vector.broadcast %163 : vector<8x1xf32> to vector<8x32xf32>
    %165 = arith.mulf %143, %164 : vector<8x32xf32>
    %166 = vector.extract_strided_slice %141 {offsets = [0, 32], sizes = [8, 32], strides = [1, 1]} : vector<8x96xf32> to vector<8x32xf32>
    %167 = arith.addf %165, %166 : vector<8x32xf32>
    %168 = vector.extract_strided_slice %141 {offsets = [0, 64], sizes = [8, 32], strides = [1, 1]} : vector<8x96xf32> to vector<8x32xf32>
    %c7_i32 = arith.constant 7 : i32
    %169 = tpu.dynamic_rotate %168 by %c7_i32 dim 0 : vector<8x32xf32>, i32 -> vector<8x32xf32>
    %170 = tpu.iota {dimensions = array<i32: 0>} : vector<8x1xi32>
    %c0_i32_63 = arith.constant 0 : i32
    %171 = vector.broadcast %c0_i32_63 : i32 to vector<8x1xi32>
    %c4_i32_64 = arith.constant 4 : i32
    %172 = vector.broadcast %c4_i32_64 : i32 to vector<8x1xi32>
    %173 = arith.cmpi sge, %170, %172 : vector<8x1xi32>
    %174 = arith.extui %173 : vector<8x1xi1> to vector<8x1xi32>
    %175 = arith.addi %171, %174 : vector<8x1xi32>
    %c4_i32_65 = arith.constant 4 : i32
    %176 = vector.broadcast %c4_i32_65 : i32 to vector<8x1xi32>
    %177 = arith.muli %175, %176 : vector<8x1xi32>
    %178 = arith.subi %170, %177 : vector<8x1xi32>
    %c1_i32_66 = arith.constant 1 : i32
    %179 = vector.broadcast %c1_i32_66 : i32 to vector<8x1xi32>
    %180 = arith.addi %178, %179 : vector<8x1xi32>
    %c0_i32_67 = arith.constant 0 : i32
    %181 = vector.broadcast %c0_i32_67 : i32 to vector<8x1xi32>
    %182 = arith.cmpi sge, %180, %181 : vector<8x1xi32>
    %c1_i32_68 = arith.constant 1 : i32
    %183 = vector.broadcast %c1_i32_68 : i32 to vector<8x1xi32>
    %184 = arith.addi %178, %183 : vector<8x1xi32>
    %c4_i32_69 = arith.constant 4 : i32
    %185 = vector.broadcast %c4_i32_69 : i32 to vector<8x1xi32>
    %186 = arith.cmpi slt, %184, %185 : vector<8x1xi32>
    %187 = arith.andi %182, %186 : vector<8x1xi1>
    %188 = arith.extui %187 : vector<8x1xi1> to vector<8x1xi32>
    %189 = arith.sitofp %188 : vector<8x1xi32> to vector<8x1xf32>
    %190 = vector.broadcast %189 : vector<8x1xf32> to vector<8x32xf32>
    %191 = arith.mulf %169, %190 : vector<8x32xf32>
    %192 = arith.addf %167, %191 : vector<8x32xf32>
    %c40 = arith.constant 40 : index
    %c0_70 = arith.constant 0 : index
    %193 = vector.load %arg2[%c40, %c0_70] : memref<216x128xf32, #tpu.memory_space<vmem>>, vector<1x32xf32>
    %194 = vector.broadcast %193 : vector<1x32xf32> to vector<8x32xf32>
    %195 = arith.addf %192, %194 : vector<8x32xf32>
    %cst_71 = arith.constant 0.000000e+00 : f32
    %196 = vector.broadcast %cst_71 : f32 to vector<8x32xf32>
    %197 = arith.maximumf %195, %196 : vector<8x32xf32>
    %c400 = arith.constant 400 : index
    %c0_72 = arith.constant 0 : index
    %198 = vector.load %arg1[%c400, %c0_72] : memref<1104x256xbf16, #tpu.memory_space<vmem>>, vector<32x32xbf16>
    %199 = arith.truncf %197 : vector<8x32xf32> to vector<8x32xbf16>
    %cst_73 = arith.constant dense<0.000000e+00> : vector<8x32xf32>
    %200 = tpu.matmul %199, %198, %cst_73 {dimension_numbers = #tpu.dot_dimension_numbers<[1], [0], [0], [1], [0, 0, 1, 1], [], []>} : vector<8x32xbf16>, vector<32x32xbf16>, vector<8x32xf32> -> vector<8x32xf32>
    %c48_74 = arith.constant 48 : index
    %c0_75 = arith.constant 0 : index
    %201 = vector.load %arg2[%c48_74, %c0_75] : memref<216x128xf32, #tpu.memory_space<vmem>>, vector<1x32xf32>
    %202 = vector.broadcast %201 : vector<1x32xf32> to vector<8x32xf32>
    %203 = arith.addf %200, %202 : vector<8x32xf32>
    %204 = arith.addf %136, %203 : vector<8x32xf32>
    %c432 = arith.constant 432 : index
    %c0_76 = arith.constant 0 : index
    %205 = vector.load %arg1[%c432, %c0_76] : memref<1104x256xbf16, #tpu.memory_space<vmem>>, vector<32x96xbf16>
    %206 = arith.truncf %204 : vector<8x32xf32> to vector<8x32xbf16>
    %cst_77 = arith.constant dense<0.000000e+00> : vector<8x96xf32>
    %207 = tpu.matmul %206, %205, %cst_77 {dimension_numbers = #tpu.dot_dimension_numbers<[1], [0], [0], [1], [0, 0, 1, 1], [], []>} : vector<8x32xbf16>, vector<32x96xbf16>, vector<8x96xf32> -> vector<8x96xf32>
    %208 = vector.extract_strided_slice %207 {offsets = [0, 0], sizes = [8, 32], strides = [1, 1]} : vector<8x96xf32> to vector<8x32xf32>
    %c1_i32_78 = arith.constant 1 : i32
    %209 = tpu.dynamic_rotate %208 by %c1_i32_78 dim 0 : vector<8x32xf32>, i32 -> vector<8x32xf32>
    %210 = vector.broadcast %163 : vector<8x1xf32> to vector<8x32xf32>
    %211 = arith.mulf %209, %210 : vector<8x32xf32>
    %212 = vector.extract_strided_slice %207 {offsets = [0, 32], sizes = [8, 32], strides = [1, 1]} : vector<8x96xf32> to vector<8x32xf32>
    %213 = arith.addf %211, %212 : vector<8x32xf32>
    %214 = vector.extract_strided_slice %207 {offsets = [0, 64], sizes = [8, 32], strides = [1, 1]} : vector<8x96xf32> to vector<8x32xf32>
    %c7_i32_79 = arith.constant 7 : i32
    %215 = tpu.dynamic_rotate %214 by %c7_i32_79 dim 0 : vector<8x32xf32>, i32 -> vector<8x32xf32>
    %216 = vector.broadcast %189 : vector<8x1xf32> to vector<8x32xf32>
    %217 = arith.mulf %215, %216 : vector<8x32xf32>
    %218 = arith.addf %213, %217 : vector<8x32xf32>
    %c56 = arith.constant 56 : index
    %c0_80 = arith.constant 0 : index
    %219 = vector.load %arg2[%c56, %c0_80] : memref<216x128xf32, #tpu.memory_space<vmem>>, vector<1x32xf32>
    %220 = vector.broadcast %219 : vector<1x32xf32> to vector<8x32xf32>
    %221 = arith.addf %218, %220 : vector<8x32xf32>
    %c64_81 = arith.constant 64 : index
    %c0_82 = arith.constant 0 : index
    %222 = vector.load %arg2[%c64_81, %c0_82] : memref<216x128xf32, #tpu.memory_space<vmem>>, vector<32x32xf32>
    %c96 = arith.constant 96 : index
    %c0_83 = arith.constant 0 : index
    %223 = vector.load %arg2[%c96, %c0_83] : memref<216x128xf32, #tpu.memory_space<vmem>>, vector<1x32xf32>
    %cst_84 = arith.constant dense<0.000000e+00> : vector<16x32xf32>
    %224 = tpu.matmul %113, %222, %cst_84 {dimension_numbers = #tpu.dot_dimension_numbers<[1], [1], [0], [0], [0, 0, 1, 0], [], []>} : vector<16x32xf32>, vector<32x32xf32>, vector<16x32xf32> -> vector<16x32xf32>
    %225 = arith.mulf %113, %113 : vector<16x32xf32>
    %cst_85 = arith.constant dense<0.000000e+00> : vector<16xf32>
    %226 = vector.multi_reduction <add>, %225, %cst_85 [1] : vector<16x32xf32> to vector<16xf32>
    %227 = vector.shape_cast %226 : vector<16xf32> to vector<16x1xf32>
    %cst_86 = arith.constant 2.000000e+00 : f32
    %228 = vector.broadcast %cst_86 : f32 to vector<16x32xf32>
    %229 = arith.mulf %228, %224 : vector<16x32xf32>
    %230 = vector.broadcast %227 : vector<16x1xf32> to vector<16x32xf32>
    %231 = arith.subf %230, %229 : vector<16x32xf32>
    %232 = vector.broadcast %223 : vector<1x32xf32> to vector<16x32xf32>
    %233 = arith.addf %231, %232 : vector<16x32xf32>
    %cst_87 = arith.constant dense<0x7F800000> : vector<16xf32>
    %234 = vector.multi_reduction <minimumf>, %233, %cst_87 [1] : vector<16x32xf32> to vector<16xf32>
    %235 = vector.shape_cast %234 : vector<16xf32> to vector<16x1xf32>
    %236 = tpu.iota {dimensions = array<i32: 1>} : vector<16x32xi32>
    %237 = vector.broadcast %235 : vector<16x1xf32> to vector<16x32xf32>
    %238 = arith.cmpf oeq, %233, %237 : vector<16x32xf32>
    %c32_i32 = arith.constant 32 : i32
    %239 = vector.broadcast %c32_i32 : i32 to vector<16x32xi32>
    %240 = arith.select %238, %236, %239 : vector<16x32xi1>, vector<16x32xi32>
    %cst_88 = arith.constant dense<2147483647> : vector<16xi32>
    %241 = vector.multi_reduction <minsi>, %240, %cst_88 [1] : vector<16x32xi32> to vector<16xi32>
    %242 = vector.shape_cast %241 : vector<16xi32> to vector<16x1xi32>
    %243 = vector.broadcast %242 : vector<16x1xi32> to vector<16x32xi32>
    %244 = arith.cmpi eq, %236, %243 : vector<16x32xi32>
    %245 = arith.extui %244 : vector<16x32xi1> to vector<16x32xi32>
    %246 = arith.sitofp %245 : vector<16x32xi32> to vector<16x32xf32>
    %247 = arith.truncf %246 : vector<16x32xf32> to vector<16x32xbf16>
    %248 = arith.truncf %222 : vector<32x32xf32> to vector<32x32xbf16>
    %cst_89 = arith.constant dense<0.000000e+00> : vector<16x32xf32>
    %249 = tpu.matmul %247, %248, %cst_89 {dimension_numbers = #tpu.dot_dimension_numbers<[1], [0], [0], [1], [0, 0, 1, 1], [], []>} : vector<16x32xbf16>, vector<32x32xbf16>, vector<16x32xf32> -> vector<16x32xf32>
    %250 = arith.subf %249, %113 : vector<16x32xf32>
    %251 = arith.mulf %250, %250 : vector<16x32xf32>
    %252 = vector.shape_cast %251 : vector<16x32xf32> to vector<1x16x32xf32>
    %cst_90 = arith.constant dense<0.000000e+00> : vector<1xf32>
    %253 = vector.multi_reduction <add>, %252, %cst_90 [1, 2] : vector<1x16x32xf32> to vector<1xf32>
    %254 = vector.shape_cast %253 : vector<1xf32> to vector<1x1x1xf32>
    %255 = vector.extract %254[0, 0, 0] : f32 from vector<1x1x1xf32>
    %cst_91 = arith.constant 0.001953125 : f32
    %256 = arith.mulf %255, %cst_91 : f32
    %257 = vector.shape_cast %235 : vector<16x1xf32> to vector<1x16x1xf32>
    %cst_92 = arith.constant dense<0.000000e+00> : vector<1xf32>
    %258 = vector.multi_reduction <add>, %257, %cst_92 [1, 2] : vector<1x16x1xf32> to vector<1xf32>
    %259 = vector.shape_cast %258 : vector<1xf32> to vector<1x1x1xf32>
    %260 = vector.extract %259[0, 0, 0] : f32 from vector<1x1x1xf32>
    %cst_93 = arith.constant 1.600000e+01 : f32
    %261 = arith.divf %260, %cst_93 : f32
    %262 = vector.shape_cast %113 : vector<16x32xf32> to vector<1x16x32xf32>
    %cst_94 = arith.constant dense<0.000000e+00> : vector<1xf32>
    %263 = vector.multi_reduction <add>, %262, %cst_94 [1, 2] : vector<1x16x32xf32> to vector<1xf32>
    %264 = vector.shape_cast %263 : vector<1xf32> to vector<1x1x1xf32>
    %265 = vector.extract %264[0, 0, 0] : f32 from vector<1x1x1xf32>
    %cst_95 = arith.constant 5.120000e+02 : f32
    %266 = arith.divf %265, %cst_95 : f32
    %267 = vector.broadcast %266 : f32 to vector<16x32xf32>
    %268 = arith.subf %113, %267 : vector<16x32xf32>
    %269 = arith.mulf %268, %268 : vector<16x32xf32>
    %270 = vector.shape_cast %269 : vector<16x32xf32> to vector<1x16x32xf32>
    %cst_96 = arith.constant dense<0.000000e+00> : vector<1xf32>
    %271 = vector.multi_reduction <add>, %270, %cst_96 [1, 2] : vector<1x16x32xf32> to vector<1xf32>
    %272 = vector.shape_cast %271 : vector<1xf32> to vector<1x1x1xf32>
    %273 = vector.extract %272[0, 0, 0] : f32 from vector<1x1x1xf32>
    %274 = math.sqrt %273 : f32
    %cst_97 = arith.constant 0.0441941731 : f32
    %275 = arith.mulf %274, %cst_97 : f32
    %c104 = arith.constant 104 : index
    %c0_98 = arith.constant 0 : index
    %276 = vector.load %arg2[%c104, %c0_98] : memref<216x128xf32, #tpu.memory_space<vmem>>, vector<32x32xf32>
    %c136 = arith.constant 136 : index
    %c0_99 = arith.constant 0 : index
    %277 = vector.load %arg2[%c136, %c0_99] : memref<216x128xf32, #tpu.memory_space<vmem>>, vector<1x32xf32>
    %cst_100 = arith.constant dense<0.000000e+00> : vector<8x32xf32>
    %278 = tpu.matmul %221, %276, %cst_100 {dimension_numbers = #tpu.dot_dimension_numbers<[1], [1], [0], [0], [0, 0, 1, 0], [], []>} : vector<8x32xf32>, vector<32x32xf32>, vector<8x32xf32> -> vector<8x32xf32>
    %279 = arith.mulf %221, %221 : vector<8x32xf32>
    %cst_101 = arith.constant dense<0.000000e+00> : vector<8xf32>
    %280 = vector.multi_reduction <add>, %279, %cst_101 [1] : vector<8x32xf32> to vector<8xf32>
    %281 = vector.shape_cast %280 : vector<8xf32> to vector<8x1xf32>
    %cst_102 = arith.constant 2.000000e+00 : f32
    %282 = vector.broadcast %cst_102 : f32 to vector<8x32xf32>
    %283 = arith.mulf %282, %278 : vector<8x32xf32>
    %284 = vector.broadcast %281 : vector<8x1xf32> to vector<8x32xf32>
    %285 = arith.subf %284, %283 : vector<8x32xf32>
    %286 = vector.broadcast %277 : vector<1x32xf32> to vector<8x32xf32>
    %287 = arith.addf %285, %286 : vector<8x32xf32>
    %cst_103 = arith.constant dense<0x7F800000> : vector<8xf32>
    %288 = vector.multi_reduction <minimumf>, %287, %cst_103 [1] : vector<8x32xf32> to vector<8xf32>
    %289 = vector.shape_cast %288 : vector<8xf32> to vector<8x1xf32>
    %290 = tpu.iota {dimensions = array<i32: 1>} : vector<8x32xi32>
    %291 = vector.broadcast %289 : vector<8x1xf32> to vector<8x32xf32>
    %292 = arith.cmpf oeq, %287, %291 : vector<8x32xf32>
    %c32_i32_104 = arith.constant 32 : i32
    %293 = vector.broadcast %c32_i32_104 : i32 to vector<8x32xi32>
    %294 = arith.select %292, %290, %293 : vector<8x32xi1>, vector<8x32xi32>
    %cst_105 = arith.constant dense<2147483647> : vector<8xi32>
    %295 = vector.multi_reduction <minsi>, %294, %cst_105 [1] : vector<8x32xi32> to vector<8xi32>
    %296 = vector.shape_cast %295 : vector<8xi32> to vector<8x1xi32>
    %297 = vector.broadcast %296 : vector<8x1xi32> to vector<8x32xi32>
    %298 = arith.cmpi eq, %290, %297 : vector<8x32xi32>
    %299 = arith.extui %298 : vector<8x32xi1> to vector<8x32xi32>
    %300 = arith.sitofp %299 : vector<8x32xi32> to vector<8x32xf32>
    %301 = arith.truncf %300 : vector<8x32xf32> to vector<8x32xbf16>
    %302 = arith.truncf %276 : vector<32x32xf32> to vector<32x32xbf16>
    %cst_106 = arith.constant dense<0.000000e+00> : vector<8x32xf32>
    %303 = tpu.matmul %301, %302, %cst_106 {dimension_numbers = #tpu.dot_dimension_numbers<[1], [0], [0], [1], [0, 0, 1, 1], [], []>} : vector<8x32xbf16>, vector<32x32xbf16>, vector<8x32xf32> -> vector<8x32xf32>
    %304 = arith.subf %303, %221 : vector<8x32xf32>
    %305 = arith.mulf %304, %304 : vector<8x32xf32>
    %306 = vector.shape_cast %305 : vector<8x32xf32> to vector<1x8x32xf32>
    %cst_107 = arith.constant dense<0.000000e+00> : vector<1xf32>
    %307 = vector.multi_reduction <add>, %306, %cst_107 [1, 2] : vector<1x8x32xf32> to vector<1xf32>
    %308 = vector.shape_cast %307 : vector<1xf32> to vector<1x1x1xf32>
    %309 = vector.extract %308[0, 0, 0] : f32 from vector<1x1x1xf32>
    %cst_108 = arith.constant 3.906250e-03 : f32
    %310 = arith.mulf %309, %cst_108 : f32
    %311 = vector.shape_cast %289 : vector<8x1xf32> to vector<1x8x1xf32>
    %cst_109 = arith.constant dense<0.000000e+00> : vector<1xf32>
    %312 = vector.multi_reduction <add>, %311, %cst_109 [1, 2] : vector<1x8x1xf32> to vector<1xf32>
    %313 = vector.shape_cast %312 : vector<1xf32> to vector<1x1x1xf32>
    %314 = vector.extract %313[0, 0, 0] : f32 from vector<1x1x1xf32>
    %cst_110 = arith.constant 8.000000e+00 : f32
    %315 = arith.divf %314, %cst_110 : f32
    %316 = vector.shape_cast %221 : vector<8x32xf32> to vector<1x8x32xf32>
    %cst_111 = arith.constant dense<0.000000e+00> : vector<1xf32>
    %317 = vector.multi_reduction <add>, %316, %cst_111 [1, 2] : vector<1x8x32xf32> to vector<1xf32>
    %318 = vector.shape_cast %317 : vector<1xf32> to vector<1x1x1xf32>
    %319 = vector.extract %318[0, 0, 0] : f32 from vector<1x1x1xf32>
    %cst_112 = arith.constant 2.560000e+02 : f32
    %320 = arith.divf %319, %cst_112 : f32
    %321 = vector.broadcast %320 : f32 to vector<8x32xf32>
    %322 = arith.subf %221, %321 : vector<8x32xf32>
    %323 = arith.mulf %322, %322 : vector<8x32xf32>
    %324 = vector.shape_cast %323 : vector<8x32xf32> to vector<1x8x32xf32>
    %cst_113 = arith.constant dense<0.000000e+00> : vector<1xf32>
    %325 = vector.multi_reduction <add>, %324, %cst_113 [1, 2] : vector<1x8x32xf32> to vector<1xf32>
    %326 = vector.shape_cast %325 : vector<1xf32> to vector<1x1x1xf32>
    %327 = vector.extract %326[0, 0, 0] : f32 from vector<1x1x1xf32>
    %328 = math.sqrt %327 : f32
    %cst_114 = arith.constant 6.250000e-02 : f32
    %329 = arith.mulf %328, %cst_114 : f32
    %c464 = arith.constant 464 : index
    %c0_115 = arith.constant 0 : index
    %330 = vector.load %arg1[%c464, %c0_115] : memref<1104x256xbf16, #tpu.memory_space<vmem>>, vector<32x96xbf16>
    %331 = arith.truncf %303 : vector<8x32xf32> to vector<8x32xbf16>
    %cst_116 = arith.constant dense<0.000000e+00> : vector<8x96xf32>
    %332 = tpu.matmul %331, %330, %cst_116 {dimension_numbers = #tpu.dot_dimension_numbers<[1], [0], [0], [1], [0, 0, 1, 1], [], []>} : vector<8x32xbf16>, vector<32x96xbf16>, vector<8x96xf32> -> vector<8x96xf32>
    %333 = vector.extract_strided_slice %332 {offsets = [0, 0], sizes = [8, 32], strides = [1, 1]} : vector<8x96xf32> to vector<8x32xf32>
    %c1_i32_117 = arith.constant 1 : i32
    %334 = tpu.dynamic_rotate %333 by %c1_i32_117 dim 0 : vector<8x32xf32>, i32 -> vector<8x32xf32>
    %335 = vector.broadcast %163 : vector<8x1xf32> to vector<8x32xf32>
    %336 = arith.mulf %334, %335 : vector<8x32xf32>
    %337 = vector.extract_strided_slice %332 {offsets = [0, 32], sizes = [8, 32], strides = [1, 1]} : vector<8x96xf32> to vector<8x32xf32>
    %338 = arith.addf %336, %337 : vector<8x32xf32>
    %339 = vector.extract_strided_slice %332 {offsets = [0, 64], sizes = [8, 32], strides = [1, 1]} : vector<8x96xf32> to vector<8x32xf32>
    %c7_i32_118 = arith.constant 7 : i32
    %340 = tpu.dynamic_rotate %339 by %c7_i32_118 dim 0 : vector<8x32xf32>, i32 -> vector<8x32xf32>
    %341 = vector.broadcast %189 : vector<8x1xf32> to vector<8x32xf32>
    %342 = arith.mulf %340, %341 : vector<8x32xf32>
    %343 = arith.addf %338, %342 : vector<8x32xf32>
    %c144_119 = arith.constant 144 : index
    %c0_120 = arith.constant 0 : index
    %344 = vector.load %arg2[%c144_119, %c0_120] : memref<216x128xf32, #tpu.memory_space<vmem>>, vector<1x32xf32>
    %345 = vector.broadcast %344 : vector<1x32xf32> to vector<8x32xf32>
    %346 = arith.addf %343, %345 : vector<8x32xf32>
    %cst_121 = arith.constant 0.000000e+00 : f32
    %347 = vector.broadcast %cst_121 : f32 to vector<8x32xf32>
    %348 = arith.maximumf %346, %347 : vector<8x32xf32>
    %c496 = arith.constant 496 : index
    %c0_122 = arith.constant 0 : index
    %349 = vector.load %arg1[%c496, %c0_122] : memref<1104x256xbf16, #tpu.memory_space<vmem>>, vector<32x96xbf16>
    %350 = arith.truncf %348 : vector<8x32xf32> to vector<8x32xbf16>
    %cst_123 = arith.constant dense<0.000000e+00> : vector<8x96xf32>
    %351 = tpu.matmul %350, %349, %cst_123 {dimension_numbers = #tpu.dot_dimension_numbers<[1], [0], [0], [1], [0, 0, 1, 1], [], []>} : vector<8x32xbf16>, vector<32x96xbf16>, vector<8x96xf32> -> vector<8x96xf32>
    %352 = vector.extract_strided_slice %351 {offsets = [0, 0], sizes = [8, 32], strides = [1, 1]} : vector<8x96xf32> to vector<8x32xf32>
    %c1_i32_124 = arith.constant 1 : i32
    %353 = tpu.dynamic_rotate %352 by %c1_i32_124 dim 0 : vector<8x32xf32>, i32 -> vector<8x32xf32>
    %354 = vector.broadcast %163 : vector<8x1xf32> to vector<8x32xf32>
    %355 = arith.mulf %353, %354 : vector<8x32xf32>
    %356 = vector.extract_strided_slice %351 {offsets = [0, 32], sizes = [8, 32], strides = [1, 1]} : vector<8x96xf32> to vector<8x32xf32>
    %357 = arith.addf %355, %356 : vector<8x32xf32>
    %358 = vector.extract_strided_slice %351 {offsets = [0, 64], sizes = [8, 32], strides = [1, 1]} : vector<8x96xf32> to vector<8x32xf32>
    %c7_i32_125 = arith.constant 7 : i32
    %359 = tpu.dynamic_rotate %358 by %c7_i32_125 dim 0 : vector<8x32xf32>, i32 -> vector<8x32xf32>
    %360 = vector.broadcast %189 : vector<8x1xf32> to vector<8x32xf32>
    %361 = arith.mulf %359, %360 : vector<8x32xf32>
    %362 = arith.addf %357, %361 : vector<8x32xf32>
    %c152 = arith.constant 152 : index
    %c0_126 = arith.constant 0 : index
    %363 = vector.load %arg2[%c152, %c0_126] : memref<216x128xf32, #tpu.memory_space<vmem>>, vector<1x32xf32>
    %364 = vector.broadcast %363 : vector<1x32xf32> to vector<8x32xf32>
    %365 = arith.addf %362, %364 : vector<8x32xf32>
    %cst_127 = arith.constant 0.000000e+00 : f32
    %366 = vector.broadcast %cst_127 : f32 to vector<8x32xf32>
    %367 = arith.maximumf %365, %366 : vector<8x32xf32>
    %c528 = arith.constant 528 : index
    %c0_128 = arith.constant 0 : index
    %368 = vector.load %arg1[%c528, %c0_128] : memref<1104x256xbf16, #tpu.memory_space<vmem>>, vector<32x32xbf16>
    %369 = arith.truncf %367 : vector<8x32xf32> to vector<8x32xbf16>
    %cst_129 = arith.constant dense<0.000000e+00> : vector<8x32xf32>
    %370 = tpu.matmul %369, %368, %cst_129 {dimension_numbers = #tpu.dot_dimension_numbers<[1], [0], [0], [1], [0, 0, 1, 1], [], []>} : vector<8x32xbf16>, vector<32x32xbf16>, vector<8x32xf32> -> vector<8x32xf32>
    %c160 = arith.constant 160 : index
    %c0_130 = arith.constant 0 : index
    %371 = vector.load %arg2[%c160, %c0_130] : memref<216x128xf32, #tpu.memory_space<vmem>>, vector<1x32xf32>
    %372 = vector.broadcast %371 : vector<1x32xf32> to vector<8x32xf32>
    %373 = arith.addf %370, %372 : vector<8x32xf32>
    %374 = arith.addf %346, %373 : vector<8x32xf32>
    %c560 = arith.constant 560 : index
    %c0_131 = arith.constant 0 : index
    %375 = vector.load %arg1[%c560, %c0_131] : memref<1104x256xbf16, #tpu.memory_space<vmem>>, vector<32x128xbf16>
    %376 = arith.truncf %374 : vector<8x32xf32> to vector<8x32xbf16>
    %cst_132 = arith.constant dense<0.000000e+00> : vector<8x128xf32>
    %377 = tpu.matmul %376, %375, %cst_132 {dimension_numbers = #tpu.dot_dimension_numbers<[1], [0], [0], [1], [0, 0, 1, 1], [], []>} : vector<8x32xbf16>, vector<32x128xbf16>, vector<8x128xf32> -> vector<8x128xf32>
    %378 = arith.truncf %377 : vector<8x128xf32> to vector<8x128xbf16>
    %c592 = arith.constant 592 : index
    %c0_133 = arith.constant 0 : index
    %379 = vector.load %arg1[%c592, %c0_133] : memref<1104x256xbf16, #tpu.memory_space<vmem>>, vector<16x8xbf16>
    %380 = vector.extract_strided_slice %378 {offsets = [0, 0], sizes = [8, 32], strides = [1, 1]} : vector<8x128xbf16> to vector<8x32xbf16>
    %cst_134 = arith.constant dense<0.000000e+00> : vector<16x32xf32>
    %381 = tpu.matmul %379, %380, %cst_134 {dimension_numbers = #tpu.dot_dimension_numbers<[1], [0], [0], [1], [0, 0, 1, 1], [], []>} : vector<16x8xbf16>, vector<8x32xbf16>, vector<16x32xf32> -> vector<16x32xf32>
    %c608 = arith.constant 608 : index
    %c0_135 = arith.constant 0 : index
    %382 = vector.load %arg1[%c608, %c0_135] : memref<1104x256xbf16, #tpu.memory_space<vmem>>, vector<16x8xbf16>
    %383 = vector.extract_strided_slice %378 {offsets = [0, 32], sizes = [8, 32], strides = [1, 1]} : vector<8x128xbf16> to vector<8x32xbf16>
    %cst_136 = arith.constant dense<0.000000e+00> : vector<16x32xf32>
    %384 = tpu.matmul %382, %383, %cst_136 {dimension_numbers = #tpu.dot_dimension_numbers<[1], [0], [0], [1], [0, 0, 1, 1], [], []>} : vector<16x8xbf16>, vector<8x32xbf16>, vector<16x32xf32> -> vector<16x32xf32>
    %385 = arith.addf %381, %384 : vector<16x32xf32>
    %c624 = arith.constant 624 : index
    %c0_137 = arith.constant 0 : index
    %386 = vector.load %arg1[%c624, %c0_137] : memref<1104x256xbf16, #tpu.memory_space<vmem>>, vector<16x8xbf16>
    %387 = vector.extract_strided_slice %378 {offsets = [0, 64], sizes = [8, 32], strides = [1, 1]} : vector<8x128xbf16> to vector<8x32xbf16>
    %cst_138 = arith.constant dense<0.000000e+00> : vector<16x32xf32>
    %388 = tpu.matmul %386, %387, %cst_138 {dimension_numbers = #tpu.dot_dimension_numbers<[1], [0], [0], [1], [0, 0, 1, 1], [], []>} : vector<16x8xbf16>, vector<8x32xbf16>, vector<16x32xf32> -> vector<16x32xf32>
    %389 = arith.addf %385, %388 : vector<16x32xf32>
    %c640 = arith.constant 640 : index
    %c0_139 = arith.constant 0 : index
    %390 = vector.load %arg1[%c640, %c0_139] : memref<1104x256xbf16, #tpu.memory_space<vmem>>, vector<16x8xbf16>
    %391 = vector.extract_strided_slice %378 {offsets = [0, 96], sizes = [8, 32], strides = [1, 1]} : vector<8x128xbf16> to vector<8x32xbf16>
    %cst_140 = arith.constant dense<0.000000e+00> : vector<16x32xf32>
    %392 = tpu.matmul %390, %391, %cst_140 {dimension_numbers = #tpu.dot_dimension_numbers<[1], [0], [0], [1], [0, 0, 1, 1], [], []>} : vector<16x8xbf16>, vector<8x32xbf16>, vector<16x32xf32> -> vector<16x32xf32>
    %393 = arith.addf %389, %392 : vector<16x32xf32>
    %c168 = arith.constant 168 : index
    %c0_141 = arith.constant 0 : index
    %394 = vector.load %arg2[%c168, %c0_141] : memref<216x128xf32, #tpu.memory_space<vmem>>, vector<1x32xf32>
    %395 = vector.broadcast %394 : vector<1x32xf32> to vector<16x32xf32>
    %396 = arith.addf %393, %395 : vector<16x32xf32>
    %397 = tpu.concatenate %249, %396 in 1 : vector<16x32xf32>, vector<16x32xf32> -> vector<16x64xf32>
    %c656 = arith.constant 656 : index
    %c0_142 = arith.constant 0 : index
    %398 = vector.load %arg1[%c656, %c0_142] : memref<1104x256xbf16, #tpu.memory_space<vmem>>, vector<64x192xbf16>
    %399 = arith.truncf %397 : vector<16x64xf32> to vector<16x64xbf16>
    %cst_143 = arith.constant dense<0.000000e+00> : vector<16x192xf32>
    %400 = tpu.matmul %399, %398, %cst_143 {dimension_numbers = #tpu.dot_dimension_numbers<[1], [0], [0], [1], [0, 0, 1, 1], [], []>} : vector<16x64xbf16>, vector<64x192xbf16>, vector<16x192xf32> -> vector<16x192xf32>
    %401 = vector.extract_strided_slice %400 {offsets = [0, 0], sizes = [16, 64], strides = [1, 1]} : vector<16x192xf32> to vector<16x64xf32>
    %c1_i32_144 = arith.constant 1 : i32
    %402 = tpu.dynamic_rotate %401 by %c1_i32_144 dim 0 : vector<16x64xf32>, i32 -> vector<16x64xf32>
    %403 = vector.broadcast %54 : vector<16x1xf32> to vector<16x64xf32>
    %404 = arith.mulf %402, %403 : vector<16x64xf32>
    %405 = vector.extract_strided_slice %400 {offsets = [0, 64], sizes = [16, 64], strides = [1, 1]} : vector<16x192xf32> to vector<16x64xf32>
    %406 = arith.addf %404, %405 : vector<16x64xf32>
    %407 = vector.extract_strided_slice %400 {offsets = [0, 128], sizes = [16, 64], strides = [1, 1]} : vector<16x192xf32> to vector<16x64xf32>
    %c15_i32_145 = arith.constant 15 : i32
    %408 = tpu.dynamic_rotate %407 by %c15_i32_145 dim 0 : vector<16x64xf32>, i32 -> vector<16x64xf32>
    %409 = vector.broadcast %80 : vector<16x1xf32> to vector<16x64xf32>
    %410 = arith.mulf %408, %409 : vector<16x64xf32>
    %411 = arith.addf %406, %410 : vector<16x64xf32>
    %c176 = arith.constant 176 : index
    %c0_146 = arith.constant 0 : index
    %412 = vector.load %arg2[%c176, %c0_146] : memref<216x128xf32, #tpu.memory_space<vmem>>, vector<1x64xf32>
    %413 = vector.broadcast %412 : vector<1x64xf32> to vector<16x64xf32>
    %414 = arith.addf %411, %413 : vector<16x64xf32>
    %cst_147 = arith.constant 0.000000e+00 : f32
    %415 = vector.broadcast %cst_147 : f32 to vector<16x64xf32>
    %416 = arith.maximumf %414, %415 : vector<16x64xf32>
    %c720 = arith.constant 720 : index
    %c0_148 = arith.constant 0 : index
    %417 = vector.load %arg1[%c720, %c0_148] : memref<1104x256xbf16, #tpu.memory_space<vmem>>, vector<64x192xbf16>
    %418 = arith.truncf %416 : vector<16x64xf32> to vector<16x64xbf16>
    %cst_149 = arith.constant dense<0.000000e+00> : vector<16x192xf32>
    %419 = tpu.matmul %418, %417, %cst_149 {dimension_numbers = #tpu.dot_dimension_numbers<[1], [0], [0], [1], [0, 0, 1, 1], [], []>} : vector<16x64xbf16>, vector<64x192xbf16>, vector<16x192xf32> -> vector<16x192xf32>
    %420 = vector.extract_strided_slice %419 {offsets = [0, 0], sizes = [16, 64], strides = [1, 1]} : vector<16x192xf32> to vector<16x64xf32>
    %c1_i32_150 = arith.constant 1 : i32
    %421 = tpu.dynamic_rotate %420 by %c1_i32_150 dim 0 : vector<16x64xf32>, i32 -> vector<16x64xf32>
    %422 = vector.broadcast %54 : vector<16x1xf32> to vector<16x64xf32>
    %423 = arith.mulf %421, %422 : vector<16x64xf32>
    %424 = vector.extract_strided_slice %419 {offsets = [0, 64], sizes = [16, 64], strides = [1, 1]} : vector<16x192xf32> to vector<16x64xf32>
    %425 = arith.addf %423, %424 : vector<16x64xf32>
    %426 = vector.extract_strided_slice %419 {offsets = [0, 128], sizes = [16, 64], strides = [1, 1]} : vector<16x192xf32> to vector<16x64xf32>
    %c15_i32_151 = arith.constant 15 : i32
    %427 = tpu.dynamic_rotate %426 by %c15_i32_151 dim 0 : vector<16x64xf32>, i32 -> vector<16x64xf32>
    %428 = vector.broadcast %80 : vector<16x1xf32> to vector<16x64xf32>
    %429 = arith.mulf %427, %428 : vector<16x64xf32>
    %430 = arith.addf %425, %429 : vector<16x64xf32>
    %c184 = arith.constant 184 : index
    %c0_152 = arith.constant 0 : index
    %431 = vector.load %arg2[%c184, %c0_152] : memref<216x128xf32, #tpu.memory_space<vmem>>, vector<1x64xf32>
    %432 = vector.broadcast %431 : vector<1x64xf32> to vector<16x64xf32>
    %433 = arith.addf %430, %432 : vector<16x64xf32>
    %cst_153 = arith.constant 0.000000e+00 : f32
    %434 = vector.broadcast %cst_153 : f32 to vector<16x64xf32>
    %435 = arith.maximumf %433, %434 : vector<16x64xf32>
    %c784 = arith.constant 784 : index
    %c0_154 = arith.constant 0 : index
    %436 = vector.load %arg1[%c784, %c0_154] : memref<1104x256xbf16, #tpu.memory_space<vmem>>, vector<64x64xbf16>
    %437 = arith.truncf %435 : vector<16x64xf32> to vector<16x64xbf16>
    %cst_155 = arith.constant dense<0.000000e+00> : vector<16x64xf32>
    %438 = tpu.matmul %437, %436, %cst_155 {dimension_numbers = #tpu.dot_dimension_numbers<[1], [0], [0], [1], [0, 0, 1, 1], [], []>} : vector<16x64xbf16>, vector<64x64xbf16>, vector<16x64xf32> -> vector<16x64xf32>
    %c192 = arith.constant 192 : index
    %c0_156 = arith.constant 0 : index
    %439 = vector.load %arg2[%c192, %c0_156] : memref<216x128xf32, #tpu.memory_space<vmem>>, vector<1x64xf32>
    %440 = vector.broadcast %439 : vector<1x64xf32> to vector<16x64xf32>
    %441 = arith.addf %438, %440 : vector<16x64xf32>
    %442 = arith.addf %414, %441 : vector<16x64xf32>
    %c848 = arith.constant 848 : index
    %c0_157 = arith.constant 0 : index
    %443 = vector.load %arg1[%c848, %c0_157] : memref<1104x256xbf16, #tpu.memory_space<vmem>>, vector<64x256xbf16>
    %444 = arith.truncf %442 : vector<16x64xf32> to vector<16x64xbf16>
    %cst_158 = arith.constant dense<0.000000e+00> : vector<16x256xf32>
    %445 = tpu.matmul %444, %443, %cst_158 {dimension_numbers = #tpu.dot_dimension_numbers<[1], [0], [0], [1], [0, 0, 1, 1], [], []>} : vector<16x64xbf16>, vector<64x256xbf16>, vector<16x256xf32> -> vector<16x256xf32>
    %446 = arith.truncf %445 : vector<16x256xf32> to vector<16x256xbf16>
    %c912 = arith.constant 912 : index
    %c0_159 = arith.constant 0 : index
    %447 = vector.load %arg1[%c912, %c0_159] : memref<1104x256xbf16, #tpu.memory_space<vmem>>, vector<32x16xbf16>
    %448 = vector.extract_strided_slice %446 {offsets = [0, 0], sizes = [16, 64], strides = [1, 1]} : vector<16x256xbf16> to vector<16x64xbf16>
    %cst_160 = arith.constant dense<0.000000e+00> : vector<32x64xf32>
    %449 = tpu.matmul %447, %448, %cst_160 {dimension_numbers = #tpu.dot_dimension_numbers<[1], [0], [0], [1], [0, 0, 1, 1], [], []>} : vector<32x16xbf16>, vector<16x64xbf16>, vector<32x64xf32> -> vector<32x64xf32>
    %c944 = arith.constant 944 : index
    %c0_161 = arith.constant 0 : index
    %450 = vector.load %arg1[%c944, %c0_161] : memref<1104x256xbf16, #tpu.memory_space<vmem>>, vector<32x16xbf16>
    %451 = vector.extract_strided_slice %446 {offsets = [0, 64], sizes = [16, 64], strides = [1, 1]} : vector<16x256xbf16> to vector<16x64xbf16>
    %cst_162 = arith.constant dense<0.000000e+00> : vector<32x64xf32>
    %452 = tpu.matmul %450, %451, %cst_162 {dimension_numbers = #tpu.dot_dimension_numbers<[1], [0], [0], [1], [0, 0, 1, 1], [], []>} : vector<32x16xbf16>, vector<16x64xbf16>, vector<32x64xf32> -> vector<32x64xf32>
    %453 = arith.addf %449, %452 : vector<32x64xf32>
    %c976 = arith.constant 976 : index
    %c0_163 = arith.constant 0 : index
    %454 = vector.load %arg1[%c976, %c0_163] : memref<1104x256xbf16, #tpu.memory_space<vmem>>, vector<32x16xbf16>
    %455 = vector.extract_strided_slice %446 {offsets = [0, 128], sizes = [16, 64], strides = [1, 1]} : vector<16x256xbf16> to vector<16x64xbf16>
    %cst_164 = arith.constant dense<0.000000e+00> : vector<32x64xf32>
    %456 = tpu.matmul %454, %455, %cst_164 {dimension_numbers = #tpu.dot_dimension_numbers<[1], [0], [0], [1], [0, 0, 1, 1], [], []>} : vector<32x16xbf16>, vector<16x64xbf16>, vector<32x64xf32> -> vector<32x64xf32>
    %457 = arith.addf %453, %456 : vector<32x64xf32>
    %c1008 = arith.constant 1008 : index
    %c0_165 = arith.constant 0 : index
    %458 = vector.load %arg1[%c1008, %c0_165] : memref<1104x256xbf16, #tpu.memory_space<vmem>>, vector<32x16xbf16>
    %459 = vector.extract_strided_slice %446 {offsets = [0, 192], sizes = [16, 64], strides = [1, 1]} : vector<16x256xbf16> to vector<16x64xbf16>
    %cst_166 = arith.constant dense<0.000000e+00> : vector<32x64xf32>
    %460 = tpu.matmul %458, %459, %cst_166 {dimension_numbers = #tpu.dot_dimension_numbers<[1], [0], [0], [1], [0, 0, 1, 1], [], []>} : vector<32x16xbf16>, vector<16x64xbf16>, vector<32x64xf32> -> vector<32x64xf32>
    %461 = arith.addf %457, %460 : vector<32x64xf32>
    %c200 = arith.constant 200 : index
    %c0_167 = arith.constant 0 : index
    %462 = vector.load %arg2[%c200, %c0_167] : memref<216x128xf32, #tpu.memory_space<vmem>>, vector<1x64xf32>
    %463 = vector.broadcast %462 : vector<1x64xf32> to vector<32x64xf32>
    %464 = arith.addf %461, %463 : vector<32x64xf32>
    %c1040 = arith.constant 1040 : index
    %c0_168 = arith.constant 0 : index
    %465 = vector.load %arg1[%c1040, %c0_168] : memref<1104x256xbf16, #tpu.memory_space<vmem>>, vector<64x24xbf16>
    %466 = arith.truncf %464 : vector<32x64xf32> to vector<32x64xbf16>
    %cst_169 = arith.constant dense<0.000000e+00> : vector<32x24xf32>
    %467 = tpu.matmul %466, %465, %cst_169 {dimension_numbers = #tpu.dot_dimension_numbers<[1], [0], [0], [1], [0, 0, 1, 1], [], []>} : vector<32x64xbf16>, vector<64x24xbf16>, vector<32x24xf32> -> vector<32x24xf32>
    %468 = vector.extract_strided_slice %467 {offsets = [0, 0], sizes = [32, 8], strides = [1, 1]} : vector<32x24xf32> to vector<32x8xf32>
    %c1_i32_170 = arith.constant 1 : i32
    %469 = tpu.dynamic_rotate %468 by %c1_i32_170 dim 0 : vector<32x8xf32>, i32 -> vector<32x8xf32>
    %470 = tpu.iota {dimensions = array<i32: 0>} : vector<32x1xi32>
    %c0_i32_171 = arith.constant 0 : i32
    %471 = vector.broadcast %c0_i32_171 : i32 to vector<32x1xi32>
    %c16_i32 = arith.constant 16 : i32
    %472 = vector.broadcast %c16_i32 : i32 to vector<32x1xi32>
    %473 = arith.cmpi sge, %470, %472 : vector<32x1xi32>
    %474 = arith.extui %473 : vector<32x1xi1> to vector<32x1xi32>
    %475 = arith.addi %471, %474 : vector<32x1xi32>
    %c16_i32_172 = arith.constant 16 : i32
    %476 = vector.broadcast %c16_i32_172 : i32 to vector<32x1xi32>
    %477 = arith.muli %475, %476 : vector<32x1xi32>
    %478 = arith.subi %470, %477 : vector<32x1xi32>
    %c-1_i32_173 = arith.constant -1 : i32
    %479 = vector.broadcast %c-1_i32_173 : i32 to vector<32x1xi32>
    %480 = arith.addi %478, %479 : vector<32x1xi32>
    %c0_i32_174 = arith.constant 0 : i32
    %481 = vector.broadcast %c0_i32_174 : i32 to vector<32x1xi32>
    %482 = arith.cmpi sge, %480, %481 : vector<32x1xi32>
    %c-1_i32_175 = arith.constant -1 : i32
    %483 = vector.broadcast %c-1_i32_175 : i32 to vector<32x1xi32>
    %484 = arith.addi %478, %483 : vector<32x1xi32>
    %c16_i32_176 = arith.constant 16 : i32
    %485 = vector.broadcast %c16_i32_176 : i32 to vector<32x1xi32>
    %486 = arith.cmpi slt, %484, %485 : vector<32x1xi32>
    %487 = arith.andi %482, %486 : vector<32x1xi1>
    %488 = arith.extui %487 : vector<32x1xi1> to vector<32x1xi32>
    %489 = arith.sitofp %488 : vector<32x1xi32> to vector<32x1xf32>
    %490 = vector.broadcast %489 : vector<32x1xf32> to vector<32x8xf32>
    %491 = arith.mulf %469, %490 : vector<32x8xf32>
    %492 = vector.extract_strided_slice %467 {offsets = [0, 8], sizes = [32, 8], strides = [1, 1]} : vector<32x24xf32> to vector<32x8xf32>
    %493 = arith.addf %491, %492 : vector<32x8xf32>
    %494 = vector.extract_strided_slice %467 {offsets = [0, 16], sizes = [32, 8], strides = [1, 1]} : vector<32x24xf32> to vector<32x8xf32>
    %c31_i32 = arith.constant 31 : i32
    %495 = tpu.dynamic_rotate %494 by %c31_i32 dim 0 : vector<32x8xf32>, i32 -> vector<32x8xf32>
    %496 = tpu.iota {dimensions = array<i32: 0>} : vector<32x1xi32>
    %c0_i32_177 = arith.constant 0 : i32
    %497 = vector.broadcast %c0_i32_177 : i32 to vector<32x1xi32>
    %c16_i32_178 = arith.constant 16 : i32
    %498 = vector.broadcast %c16_i32_178 : i32 to vector<32x1xi32>
    %499 = arith.cmpi sge, %496, %498 : vector<32x1xi32>
    %500 = arith.extui %499 : vector<32x1xi1> to vector<32x1xi32>
    %501 = arith.addi %497, %500 : vector<32x1xi32>
    %c16_i32_179 = arith.constant 16 : i32
    %502 = vector.broadcast %c16_i32_179 : i32 to vector<32x1xi32>
    %503 = arith.muli %501, %502 : vector<32x1xi32>
    %504 = arith.subi %496, %503 : vector<32x1xi32>
    %c1_i32_180 = arith.constant 1 : i32
    %505 = vector.broadcast %c1_i32_180 : i32 to vector<32x1xi32>
    %506 = arith.addi %504, %505 : vector<32x1xi32>
    %c0_i32_181 = arith.constant 0 : i32
    %507 = vector.broadcast %c0_i32_181 : i32 to vector<32x1xi32>
    %508 = arith.cmpi sge, %506, %507 : vector<32x1xi32>
    %c1_i32_182 = arith.constant 1 : i32
    %509 = vector.broadcast %c1_i32_182 : i32 to vector<32x1xi32>
    %510 = arith.addi %504, %509 : vector<32x1xi32>
    %c16_i32_183 = arith.constant 16 : i32
    %511 = vector.broadcast %c16_i32_183 : i32 to vector<32x1xi32>
    %512 = arith.cmpi slt, %510, %511 : vector<32x1xi32>
    %513 = arith.andi %508, %512 : vector<32x1xi1>
    %514 = arith.extui %513 : vector<32x1xi1> to vector<32x1xi32>
    %515 = arith.sitofp %514 : vector<32x1xi32> to vector<32x1xf32>
    %516 = vector.broadcast %515 : vector<32x1xf32> to vector<32x8xf32>
    %517 = arith.mulf %495, %516 : vector<32x8xf32>
    %518 = arith.addf %493, %517 : vector<32x8xf32>
    %c208_184 = arith.constant 208 : index
    %c0_185 = arith.constant 0 : index
    %519 = vector.load %arg2[%c208_184, %c0_185] : memref<216x128xf32, #tpu.memory_space<vmem>>, vector<1x8xf32>
    %520 = vector.broadcast %519 : vector<1x8xf32> to vector<32x8xf32>
    %521 = arith.addf %518, %520 : vector<32x8xf32>
    %522 = vector.shape_cast %5 : vector<32x1xf32> to vector<1x32x1xf32>
    %cst_186 = arith.constant dense<0.000000e+00> : vector<1xf32>
    %523 = vector.multi_reduction <add>, %522, %cst_186 [1, 2] : vector<1x32x1xf32> to vector<1xf32>
    %524 = vector.shape_cast %523 : vector<1xf32> to vector<1x1x1xf32>
    %525 = vector.extract %524[0, 0, 0] : f32 from vector<1x1x1xf32>
    %cst_187 = arith.constant 4.000000e+00 : f32
    %526 = arith.mulf %525, %cst_187 : f32
    %cst_188 = arith.constant 0.000000e+00 : f32
    %527 = arith.cmpf ogt, %526, %cst_188 : f32
    %cst_189 = arith.constant 1.000000e+00 : f32
    %528 = arith.select %527, %526, %cst_189 : f32
    %cst_190 = arith.constant 1.000000e+00 : f32
    %529 = arith.divf %cst_190, %528 : f32
    %530 = vector.extract_strided_slice %521 {offsets = [0, 0], sizes = [32, 4], strides = [1, 1]} : vector<32x8xf32> to vector<32x4xf32>
    %531 = arith.subf %530, %4 : vector<32x4xf32>
    %532 = vector.broadcast %5 : vector<32x1xf32> to vector<32x4xf32>
    %533 = arith.mulf %531, %532 : vector<32x4xf32>
    %534 = vector.extract_strided_slice %521 {offsets = [0, 4], sizes = [32, 4], strides = [1, 1]} : vector<32x8xf32> to vector<32x4xf32>
    %535 = arith.subf %534, %4 : vector<32x4xf32>
    %536 = vector.broadcast %5 : vector<32x1xf32> to vector<32x4xf32>
    %537 = arith.mulf %535, %536 : vector<32x4xf32>
    %538 = arith.mulf %533, %533 : vector<32x4xf32>
    %539 = vector.shape_cast %538 : vector<32x4xf32> to vector<1x32x4xf32>
    %cst_191 = arith.constant dense<0.000000e+00> : vector<1xf32>
    %540 = vector.multi_reduction <add>, %539, %cst_191 [1, 2] : vector<1x32x4xf32> to vector<1xf32>
    %541 = vector.shape_cast %540 : vector<1xf32> to vector<1x1x1xf32>
    %542 = vector.extract %541[0, 0, 0] : f32 from vector<1x1x1xf32>
    %543 = arith.mulf %542, %529 : f32
    %544 = arith.mulf %537, %537 : vector<32x4xf32>
    %545 = vector.shape_cast %544 : vector<32x4xf32> to vector<1x32x4xf32>
    %cst_192 = arith.constant dense<0.000000e+00> : vector<1xf32>
    %546 = vector.multi_reduction <add>, %545, %cst_192 [1, 2] : vector<1x32x4xf32> to vector<1xf32>
    %547 = vector.shape_cast %546 : vector<1xf32> to vector<1x1x1xf32>
    %548 = vector.extract %547[0, 0, 0] : f32 from vector<1x1x1xf32>
    %549 = arith.mulf %548, %529 : f32
    %550 = math.absf %533 : vector<32x4xf32>
    %551 = vector.shape_cast %550 : vector<32x4xf32> to vector<1x32x4xf32>
    %cst_193 = arith.constant dense<0.000000e+00> : vector<1xf32>
    %552 = vector.multi_reduction <add>, %551, %cst_193 [1, 2] : vector<1x32x4xf32> to vector<1xf32>
    %553 = vector.shape_cast %552 : vector<1xf32> to vector<1x1x1xf32>
    %554 = vector.extract %553[0, 0, 0] : f32 from vector<1x1x1xf32>
    %555 = arith.mulf %554, %529 : f32
    %556 = tpu.iota {dimensions = array<i32: 1>} : vector<1x16xi32>
    %cst_194 = arith.constant 0.000000e+00 : f32
    %557 = vector.broadcast %cst_194 : f32 to vector<1x16xf32>
    %c0_i32_195 = arith.constant 0 : i32
    %558 = vector.broadcast %c0_i32_195 : i32 to vector<1x16xi32>
    %559 = arith.cmpi eq, %556, %558 : vector<1x16xi32>
    %560 = arith.extui %559 : vector<1x16xi1> to vector<1x16xi32>
    %561 = arith.sitofp %560 : vector<1x16xi32> to vector<1x16xf32>
    %562 = vector.broadcast %543 : f32 to vector<1x16xf32>
    %563 = arith.mulf %562, %561 : vector<1x16xf32>
    %564 = arith.addf %557, %563 : vector<1x16xf32>
    %c1_i32_196 = arith.constant 1 : i32
    %565 = vector.broadcast %c1_i32_196 : i32 to vector<1x16xi32>
    %566 = arith.cmpi eq, %556, %565 : vector<1x16xi32>
    %567 = arith.extui %566 : vector<1x16xi1> to vector<1x16xi32>
    %568 = arith.sitofp %567 : vector<1x16xi32> to vector<1x16xf32>
    %569 = vector.broadcast %549 : f32 to vector<1x16xf32>
    %570 = arith.mulf %569, %568 : vector<1x16xf32>
    %571 = arith.addf %564, %570 : vector<1x16xf32>
    %c2_i32 = arith.constant 2 : i32
    %572 = vector.broadcast %c2_i32 : i32 to vector<1x16xi32>
    %573 = arith.cmpi eq, %556, %572 : vector<1x16xi32>
    %574 = arith.extui %573 : vector<1x16xi1> to vector<1x16xi32>
    %575 = arith.sitofp %574 : vector<1x16xi32> to vector<1x16xf32>
    %576 = vector.broadcast %256 : f32 to vector<1x16xf32>
    %577 = arith.mulf %576, %575 : vector<1x16xf32>
    %578 = arith.addf %571, %577 : vector<1x16xf32>
    %c3_i32 = arith.constant 3 : i32
    %579 = vector.broadcast %c3_i32 : i32 to vector<1x16xi32>
    %580 = arith.cmpi eq, %556, %579 : vector<1x16xi32>
    %581 = arith.extui %580 : vector<1x16xi1> to vector<1x16xi32>
    %582 = arith.sitofp %581 : vector<1x16xi32> to vector<1x16xf32>
    %583 = vector.broadcast %310 : f32 to vector<1x16xf32>
    %584 = arith.mulf %583, %582 : vector<1x16xf32>
    %585 = arith.addf %578, %584 : vector<1x16xf32>
    %c4_i32_197 = arith.constant 4 : i32
    %586 = vector.broadcast %c4_i32_197 : i32 to vector<1x16xi32>
    %587 = arith.cmpi eq, %556, %586 : vector<1x16xi32>
    %588 = arith.extui %587 : vector<1x16xi1> to vector<1x16xi32>
    %589 = arith.sitofp %588 : vector<1x16xi32> to vector<1x16xf32>
    %590 = vector.broadcast %261 : f32 to vector<1x16xf32>
    %591 = arith.mulf %590, %589 : vector<1x16xf32>
    %592 = arith.addf %585, %591 : vector<1x16xf32>
    %c5_i32 = arith.constant 5 : i32
    %593 = vector.broadcast %c5_i32 : i32 to vector<1x16xi32>
    %594 = arith.cmpi eq, %556, %593 : vector<1x16xi32>
    %595 = arith.extui %594 : vector<1x16xi1> to vector<1x16xi32>
    %596 = arith.sitofp %595 : vector<1x16xi32> to vector<1x16xf32>
    %597 = vector.broadcast %315 : f32 to vector<1x16xf32>
    %598 = arith.mulf %597, %596 : vector<1x16xf32>
    %599 = arith.addf %592, %598 : vector<1x16xf32>
    %c6_i32 = arith.constant 6 : i32
    %600 = vector.broadcast %c6_i32 : i32 to vector<1x16xi32>
    %601 = arith.cmpi eq, %556, %600 : vector<1x16xi32>
    %602 = arith.extui %601 : vector<1x16xi1> to vector<1x16xi32>
    %603 = arith.sitofp %602 : vector<1x16xi32> to vector<1x16xf32>
    %604 = vector.broadcast %275 : f32 to vector<1x16xf32>
    %605 = arith.mulf %604, %603 : vector<1x16xf32>
    %606 = arith.addf %599, %605 : vector<1x16xf32>
    %c7_i32_198 = arith.constant 7 : i32
    %607 = vector.broadcast %c7_i32_198 : i32 to vector<1x16xi32>
    %608 = arith.cmpi eq, %556, %607 : vector<1x16xi32>
    %609 = arith.extui %608 : vector<1x16xi1> to vector<1x16xi32>
    %610 = arith.sitofp %609 : vector<1x16xi32> to vector<1x16xf32>
    %611 = vector.broadcast %329 : f32 to vector<1x16xf32>
    %612 = arith.mulf %611, %610 : vector<1x16xf32>
    %613 = arith.addf %606, %612 : vector<1x16xf32>
    %c8_i32_199 = arith.constant 8 : i32
    %614 = vector.broadcast %c8_i32_199 : i32 to vector<1x16xi32>
    %615 = arith.cmpi eq, %556, %614 : vector<1x16xi32>
    %616 = arith.extui %615 : vector<1x16xi1> to vector<1x16xi32>
    %617 = arith.sitofp %616 : vector<1x16xi32> to vector<1x16xf32>
    %618 = vector.broadcast %555 : f32 to vector<1x16xf32>
    %619 = arith.mulf %618, %617 : vector<1x16xf32>
    %620 = arith.addf %613, %619 : vector<1x16xf32>
    %cst_200 = arith.constant 0.000000e+00 : f32
    %621 = vector.broadcast %cst_200 : f32 to vector<40x128xf32>
    %c0_201 = arith.constant 0 : index
    %c0_202 = arith.constant 0 : index
    %622 = vector.load %arg3[%c0_201, %c0_202] : memref<40x128xf32, #tpu.memory_space<vmem>>, vector<40x128xf32>
    tpu.vector_store %arg3[%c0_201, %c0_202], %621 {strides = array<i32>} : memref<40x128xf32, #tpu.memory_space<vmem>>, vector<40x128xf32>,
    %623 = vector.extract_strided_slice %521 {offsets = [0, 0], sizes = [32, 4], strides = [1, 1]} : vector<32x8xf32> to vector<32x4xf32>
    %c0_203 = arith.constant 0 : index
    %c0_204 = arith.constant 0 : index
    %624 = vector.load %arg3[%c0_203, %c0_204] : memref<40x128xf32, #tpu.memory_space<vmem>>, vector<32x4xf32>
    tpu.vector_store %arg3[%c0_203, %c0_204], %623 {strides = array<i32>} : memref<40x128xf32, #tpu.memory_space<vmem>>, vector<32x4xf32>,
    %c32_205 = arith.constant 32 : index
    %c0_206 = arith.constant 0 : index
    %625 = vector.load %arg3[%c32_205, %c0_206] : memref<40x128xf32, #tpu.memory_space<vmem>>, vector<1x16xf32>
    tpu.vector_store %arg3[%c32_205, %c0_206], %620 {strides = array<i32>} : memref<40x128xf32, #tpu.memory_space<vmem>>, vector<1x16xf32>,
    return
  }
}

</mosaic_0001>

<bundles_post_ra>
// kernel: forward.1
= control target key start
LH: loop header
LB: loop body
LE: loop exit
PB: predicated region body
PF: predicated region fallthrough
CT: control target
= control target key end

     0   :  { %8 = vsyncpa [#allocation3], 0  ;;  %s4967_s0 = inlined_call_operand.vmem [shape: f32[32,5], index: 0, kind: input, shape index: {}]   ;;  %s4968_s1 = inlined_call_operand.hbm [shape: bf16[1104,256], index: 1, kind: input, shape index: {}]   ;;  %s4969_s2 = inlined_call_operand.hbm [shape: f32[216,128], index: 2, kind: input, shape index: {}]   ;;  %s4970_s3 = inlined_call_operand.vmem [shape: f32[40,128], index: 3, kind: output, shape index: {}]  }
   0x1   :  { %9 = vsyncpa [#allocation5], 0  ;;  %s4274_s12 = smov [#allocation2]   ;;  %s4226_s16 = scalar_lea.hbm %s4968_s1, 17664 }
   0x2   :  { %s17_s13 = sshll.u32 %s4274_s12, 4  ;;  %p4227_p0 = scmp.ne.s32.totalorder %s4968_s1, %s4226_s16  ;;  %s18_s13 = int_to_ptr.vmem [resolvable:$true] %s17_s13 }
   0x3   :  { %p4230_p1 = scmp.lt.u32.totalorder %s4226_s16, %s4968_s1 }
   0x5   :  { %p4232_p2 = pnand %p4230_p1, %p4227_p0 }
   0x7   :  { %4235 = shalt.err (!%p4232_p2)
}
   0x8   :  { %s4236_s21 = scalar_lea.vmem %s18_s13, 17664  ;;  %p4241_p4 = scmp.lt.s32.totalorder %s18_s13, %s18_s13 }
   0x9   :  { %p4237_p3 = scmp.ne.s32.totalorder %s18_s13, %s4236_s21  ;;  %p4242_p5 = scmp.lt.s32.totalorder %s4236_s21, %s4236_s21 }
   0xb   :  { %p4243_p6 = por %p4242_p5, %p4241_p4 }
   0xd   :  { %p4244_p7 = pnand %p4243_p6, %p4237_p3 }
   0xf   :  { %4247 = shalt.err (!%p4244_p7)
}
  0x10   :  { %s4275_s22 = smov 128   ;;  %s4276_s23 = smov 8  }
  0x11   :  { %23 = dma.hbm_to_vmem [thread:$0]  %s4968_s1, 17664, %s18_s13, [#allocation3], %s4275_s22, %s4275_s22, %s4276_s23  }
  0x12   :  { %s4277_s26 = smov [#allocation4]   ;;  %s4248_s30 = scalar_lea.hbm %s4969_s2, 3456 }
  0x13   :  { %s29_s27 = sshll.u32 %s4277_s26, 4  ;;  %p4249_p8 = scmp.ne.s32.totalorder %s4969_s2, %s4248_s30  ;;  %s30_s27 = int_to_ptr.vmem [resolvable:$true] %s29_s27 }
  0x14   :  { %p4252_p9 = scmp.lt.u32.totalorder %s4248_s30, %s4969_s2 }
  0x16   :  { %p4254_p10 = pnand %p4252_p9, %p4249_p8 }
  0x18   :  { %4257 = shalt.err (!%p4254_p10)
}
  0x19   :  { %s4258_s8 = scalar_lea.vmem %s30_s27, 3456  ;;  %p4263_p12 = scmp.lt.s32.totalorder %s30_s27, %s30_s27 }
  0x1a   :  { %p4259_p11 = scmp.ne.s32.totalorder %s30_s27, %s4258_s8  ;;  %p4264_p13 = scmp.lt.s32.totalorder %s4258_s8, %s4258_s8 }
  0x1c   :  { %p4265_p0 = por %p4264_p13, %p4263_p12 }
  0x1e   :  { %p4266_p1 = pnand %p4265_p0, %p4259_p11 }
  0x20   :  { %4269 = shalt.err (!%p4266_p1)
}
  0x21   :  { %35 = dma.hbm_to_vmem [thread:$0]  %s4969_s2, 3456, %s30_s27, [#allocation5], %s4275_s22, %s4275_s22, %s4276_s23  }
  0x22   :  { %4270 = dma.done.wait [#allocation3], 17664  }
  0x23   :  { %4271 = vsyncadd [#allocation3], 4294949632 }
  0x24   :  { %4272 = dma.done.wait [#allocation5], 3456  }
  0x25   :  { %4273 = vsyncadd [#allocation5], 4294963840  ;;  %v4278_v0 = vmov 0   ;;  %v55_v1 = vld [vmem:[#allocation2] sm:$0x33]  ;;  %vm70_vm0 = vcmask 1041408  }
  0x26   :  { %109 = vmatprep.mubr.bf16.mxu0 %v4278_v0  ;;  %119 = vmatprep.mubr.bf16.mxu1 %v4278_v0  ;;  %v43_v2 = vld [vmem:[%s4967_s0] sm:$0xff]  ;;  %v44_v3 = vld [vmem:[%s4967_s0 + $0x8] sm:$0xff]  ;;  %vm63_vm1 = vcmask 31744   ;;  %v3500_v4 = vcombine.high %v55_v1, %v55_v1  ;;  %v3499_v5 = vcombine.low %v55_v1, %v55_v1  ;;  %v45_v8 = vld [vmem:[%s4967_s0 + $0x10] sm:$0xff]  ;;  %v4279_v19 = vmov 0.0   ;;  %s4281_s27 = smov 64  }
  0x27   :  { %v47_v6 = vmul.f32 0.01, %v43_v2  ;;  %v48_v7 = vmul.f32 0.01, %v44_v3  ;;  %v46_v9 = vld [vmem:[%s4967_s0 + $0x18] sm:$0xff]  ;;  %3478 = vst [vmem:[%s4970_s3] sm:$0xff] %v4279_v19  ;;  %3479 = vst [vmem:[%s4970_s3 + $0x8] sm:$0xff] %v4279_v19 }
  0x28   :  { %v49_v10 = vmul.f32 0.01, %v45_v8  ;;  %v50_v11 = vmul.f32 0.01, %v46_v9  ;;  %3501 = vmatprep.subr.msk.bf16.mxu0 %vm70_vm0, %v3500_v4  ;;  %4041 = vmatprep.subr.msk.bf16.mxu1 %vm70_vm0, %v3500_v4  ;;  %v72_v12 = vsel %vm70_vm0, %v3499_v5, 0  ;;  %3480 = vst [vmem:[%s4970_s3 + $0x10] sm:$0xff] %v4279_v19 }
  0x29   :  { %v4348_v13 = vadd.f32 -1.0, %v47_v6  ;;  %v4350_v14 = vadd.f32 -1.0, %v48_v7  ;;  %78 = vmatpush1.bf16.msra.mxu0 %v72_v12  ;;  %4042 = vmatpush1.bf16.msra.mxu1 %v72_v12  ;;  %3481 = vst [vmem:[%s4970_s3 + $0x18] sm:$0xff] %v4279_v19  ;;  %3482 = vst [vmem:[%s4970_s3 + $0x20] sm:$0xff] %v4279_v19  ;;  %vm4280_vm2 = vmmov 0   ;;  %vm151_vm3 = vcmask 261120  }
  0x2a   :  { %v4352_v15 = vadd.f32 -1.0, %v49_v10  ;;  %v4354_v16 = vadd.f32 -1.0, %v50_v11  ;;  %3795 = vmatprep.subr.bf16.mxu0 %v4279_v19  ;;  %3779 = vmatprep.subr.bf16.mxu1 %v4279_v19  ;;  %v4112_v32 = vld [vmem:[#allocation2 + $0x30] ss:$8 sps:$4 sm:$0xff]   ;;  %v4110_v35 = vld [vmem:[#allocation2 + $0x20] ss:$8 sps:$4 sm:$0xff]   ;;  %vm4526_vm12 = vmpackc.low %vm151_vm3, %vm151_vm3 }
  0x2b   :  { %v56_v17 = vpack.c.bf16 %v4350_v14, %v4348_v13  ;;  %v4111_v36 = vld [vmem:[#allocation2 + $0x10] ss:$8 sps:$4 sm:$0xff]   ;;  %v4113_v39 = vld [vmem:[#allocation2 + $0x40] ss:$8 sps:$4 sm:$0xff]   ;;  %v4116_v40 = vld [vmem:[#allocation2 + $0x54] ss:$8 sps:$4 sm:$0xff]  }
  0x2c   :  { %v57_v18 = vpack.c.bf16 %v4354_v16, %v4352_v15  ;;  %v4114_v41 = vld [vmem:[#allocation2 + $0x50] ss:$8 sps:$4 sm:$0xff]   ;;  %v4117_v42 = vld [vmem:[#allocation2 + $0x60] ss:$8 sps:$4 sm:$0xff]   ;;  %v4119_v43 = vld [vmem:[#allocation2 + $0x64] ss:$8 sps:$4 sm:$0xff]  }
  0x2d   :  { %3502 = vmatmul.mubr.msk.bf16.vlgmr.msra.gmra.mrb[0].mxu0 %vm63_vm1, %v56_v17  ;;  %v4122_v48 = vld [vmem:[#allocation2 + $0x74] ss:$8 sps:$4 sm:$0xff]   ;;  %v4120_v49 = vld [vmem:[#allocation2 + $0x70] ss:$8 sps:$4 sm:$0xff]   ;;  %v4125_v50 = vld [vmem:[#allocation2 + $0x84] ss:$8 sps:$4 sm:$0xff]  }
  0x2e   :  { %3503 = vmatmul.mubr.msk.bf16.vlgmr.msra.gmra.mrb[0].mxu1 %vm63_vm1, %v57_v18  ;;  %3799 = vmatprep.mubr.msk.bf16.mxu0 %vm4280_vm2, %v4279_v19  ;;  %v4123_v51 = vld [vmem:[#allocation2 + $0x80] ss:$8 sps:$4 sm:$0xff]   ;;  %v3512_v2 = vld [vmem:[#allocation4] ss:$0 sm:$0xff]  ;;  %vm417_vm4 = vcmask 523264   ;;  %s4282_s28 = smov 96  }
  0x2f   :  { %3783 = vmatprep.mubr.msk.bf16.mxu1 %vm4280_vm2, %v4279_v19  ;;  %v4126_v17 = vld [vmem:[#allocation2 + $0x90] ss:$8 sps:$4 sm:$0xff]   ;;  %v4127_v18 = vld [vmem:[#allocation2 + $0xa0] ss:$8 sps:$4 sm:$0xff]   ;;  %vm815_vm11 = vcmask 130048   ;;  %s4283_s29 = smov 32  }
  0x30   :  { %s4286_s9 = smov 112   ;;  %s4287_s10 = smov 120  }
  0x31   :  { %s4288_s19 = smov 124   ;;  %s4289_s24 = smov 4  }
 0x100   :  { %v111_v20 = vpop.f32.mrb[0].mxu0 }
 0x101   :  { %v113_v21 = vpop.f32.mrb[1].mxu0  ;;  %v121_v22 = vpop.f32.mrb[0].mxu1 }
 0x102   :  { %v115_v23 = vpop.f32.mrb[2].mxu0  ;;  %v123_v24 = vpop.f32.mrb[1].mxu1 }
 0x103   :  { %v130_v25 = vpack.c.bf16 %v115_v23, %v111_v20  ;;  %v117_v26 = vpop.f32.mrb[3].mxu0  ;;  %v125_v27 = vpop.f32.mrb[2].mxu1  ;;  %v4128_v20 = vld [vmem:[#allocation2 + $0xb0] ss:$8 sps:$4 sm:$0xff]  }
 0x104   :  { %v131_v28 = vpack.c.bf16 %v117_v26, %v113_v21  ;;  %v132_v29 = vpack.c.bf16 %v125_v27, %v121_v22  ;;  %v127_v30 = vpop.f32.mrb[3].mxu1  ;;  %v4129_v21 = vld [vmem:[#allocation2 + $0xc0] ss:$8 sps:$4 sm:$0xff]   ;;  %v466_v22 = vlaneseq  ;;  %v4132_v26 = vld [vmem:[#allocation2 + $0xd4] ss:$8 sps:$4 sm:$0xff]  }
 0x105   :  { %v133_v31 = vpack.c.bf16 %v127_v30, %v123_v24  ;;  %145 = vrot.lane.b32.xlu0 %v130_v25, %s4281_s27 }
 0x106   :  { %307 = vrot.lane.b32.xlu1 %v131_v28, %s4281_s27  ;;  %3796 = vmatpush3.bf16.msra.mxu0 %v131_v28  ;;  %v4423_v24 = vshrl.u32 %v466_v22, 7  ;;  %v4135_v28 = vld [vmem:[#allocation2 + $0xe4] ss:$8 sps:$4 sm:$0xff]  }
 0x107   :  { %3797 = vmatprep.subr.bf16.mxu0 %v4279_v19 }
 0x108   :  { %vm468_vm5 = vcmp.lt.s32.totalorder %v4423_v24, 1  ;;  %vm506_vm6 = vcmp.lt.s32.totalorder %v4423_v24, 7  ;;  %vm1066_vm13 = vcmp.ge.s32.totalorder %v4423_v24, 4 }
 0x109   :  { %147 = vrot.lane.b32.xlu0 %v132_v29, %s4281_s27 }
 0x10a   :  { %309 = vrot.lane.b32.xlu1 %v133_v31, %s4281_s27  ;;  %3798 = vmatpush3.bf16.msra.mxu0 %v133_v31 }
 0x10b   :  { %421 = vmatprep.subr.bf16.mxu0 %v4116_v40  ;;  %v4438_v40 = vadd.s32 8, %v4423_v24 }
 0x10d   :  { %3800 = vmatmul.mubr.msk.bf16.vlgmr.msra.gmra.mrb[4].mxu0 %vm151_vm3, %v4112_v32 }
 0x10e   :  { %453 = vmatprep.mubr.bf16.mxu0 %v4278_v0  ;;  %422 = vmatpush1.bf16.msra.mxu0 %v4114_v41  ;;  %v3522_v41 = vadd.s32 4294967288, %v4438_v40 }
 0x10f   :  { %423 = vmatprep.subr.bf16.mxu0 %v4119_v43  ;;  %v509_v43 = vadd.s32 1, %v4423_v24 }
 0x111   :  { %vm513_vm8 = vcmp.lt.s32.totalorder %v509_v43, 8 }
 0x112   :  { %424 = vmatpush1.bf16.msra.mxu0 %v4117_v42  ;;  %v480_v42 = vadd.s32 4294967295, %v4423_v24 }
 0x113   :  { %425 = vmatprep.subr.bf16.mxu0 %v4122_v48 }
 0x114   :  { %vm482_vm7 = vcmp.ge.s32.totalorder %v480_v42, 0 }
 0x116   :  { %426 = vmatpush1.bf16.msra.mxu0 %v4120_v49 }
 0x117   :  { %427 = vmatprep.subr.bf16.mxu0 %v4125_v50 }
 0x11a   :  { %428 = vmatpush1.bf16.msra.mxu0 %v4123_v51 }
 0x11b   :  { %670 = vmatprep.subr.bf16.mxu0 %v4132_v26  ;;  %v4142_v26 = vld [vmem:[#allocation2 + $0x110] ss:$8 sps:$4 sm:$0xff]  }
 0x177   :  { %v146_v33 = vpop.permute.xlu0 %145 }
 0x178   :  { %3780 = vmatpush3.bf16.msra.mxu1 %v146_v33  ;;  %v308_v37 = vpop.permute.xlu1 %307  ;;  %v4133_v33 = vld [vmem:[#allocation2 + $0xe0] ss:$8 sps:$4 sm:$0xff]  }
 0x179   :  { %3781 = vmatprep.subr.bf16.mxu1 %v4279_v19 }
 0x17b   :  { %v148_v34 = vpop.permute.xlu0 %147 }
 0x17c   :  { %3782 = vmatpush3.bf16.msra.mxu1 %v148_v34  ;;  %v310_v38 = vpop.permute.xlu1 %309 }
 0x17d   :  { %3787 = vmatprep.subr.bf16.mxu1 %v4279_v19 }
 0x17f   :  { %3784 = vmatmul.mubr.msk.bf16.vlgmr.msra.gmra.mrb[4].mxu1 %vm151_vm3, %v4110_v35 }
 0x180   :  { %3788 = vmatpush3.bf16.msra.mxu1 %v130_v25  ;;  %3791 = vmatprep.mubr.msk.bf16.mxu1 %vm4280_vm2, %v4279_v19  ;;  %v4130_v25 = vld [vmem:[#allocation2 + $0xd0] ss:$8 sps:$4 sm:$0xff]  }
 0x181   :  { %3789 = vmatprep.subr.bf16.mxu1 %v4279_v19 }
 0x184   :  { %3790 = vmatpush3.bf16.msra.mxu1 %v132_v29 }
 0x185   :  { %3803 = vmatprep.subr.bf16.mxu1 %v4279_v19 }
 0x187   :  { %3792 = vmatmul.mubr.msk.bf16.vlgmr.msra.gmra.mrb[8].mxu1 %vm151_vm3, %v4111_v36 }
 0x188   :  { %3804 = vmatpush3.bf16.msra.mxu1 %v308_v37  ;;  %3807 = vmatprep.mubr.msk.bf16.mxu1 %vm4280_vm2, %v4279_v19 }
 0x189   :  { %3805 = vmatprep.subr.bf16.mxu1 %v4279_v19 }
 0x18c   :  { %3806 = vmatpush3.bf16.msra.mxu1 %v310_v38 }
 0x18d   :  { %3811 = vmatprep.subr.bf16.mxu1 %v4279_v19 }
 0x18f   :  { %3808 = vmatmul.mubr.msk.bf16.vlgmr.msra.gmra.mrb[12].mxu1 %vm151_vm3, %v4113_v39 }
 0x190   :  { %3819 = vmatprep.mubr.msk.bf16.mxu1 %vm4280_vm2, %v4279_v19  ;;  %3812 = vmatpush3.bf16.msra.mxu1 %v4126_v17 }
 0x191   :  { %3813 = vmatprep.subr.bf16.mxu1 %v4279_v19 }
 0x194   :  { %3814 = vmatpush3.bf16.msra.mxu1 %v4127_v18 }
 0x195   :  { %3815 = vmatprep.subr.bf16.mxu1 %v4279_v19 }
 0x198   :  { %3816 = vmatpush3.bf16.msra.mxu1 %v4128_v20 }
 0x199   :  { %3817 = vmatprep.subr.bf16.mxu1 %v4279_v19 }
 0x19c   :  { %3818 = vmatpush3.bf16.msra.mxu1 %v4129_v21 }
 0x19d   :  { %3823 = vmatprep.subr.bf16.mxu1 %v4279_v19 }
 0x1e0   :  { %v289_v44 = vpop.f32.mrb[4].mxu0 }
 0x1e1   :  { %v3801_v45 = vpop.f32.mrb[5].mxu0 }
 0x1e2   :  { %v292_v46 = vpop.f32.mrb[6].mxu0  ;;  %v510_v45 = vadd.s32 1, %v3522_v41 }
 0x1e3   :  { %v3802_v47 = vpop.f32.mrb[7].mxu0 }
 0x1e4   :  { %vm514_vm10 = vcmp.lt.s32.totalorder %v510_v45, 8  ;;  %v4447_v47 = vsel %vm513_vm8, 1.0, %v4279_v19 }
 0x1e5   :  { %v4454_v51 = vsel %vm514_vm10, 1.0, %v4279_v19 }
 0x252   :  { %v189_v52 = vpop.f32.mrb[4].mxu1 }
 0x253   :  { %v3785_v53 = vpop.f32.mrb[5].mxu1 }
 0x254   :  { %v192_v54 = vpop.f32.mrb[6].mxu1 }
 0x255   :  { %v3786_v55 = vpop.f32.mrb[7].mxu1 }
 0x256   :  { %v3527_v55 = vld [vmem:[#allocation4 + $0x8] ss:$0 sm:$0xff] }
 0x25a   :  { %v238_v56 = vpop.f32.mrb[8].mxu1 }
 0x25b   :  { %v239_v57 = vadd.f32 %v238_v56, %v189_v52  ;;  %v3793_v58 = vpop.f32.mrb[9].mxu1 }
 0x25c   :  { %v241_v59 = vpop.f32.mrb[10].mxu1 }
 0x25d   :  { %v242_v60 = vadd.f32 %v241_v59, %v192_v54  ;;  %v296_v61 = vadd.f32 %v289_v44, %v239_v57  ;;  %v3794_v62 = vpop.f32.mrb[11].mxu1  ;;  %v481_v44 = vadd.s32 4294967295, %v3522_v41 }
 0x25f   :  { %v297_v63 = vadd.f32 %v292_v46, %v242_v60  ;;  %vm483_vm9 = vcmp.ge.s32.totalorder %v481_v44, 0  ;;  %v4444_v46 = vsel %vm482_vm7, 1.0, %v4279_v19 }
 0x260   :  { %v4450_v48 = vsel %vm483_vm9, 1.0, %v4279_v19 }
 0x262   :  { %v350_v1 = vpop.f32.mrb[12].mxu1 }
 0x263   :  { %v357_v3 = vadd.f32 %v350_v1, %v296_v61  ;;  %v3809_v4 = vpop.f32.mrb[13].mxu1 }
 0x264   :  { %v353_v5 = vpop.f32.mrb[14].mxu1  ;;  %v4136_v4 = vld [vmem:[#allocation2 + $0xf0] ss:$8 sps:$4 sm:$0xff]  }
 0x265   :  { %v4410_v6 = vadd.f32 %v3512_v2, %v357_v3  ;;  %v358_v7 = vadd.f32 %v353_v5, %v297_v63  ;;  %v3810_v8 = vpop.f32.mrb[15].mxu1  ;;  %v4138_v3 = vld [vmem:[#allocation2 + $0xf4] ss:$8 sps:$4 sm:$0xff]   ;;  %v4141_v5 = vld [vmem:[#allocation2 + $0x104] ss:$8 sps:$4 sm:$0xff]  }
 0x266   :  { %v3528_v8 = vld [vmem:[#allocation4 + $0x10] ss:$0 sm:$0xff] }
 0x267   :  { %v4412_v9 = vadd.f32 %v3512_v2, %v358_v7  ;;  %v366_v10 = vmax.f32 %v4410_v6, 0.0  ;;  %v4139_v7 = vld [vmem:[#allocation2 + $0x100] ss:$8 sps:$4 sm:$0xff]  }
 0x269   :  { %v367_v11 = vmax.f32 %v4412_v9, 0.0 }
 0x26b   :  { %v376_v12 = vpack.c.bf16 %v367_v11, %v366_v10 }
 0x26d   :  { %3521 = vmatmul.mubr.msk.bf16.vlgmr.msra.gmra.mrb[8].mxu0 %vm417_vm4, %v376_v12 }
 0x26e   :  { %702 = vmatprep.mubr.bf16.mxu0 %v4278_v0  ;;  %671 = vmatpush1.bf16.msra.mxu0 %v4130_v25 }
 0x26f   :  { %672 = vmatprep.subr.bf16.mxu0 %v4135_v28  ;;  %v4143_v28 = vld [vmem:[#allocation2 + $0x120] ss:$8 sps:$4 sm:$0xff]  }
 0x272   :  { %673 = vmatpush1.bf16.msra.mxu0 %v4133_v33 }
 0x273   :  { %674 = vmatprep.subr.bf16.mxu0 %v4138_v3 }
 0x276   :  { %675 = vmatpush1.bf16.msra.mxu0 %v4136_v4 }
 0x277   :  { %676 = vmatprep.subr.bf16.mxu0 %v4141_v5  ;;  %v950_v5 = vld [vmem:[#allocation2 + $0x160] sm:$0xf] }
 0x27a   :  { %677 = vmatpush1.bf16.msra.mxu0 %v4139_v7  ;;  %v902_v7 = vld [vmem:[#allocation2 + $0x150] sm:$0xf] }
 0x27b   :  { %3837 = vmatprep.subr.bf16.mxu0 %v4279_v19 }
 0x340   :  { %v455_v23 = vpop.f32.mrb[8].mxu0 }
 0x341   :  { %496 = vrot.lane.b32.xlu0 %v455_v23, %s4281_s27  ;;  %v457_v27 = vpop.f32.mrb[9].mxu0  ;;  %v464_v30 = vrot.slane %v455_v23, 7 }
 0x342   :  { %v459_v29 = vpop.f32.mrb[10].mxu0  ;;  %v504_v34 = vrot.slane %v457_v27, 1 }
 0x343   :  { %v465_v31 = vrot.slane %v459_v29, 7  ;;  %498 = vrot.lane.b32.xlu1 %v459_v29, %s4281_s27  ;;  %v461_v32 = vpop.f32.mrb[11].mxu0 }
 0x344   :  { %v505_v35 = vrot.slane %v461_v32, 1 }
 0x345   :  { %v470_v36 = vsel %vm468_vm5, %v465_v31, %v464_v30  ;;  %v469_v37 = vsel %vm468_vm5, %v464_v30, %v465_v31 }
 0x346   :  { %v507_v38 = vsel %vm506_vm6, %v504_v34, %v505_v35  ;;  %v508_v39 = vsel %vm506_vm6, %v505_v35, %v504_v34  ;;  %v492_v49 = vmul.f32 %v4444_v46, %v470_v36  ;;  %v493_v54 = vmul.f32 %v4450_v48, %v469_v37 }
 0x347   :  { %v521_v53 = vmul.f32 %v4447_v47, %v507_v38  ;;  %v522_v59 = vmul.f32 %v4454_v51, %v508_v39 }
 0x3b3   :  { %v497_v50 = vpop.permute.xlu0 %496 }
 0x3b4   :  { %v502_v52 = vadd.f32 %v497_v50, %v492_v49 }
 0x3b5   :  { %v499_v56 = vpop.permute.xlu1 %498 }
 0x3b6   :  { %v523_v57 = vadd.f32 %v521_v53, %v502_v52  ;;  %v503_v58 = vadd.f32 %v499_v56, %v493_v54  ;;  %v3543_v52 = vld [vmem:[#allocation4 + $0x18] ss:$0 sm:$0xff] }
 0x3b8   :  { %v530_v60 = vadd.f32 %v3527_v55, %v523_v57  ;;  %v524_v61 = vadd.f32 %v522_v59, %v503_v58 }
 0x3ba   :  { %v531_v62 = vadd.f32 %v3527_v55, %v524_v61  ;;  %v532_v63 = vmax.f32 %v530_v60, 0.0 }
 0x3bc   :  { %v533_v1 = vmax.f32 %v531_v62, 0.0 }
 0x3be   :  { %v542_v2 = vpack.c.bf16 %v533_v1, %v532_v63  ;;  %v809_v63 = vld [vmem:[#allocation2 + $0x130] sm:$0xf] }
 0x3c0   :  { %3820 = vmatmul.mubr.msk.bf16.vlgmr.msra.gmra.mrb[16].mxu1 %vm417_vm4, %v542_v2  ;;  %v810_v2 = vld [vmem:[#allocation2 + $0x140] sm:$0xf] }
 0x3c1   :  { %3827 = vmatprep.mubr.msk.bf16.mxu1 %vm4280_vm2, %v4279_v19  ;;  %3824 = vmatpush3.bf16.msra.mxu1 %v4142_v26 }
 0x3c2   :  { %3825 = vmatprep.subr.bf16.mxu1 %v4279_v19 }
 0x3c5   :  { %3826 = vmatpush3.bf16.msra.mxu1 %v4143_v28 }
 0x3c6   :  { %3831 = vmatprep.subr.bf16.mxu1 %v4279_v19 }
 0x493   :  { %v609_v10 = vpop.f32.mrb[16].mxu1 }
 0x494   :  { %v610_v11 = vadd.f32 %v3528_v8, %v609_v10  ;;  %v3821_v12 = vpop.f32.mrb[17].mxu1 }
 0x495   :  { %v612_v17 = vpop.f32.mrb[18].mxu1  ;;  %v4145_v12 = vld [vmem:[#allocation2 + $0x180] ss:$8 sps:$4 sm:$0xff]  }
 0x496   :  { %v613_v18 = vadd.f32 %v3528_v8, %v612_v17  ;;  %v3822_v20 = vpop.f32.mrb[19].mxu1  ;;  %v616_v21 = vadd.f32 %v610_v11, %v4410_v6  ;;  %v4144_v8 = vld [vmem:[#allocation2 + $0x170] ss:$8 sps:$4 sm:$0xff]  }
 0x498   :  { %v617_v23 = vadd.f32 %v613_v18, %v4412_v9 }
 0x49a   :  { %v626_v25 = vpack.c.bf16 %v617_v23, %v616_v21 }
 0x49c   :  { %3542 = vmatmul.mubr.msk.bf16.vlgmr.msra.gmra.mrb[12].mxu0 %vm417_vm4, %v626_v25 }
 0x49d   :  { %3839 = vmatprep.mubr.msk.bf16.mxu0 %vm4280_vm2, %v4279_v19 }
 0x56f   :  { %v704_v27 = vpop.f32.mrb[12].mxu0 }
 0x570   :  { %721 = vrot.lane.b32.xlu0 %v704_v27, %s4281_s27  ;;  %v706_v29 = vpop.f32.mrb[13].mxu0  ;;  %v713_v31 = vrot.slane %v704_v27, 7 }
 0x571   :  { %v708_v30 = vpop.f32.mrb[14].mxu0  ;;  %v729_v32 = vrot.slane %v706_v29, 1 }
 0x572   :  { %v714_v6 = vrot.slane %v708_v30, 7  ;;  %723 = vrot.lane.b32.xlu1 %v708_v30, %s4281_s27  ;;  %v710_v9 = vpop.f32.mrb[15].mxu0 }
 0x573   :  { %v730_v33 = vrot.slane %v710_v9, 1 }
 0x574   :  { %v716_v34 = vsel %vm468_vm5, %v714_v6, %v713_v31  ;;  %v715_v35 = vsel %vm468_vm5, %v713_v31, %v714_v6 }
 0x575   :  { %v731_v36 = vsel %vm506_vm6, %v729_v32, %v730_v33  ;;  %v732_v37 = vsel %vm506_vm6, %v730_v33, %v729_v32  ;;  %v717_v38 = vmul.f32 %v4444_v46, %v716_v34  ;;  %v718_v43 = vmul.f32 %v4450_v48, %v715_v35  ;;  %v3551_v32 = vld [vmem:[#allocation4 + $0x20] ss:$0 sm:$0xff] }
 0x576   :  { %v733_v42 = vmul.f32 %v4447_v47, %v731_v36  ;;  %v734_v50 = vmul.f32 %v4454_v51, %v732_v37 }
 0x5e2   :  { %v722_v39 = vpop.permute.xlu0 %721 }
 0x5e3   :  { %v727_v41 = vadd.f32 %v722_v39, %v717_v38  ;;  %v4146_v39 = vld [vmem:[#allocation2 + $0x190] ss:$8 sps:$4 sm:$0xff]  }
 0x5e4   :  { %v724_v44 = vpop.permute.xlu1 %723 }
 0x5e5   :  { %v735_v45 = vadd.f32 %v733_v42, %v727_v41  ;;  %v728_v49 = vadd.f32 %v724_v44, %v718_v43  ;;  %v4147_v41 = vld [vmem:[#allocation2 + $0x1a0] ss:$8 sps:$4 sm:$0xff]   ;;  %v1246_v42 = vld [vmem:[#allocation4 + $0x40] sm:$0xff]  ;;  %v1247_v43 = vld [vmem:[#allocation4 + $0x48] sm:$0xff] }
 0x5e6   :  { %v4522_v44 = vpack.c.bf16 %v1247_v43, %v1246_v42 }
 0x5e7   :  { %v736_v53 = vadd.f32 %v734_v50, %v728_v49  ;;  %v4484_v54 = vadd.f32 %v3543_v52, %v735_v45 }
 0x5e9   :  { %v4486_v55 = vadd.f32 %v3543_v52, %v736_v53 }
 0x5eb   :  { %v748_v56 = vpack.c.bf16 %v4486_v55, %v4484_v54 }
 0x5ed   :  { %750 = vrot.lane.b32.xlu0 %v748_v56, %s4282_s28  ;;  %v1344_v56 = vmul.f32 %v4484_v54, %v4484_v54 }
 0x65f   :  { %v751_v57 = vpop.permute.xlu0 %750 }
 0x660   :  { %3828 = vmatmul.mubr.msk.bf16.vlgmr.msra.gmra.mrb[20].mxu1 %vm151_vm3, %v751_v57  ;;  %v1346_v57 = vsel %vm151_vm3, %v1344_v56, 0.0 }
 0x661   :  { %3833 = vmatprep.mubr.msk.bf16.mxu1 %vm4280_vm2, %v4279_v19 }
 0x733   :  { %v801_v58 = vpop.f32.mrb[20].mxu1 }
 0x734   :  { %v3829_v59 = vpop.f32.mrb[21].mxu1 }
 0x735   :  { %v804_v60 = vpop.f32.mrb[22].mxu1 }
 0x736   :  { %v808_v61 = vpack.c.bf16 %v804_v60, %v801_v58  ;;  %v3830_v62 = vpop.f32.mrb[23].mxu1  ;;  %v1345_v58 = vmul.f32 %v4486_v55, %v4486_v55  ;;  %v1067_v60 = vsel %vm1066_vm13, 1, %v4278_v0 }
 0x738   :  { %903 = vrot.lane.b32.xlu0 %v808_v61, %s4281_s27  ;;  %812 = vrot.lane.b32.xlu1 %v808_v61, %s4282_s28  ;;  %v1349_v59 = vsel %vm151_vm3, %v1345_v58, 0.0 }
 0x739   :  { %3838 = vmatpush3.bf16.msra.mxu0 %v808_v61 }
 0x73a   :  { %3849 = vmatprep.subr.bf16.mxu0 %v4279_v19 }
 0x73c   :  { %951 = vrot.lane.b32.xlu1 %v808_v61, %s4283_s29  ;;  %3840 = vmatmul.mubr.msk.bf16.vlgmr.msra.gmra.mrb[16].mxu0 %vm815_vm11, %v809_v63  ;;  %v1068_v61 = vmul.u32 4, %v1067_v60 }
 0x73d   :  { %3851 = vmatprep.mubr.msk.bf16.mxu0 %vm4280_vm2, %v4279_v19 }
 0x73e   :  { %v1069_v62 = vsub.s32 %v4423_v24, %v1068_v61 }
 0x740   :  { %v1070_v63 = vadd.s32 4294967295, %v1069_v62 }
 0x742   :  { %vm1071_vm14 = vcmp.ge.s32.totalorder %v1070_v63, 0  ;;  %vm1072_vm15 = vcmp.lt.s32.totalorder %v1070_v63, 4 }
 0x743   :  { %vm1073_vm8 = vmand %vm1071_vm14, %vm1072_vm15 }
 0x7aa   :  { %v813_v1 = vpop.permute.xlu1 %812  ;;  %v904_v3 = vpop.permute.xlu0 %903 }
 0x7ab   :  { %3832 = vmatpush3.bf16.msra.mxu1 %v813_v1  ;;  %v1086_v1 = vadd.s32 1, %v1069_v62 }
 0x7ac   :  { %3843 = vmatprep.subr.bf16.mxu1 %v4279_v19 }
 0x7ad   :  { %vm1087_vm0 = vcmp.ge.s32.totalorder %v1086_v1, 0  ;;  %vm1088_vm7 = vcmp.lt.s32.totalorder %v1086_v1, 4 }
 0x7ae   :  { %3834 = vmatmul.mubr.msk.bf16.vlgmr.msra.gmra.mrb[24].mxu1 %vm815_vm11, %v810_v2  ;;  %v952_v4 = vpop.permute.xlu1 %951  ;;  %vm1089_vm9 = vmand %vm1087_vm0, %vm1088_vm7 }
 0x7af   :  { %3844 = vmatpush3.bf16.msra.mxu1 %v904_v3  ;;  %3850 = vmatpush3.bf16.msra.mxu0 %v952_v4  ;;  %v4545_v3 = vsel %vm1073_vm8, 1.0, %v4279_v19 }
 0x7b0   :  { %3845 = vmatprep.mubr.msk.bf16.mxu1 %vm4280_vm2, %v4279_v19  ;;  %3855 = vmatprep.subr.bf16.mxu1 %v4279_v19 }
 0x7b1   :  { %3863 = vmatprep.subr.bf16.mxu0 %v4279_v19 }
 0x7b2   :  { %3852 = vmatmul.mubr.msk.bf16.vlgmr.msra.gmra.mrb[20].mxu0 %vm815_vm11, %v950_v5  ;;  %v4548_v5 = vsel %vm1089_vm9, 1.0, %v4279_v19 }
 0x7b3   :  { %3867 = vmatprep.mubr.msk.bf16.mxu0 %vm4280_vm2, %v4279_v19  ;;  %3864 = vmatpush3.bf16.msra.mxu0 %v4146_v39 }
 0x7b4   :  { %3865 = vmatprep.subr.bf16.mxu0 %v4279_v19 }
 0x7b6   :  { %3846 = vmatmul.mubr.msk.bf16.vlgmr.msra.gmra.mrb[28].mxu1 %vm815_vm11, %v902_v7 }
 0x7b7   :  { %3859 = vmatprep.mubr.msk.bf16.mxu1 %vm4280_vm2, %v4279_v19  ;;  %3856 = vmatpush3.bf16.msra.mxu1 %v4144_v8 }
 0x7b8   :  { %3857 = vmatprep.subr.bf16.mxu1 %v4279_v19  ;;  %3866 = vmatpush3.bf16.msra.mxu0 %v4147_v41 }
 0x7b9   :  { %4023 = vmatprep.subr.msk.bf16.mxu0 %vm4526_vm12, %v4522_v44 }
 0x7bb   :  { %3858 = vmatpush3.bf16.msra.mxu1 %v4145_v12 }
 0x7bc   :  { %3871 = vmatprep.subr.bf16.mxu1 %v4279_v19 }
 0x80f   :  { %v896_v10 = vpop.f32.mrb[16].mxu0 }
 0x810   :  { %v3841_v11 = vpop.f32.mrb[17].mxu0 }
 0x811   :  { %v899_v17 = vpop.f32.mrb[18].mxu0 }
 0x812   :  { %v3842_v18 = vpop.f32.mrb[19].mxu0  ;;  %v3557_v17 = vld [vmem:[#allocation4 + $0x28] ss:$0 sm:$0xff] }
 0x881   :  { %v853_v20 = vpop.f32.mrb[24].mxu1 }
 0x882   :  { %v897_v21 = vadd.f32 %v896_v10, %v853_v20  ;;  %v3835_v23 = vpop.f32.mrb[25].mxu1 }
 0x883   :  { %v856_v25 = vpop.f32.mrb[26].mxu1  ;;  %v1249_v23 = vld [vmem:[#allocation4 + $0x58] sm:$0xff] }
 0x884   :  { %v3836_v26 = vpop.f32.mrb[27].mxu1 }
 0x885   :  { %v991_v27 = vpop.f32.mrb[20].mxu0 }
 0x886   :  { %v3853_v28 = vpop.f32.mrb[21].mxu0 }
 0x887   :  { %v994_v29 = vpop.f32.mrb[22].mxu0  ;;  %v4148_v28 = vld [vmem:[#allocation2 + $0x1b0] ss:$8 sps:$4 sm:$0xff]  }
 0x888   :  { %v3854_v30 = vpop.f32.mrb[23].mxu0  ;;  %v4149_v29 = vld [vmem:[#allocation2 + $0x1c0] ss:$8 sps:$4 sm:$0xff]  }
 0x889   :  { %v943_v31 = vpop.f32.mrb[28].mxu1  ;;  %v3558_v30 = vld [vmem:[#allocation4 + $0x30] ss:$0 sm:$0xff] }
 0x88a   :  { %v949_v6 = vadd.f32 %v943_v31, %v897_v21  ;;  %v3847_v9 = vpop.f32.mrb[29].mxu1  ;;  %v1248_v21 = vld [vmem:[#allocation4 + $0x50] sm:$0xff] }
 0x88b   :  { %v946_v33 = vpop.f32.mrb[30].mxu1 }
 0x88c   :  { %v997_v34 = vadd.f32 %v991_v27, %v949_v6  ;;  %v3848_v35 = vpop.f32.mrb[31].mxu1  ;;  %v4027_v27 = vpack.c.bf16 %v1249_v23, %v1248_v21 }
 0x88e   :  { %v4515_v36 = vadd.f32 %v3551_v32, %v997_v34 }
 0x890   :  { %v1004_v37 = vmax.f32 %v4515_v36, 0.0 }
 0x892   :  { %v1009_v38 = vpack.c.bf16 %v1004_v37, %v1004_v37 }
 0x894   :  { %3860 = vmatmul.mubr.msk.bf16.vlgmr.msra.gmra.mrb[32].mxu1 %vm151_vm3, %v1009_v38 }
 0x895   :  { %3875 = vmatprep.mubr.msk.bf16.mxu1 %vm4280_vm2, %v4279_v19  ;;  %3872 = vmatpush3.bf16.msra.mxu1 %v4148_v28  ;;  %v1533_v28 = vld [vmem:[#allocation4 + $0x70] sm:$0xff] }
 0x896   :  { %3873 = vmatprep.subr.bf16.mxu1 %v4279_v19 }
 0x899   :  { %3874 = vmatpush3.bf16.msra.mxu1 %v4149_v29 }
 0x89a   :  { %3890 = vmatprep.subr.bf16.mxu1 %v4279_v19 }
 0x967   :  { %v1059_v49 = vpop.f32.mrb[32].mxu1 }
 0x968   :  { %1078 = vrot.lane.b32.xlu1 %v1059_v49, %s4282_s28  ;;  %1082 = vrot.lane.b32.xlu0 %v1059_v49, %s4281_s27  ;;  %v3861_v50 = vpop.f32.mrb[33].mxu1  ;;  %v1065_v2 = vrot.slane %v1059_v49, 7  ;;  %v3572_v49 = vld [vmem:[#allocation4 + $0x60] ss:$0 sm:$0xff] }
 0x969   :  { %v1062_v52 = vpop.f32.mrb[34].mxu1 }
 0x96a   :  { %v3862_v53 = vpop.f32.mrb[35].mxu1  ;;  %v1076_v8 = vmul.f32 %v4545_v3, %v1065_v2 }
 0x987   :  { %1347 = vadd.xlane.f32.xlu0 %v1346_v57  ;;  %v4578_v57 = vand.u32 127, %v466_v22 }
 0x98c   :  { %1350 = vadd.xlane.f32.xlu1 %v1349_v59 }
 0x9da   :  { %v1079_v4 = vpop.permute.xlu1 %1078  ;;  %v1083_v7 = vpop.permute.xlu0 %1082 }
 0x9db   :  { %v1085_v10 = vrot.slane %v1083_v7, 1  ;;  %v1081_v11 = vadd.f32 %v1079_v4, %v1076_v8 }
 0x9dd   :  { %v1092_v12 = vmul.f32 %v4548_v5, %v1085_v10 }
 0x9df   :  { %v1093_v18 = vadd.f32 %v1092_v12, %v1081_v11 }
 0x9e1   :  { %v1099_v20 = vadd.f32 %v3557_v17, %v1093_v18 }
 0x9e3   :  { %v1100_v25 = vmax.f32 %v1099_v20, 0.0 }
 0x9e5   :  { %v1105_v26 = vpack.c.bf16 %v1100_v25, %v1100_v25 }
 0x9e7   :  { %3868 = vmatmul.mubr.msk.bf16.vlgmr.msra.gmra.mrb[24].mxu0 %vm151_vm3, %v1105_v26 }
 0x9e8   :  { %4026 = vmatpush3.bf16.xpose.msk.msra.mxu0 %vm4526_vm12, %v4522_v44  ;;  %3887 = vmatprep.mubr.msk.f32.mxu0 %vm151_vm3, %v4484_v54 }
 0x9e9   :  { %4029 = vmatprep.subr.msk.bf16.mxu0 %vm4526_vm12, %v4027_v27 }
 0x9f0   :  { %4032 = vmatpush3.bf16.xpose.msk.msra.mxu0 %vm4526_vm12, %v4027_v27 }
 0x9f1   :  { %3909 = vmatprep.subr.bf16.mxu0 %v4279_v19 }
 0x9f7   :  { %3888 = vmatmul.mubr.msk.f32.vlgmr.msra.gmra.mrb[28].mxu0 %vm151_vm3, %v4486_v55 }
 0x9f8   :  { %3913 = vmatprep.mubr.msk.bf16.mxu0 %vm4280_vm2, %v4279_v19 }
 0xa14   :  { %v1348_v42 = vpop.xlane.xlu0 %1347 }
 0xa19   :  { %v1351_v43 = vpop.xlane.xlu1 %1350 }
 0xaba   :  { %v1160_v31 = vpop.f32.mrb[24].mxu0 }
 0xabb   :  { %v1161_v6 = vadd.f32 %v3558_v30, %v1160_v31  ;;  %v3869_v9 = vpop.f32.mrb[25].mxu0  ;;  %v4284_v30 = vmov 0.0|0.0   ;;  %v1534_v31 = vld [vmem:[#allocation4 + $0x78] sm:$0xff] }
 0xabc   :  { %v1163_v32 = vpop.f32.mrb[26].mxu0 }
 0xabd   :  { %v1166_v33 = vadd.f32 %v1161_v6, %v4515_v36  ;;  %v3870_v34 = vpop.f32.mrb[27].mxu0  ;;  %v1535_v6 = vld [vmem:[#allocation4 + $0x80] sm:$0xff] }
 0xabe   :  { %v4038_v9 = vpack.c.bf16 %v1535_v6, %v1534_v31 }
 0xabf   :  { %v1171_v35 = vpack.c.bf16 %v1166_v33, %v1166_v33 }
 0xac1   :  { %3876 = vmatmul.mubr.msk.bf16.vlgmr.msra.gmra.mrb[36].mxu1 %vm151_vm3, %v1171_v35 }
 0xac2   :  { %3891 = vmatpush3.bf16.msra.mxu1 %v4522_v44  ;;  %3894 = vmatprep.mubr.msk.bf16.mxu1 %vm4280_vm2, %v4279_v19 }
 0xac3   :  { %3892 = vmatprep.subr.bf16.mxu1 %v4279_v19 }
 0xac6   :  { %3893 = vmatpush3.bf16.msra.mxu1 %v4027_v27  ;;  %v1532_v27 = vld [vmem:[#allocation4 + $0x68] sm:$0xff] }
 0xac7   :  { %v4034_v29 = vpack.c.bf16 %v1533_v28, %v1532_v27  ;;  %4033 = vmatprep.subr.bf16.mxu1 %v4284_v30  ;;  %v3581_v28 = vld [vmem:[#allocation4 + $0x88] ss:$0 sm:$0xff] }
 0xac9   :  { %3910 = vmatpush3.bf16.msra.mxu0 %v4034_v29 }
 0xaca   :  { %v3889_v37 = vpop.f32.mrb[28].mxu0  ;;  %3911 = vmatprep.subr.bf16.mxu0 %v4279_v19 }
 0xacb   :  { %v1353_v38 = vmul.f32 2.0, %v3889_v37  ;;  %v1335_v39 = vpop.f32.mrb[29].mxu0 }
 0xacc   :  { %v1352_v41 = vmul.f32 2.0, %v1335_v39 }
 0xacd   :  { %v1355_v36 = vsub.f32 %v1351_v43, %v1353_v38  ;;  %3912 = vmatpush3.bf16.msra.mxu0 %v4038_v9 }
 0xace   :  { %v1354_v50 = vsub.f32 %v1348_v42, %v1352_v41  ;;  %3917 = vmatprep.subr.bf16.mxu0 %v4279_v19 }
 0xacf   :  { %v1361_v56 = vadd.f32 %v3572_v49, %v1355_v36 }
 0xad0   :  { %v1360_v52 = vadd.f32 %v3572_v49, %v1354_v50 }
 0xad1   :  { %v1365_v44 = vsel %vm151_vm3, %v1361_v56, inf }
 0xad2   :  { %v1362_v53 = vsel %vm151_vm3, %v1360_v52, inf }
 0xad3   :  { %1363 = vmin.xlane.f32.xlu0 %v1362_v53 }
 0xad7   :  { %1366 = vmin.xlane.f32.xlu0 %v1365_v44 }
 0xb60   :  { %v4580_v58 = vpop.xlane.xlu0 %1363 }
 0xb61   :  { %vm1370_vm10 = vcmp.eq.f32.partialorder %v1360_v52, %v4580_v58 }
 0xb62   :  { %v1372_v59 = vsel %vm1370_vm10, %v4578_v57, 32  ;;  %vm2067_vm10 = vcmask 1043456  }
 0xb63   :  { %v1374_v60 = vsel %vm151_vm3, %v1372_v59, 2147483647 }
 0xb64   :  { %v4585_v61 = vpop.xlane.xlu0 %1366  ;;  %v1376_v62 = vshra.s32 %v1374_v60, 16  ;;  %v1375_v12 = vand.u32 65535, %v1374_v60 }
 0xb65   :  { %vm1371_vm13 = vcmp.eq.f32.partialorder %v1361_v56, %v4585_v61 }
 0xb66   :  { %v1373_v63 = vsel %vm1371_vm13, %v4578_v57, 32  ;;  %v1378_v1 = vcvt.s32.f32 %v1376_v62  ;;  %v1377_v18 = vcvt.s32.f32 %v1375_v12  ;;  %v3565_v62 = vld [vmem:[#allocation4 + $0x38] ss:$0 sm:$0xff]  ;;  %vm2063_vm13 = vcmask 64512  }
 0xb67   :  { %v1389_v2 = vsel %vm151_vm3, %v1373_v63, 2147483647 }
 0xb68   :  { %1379 = vmin.xlane.f32.xlu1 %v1378_v1  ;;  %v1391_v22 = vshra.s32 %v1389_v2, 16  ;;  %v1390_v20 = vand.u32 65535, %v1389_v2 }
 0xb6a   :  { %v1393_v4 = vcvt.s32.f32 %v1391_v22  ;;  %v1392_v25 = vcvt.s32.f32 %v1390_v20 }
 0xb6c   :  { %1394 = vmin.xlane.f32.xlu0 %v1393_v4 }
 0xb94   :  { %v1221_v7 = vpop.f32.mrb[36].mxu1 }
 0xb95   :  { %v3877_v8 = vpop.f32.mrb[37].mxu1  ;;  %v1227_v38 = vrot.slane %v1221_v7, 7 }
 0xb96   :  { %v1224_v10 = vpop.f32.mrb[38].mxu1 }
 0xb97   :  { %v3878_v11 = vpop.f32.mrb[39].mxu1  ;;  %v1228_v52 = vmul.f32 %v4545_v3, %v1227_v38 }
 0xbf5   :  { %v1380_v17 = vpop.xlane.xlu1 %1379 }
 0xbf6   :  { %vm1381_vm14 = vcmp.eq.f32.partialorder %v1378_v1, %v1380_v17  ;;  %v1386_v32 = vcvt.f32.s32 %v1380_v17 }
 0xbf7   :  { %v1382_v21 = vsel %vm1381_vm14, %v1377_v18, inf }
 0xbf8   :  { %1383 = vmin.xlane.f32.xlu1 %v1382_v21  ;;  %v1387_v34 = vshll.u32 %v1386_v32, 16 }
 0xbf9   :  { %v1395_v23 = vpop.xlane.xlu0 %1394 }
 0xbfa   :  { %vm1396_vm15 = vcmp.eq.f32.partialorder %v1393_v4, %v1395_v23  ;;  %v1401_v35 = vcvt.f32.s32 %v1395_v23 }
 0xbfb   :  { %v1397_v26 = vsel %vm1396_vm15, %v1392_v25, inf }
 0xbfc   :  { %1398 = vmin.xlane.f32.xlu0 %v1397_v26  ;;  %v1402_v43 = vshll.u32 %v1401_v35, 16 }
 0xc09   :  { %1234 = vrot.lane.b32.xlu1 %v1221_v7, %s4281_s27 }
 0xc12   :  { %1230 = vrot.lane.b32.xlu0 %v1221_v7, %s4282_s28 }
 0xc85   :  { %v1384_v33 = vpop.xlane.xlu1 %1383 }
 0xc86   :  { %v1385_v37 = vcvt.f32.s32 %v1384_v33 }
 0xc88   :  { %v1388_v39 = vadd.s32 %v1387_v34, %v1385_v37 }
 0xc89   :  { %v1399_v41 = vpop.xlane.xlu0 %1398  ;;  %v1235_v42 = vpop.permute.xlu1 %1234 }
 0xc8a   :  { %v1400_v49 = vcvt.f32.s32 %v1399_v41  ;;  %v1237_v36 = vrot.slane %v1235_v42, 1  ;;  %vm1404_vm0 = vcmp.eq.s32.totalorder %v4578_v57, %v1388_v39 }
 0xc8b   :  { %v3573_v59 = vsel %vm1404_vm0, 1.0, %v4279_v19  ;;  %vm3430_vm0 = vcmp.eq.s32.totalorder %v4578_v57, 1 }
 0xc8c   :  { %v1403_v50 = vadd.s32 %v1402_v43, %v1400_v49  ;;  %v1238_v56 = vmul.f32 %v4548_v5, %v1237_v36 }
 0xc8d   :  { %v1231_v53 = vpop.permute.xlu0 %1230 }
 0xc8e   :  { %vm1405_vm7 = vcmp.eq.s32.totalorder %v4578_v57, %v1403_v50  ;;  %v1233_v44 = vadd.f32 %v1231_v53, %v1228_v52  ;;  %v4639_v50 = vld [vmem:[%s4970_s3] sm:$0xff]  ;;  %v4150_v53 = vld [vmem:[#allocation2 + $0x1d0] ss:$8 sps:$4 sm:$0xff]  }
 0xc8f   :  { %v3574_v60 = vsel %vm1405_vm7, 1.0, %v4279_v19  ;;  %vm3436_vm7 = vcmp.eq.s32.totalorder %v4578_v57, 2 }
 0xc90   :  { %v1410_v63 = vpack.c.bf16 %v3574_v60, %v3573_v59  ;;  %v1239_v1 = vadd.f32 %v1238_v56, %v1233_v44  ;;  %v4151_v44 = vld [vmem:[#allocation2 + $0x1e0] ss:$8 sps:$4 sm:$0xff]  }
 0xc92   :  { %v4600_v2 = vadd.f32 %v3565_v62, %v1239_v1  ;;  %3895 = vmatmul.mubr.msk.bf16.vlgmr.msra.gmra.mrb[40].mxu1 %vm151_vm3, %v1410_v63 }
 0xc93   :  { %4036 = vmatpush3.bf16.xpose.msk.msra.mxu1 %vm4526_vm12, %v4034_v29  ;;  %3906 = vmatprep.mubr.msk.f32.mxu1 %vm4280_vm2, %v4279_v19 }
 0xc94   :  { %v1622_v22 = vmul.f32 %v4600_v2, %v4600_v2  ;;  %4037 = vmatprep.subr.bf16.mxu1 %v4284_v30 }
 0xc96   :  { %v1623_v4 = vsel %vm151_vm3, %v1622_v22, 0.0  ;;  %v4152_v22 = vld [vmem:[#allocation2 + $0x1f0] ss:$8 sps:$4 sm:$0xff]  }
 0xc97   :  { %1624 = vadd.xlane.f32.xlu1 %v1623_v4  ;;  %v4153_v4 = vld [vmem:[#allocation2 + $0x200] ss:$8 sps:$4 sm:$0xff]  }
 0xc9b   :  { %4040 = vmatpush3.bf16.xpose.msk.msra.mxu1 %vm4526_vm12, %v4038_v9 }
 0xc9c   :  { %3925 = vmatprep.subr.bf16.mxu1 %v4279_v19 }
 0xca2   :  { %3907 = vmatmul.mubr.msk.f32.vlgmr.msra.gmra.mrb[44].mxu1 %vm151_vm3, %v4600_v2 }
 0xca3   :  { %3929 = vmatprep.mubr.msk.bf16.mxu1 %vm4280_vm2, %v4279_v19  ;;  %3926 = vmatpush3.bf16.msra.mxu1 %v4152_v22 }
 0xca4   :  { %3927 = vmatprep.subr.bf16.mxu1 %v4639_v50 }
 0xca7   :  { %3928 = vmatpush3.bf16.msra.mxu1 %v4153_v4 }
 0xca8   :  { %3941 = vmatprep.subr.bf16.mxu1 %v4639_v50 }
 0xd24   :  { %v1625_v27 = vpop.xlane.xlu1 %1624 }
 0xd65   :  { %v4617_v7 = vpop.f32.mrb[40].mxu1 }
 0xd66   :  { %v1457_v8 = vsub.f32 %v4617_v7, %v4484_v54  ;;  %v3896_v10 = vpop.f32.mrb[41].mxu1 }
 0xd67   :  { %v4621_v11 = vpop.f32.mrb[42].mxu1 }
 0xd68   :  { %v1459_v12 = vmul.f32 %v1457_v8, %v1457_v8  ;;  %v1458_v45 = vsub.f32 %v4621_v11, %v4486_v55  ;;  %v3897_v17 = vpop.f32.mrb[43].mxu1 }
 0xd6a   :  { %v1460_v18 = vmul.f32 %v1458_v45, %v1458_v45  ;;  %v1461_v20 = vsel %vm151_vm3, %v1459_v12, 0.0 }
 0xd6c   :  { %v1462_v21 = vsel %vm151_vm3, %v1460_v18, 0.0 }
 0xd6d   :  { %v4627_v23 = vadd.f32 %v1462_v21, %v1461_v20 }
 0xd75   :  { %v1618_v19 = vpop.f32.mrb[44].mxu1 }
 0xd76   :  { %v1626_v25 = vmul.f32 2.0, %v1618_v19  ;;  %v3908_v26 = vpop.f32.mrb[45].mxu1 }
 0xd78   :  { %v1627_v29 = vsub.f32 %v1625_v27, %v1626_v25  ;;  %v3587_v27 = vld [vmem:[#allocation4 + $0x90] ss:$0 sm:$0xff] }
 0xd7a   :  { %v1632_v30 = vadd.f32 %v3581_v28, %v1627_v29 }
 0xd7c   :  { %v1633_v31 = vsel %vm151_vm3, %v1632_v30, inf }
 0xd7d   :  { %1634 = vmin.xlane.f32.xlu0 %v1633_v31 }
 0xe0a   :  { %v4630_v6 = vpop.xlane.xlu0 %1634 }
 0xe0b   :  { %vm1636_vm12 = vcmp.eq.f32.partialorder %v1632_v30, %v4630_v6 }
 0xe0c   :  { %v1637_v9 = vsel %vm1636_vm12, %v4578_v57, 32  ;;  %vm3442_vm12 = vcmp.eq.s32.totalorder %v4578_v57, 3 }
 0xe0d   :  { %v1638_v32 = vsel %vm151_vm3, %v1637_v9, 2147483647  ;;  %v4154_v9 = vld [vmem:[#allocation2 + $0x210] ss:$8 sps:$4 sm:$0xff]  }
 0xe0e   :  { %v1640_v33 = vshra.s32 %v1638_v32, 16  ;;  %v1639_v35 = vand.u32 65535, %v1638_v32  ;;  %v4155_v32 = vld [vmem:[#allocation2 + $0x220] ss:$8 sps:$4 sm:$0xff]  }
 0xe10   :  { %v1642_v34 = vcvt.s32.f32 %v1640_v33  ;;  %v1641_v38 = vcvt.s32.f32 %v1639_v35 }
 0xe12   :  { %1643 = vmin.xlane.f32.xlu1 %v1642_v34 }
 0xe9f   :  { %v1644_v37 = vpop.xlane.xlu1 %1643 }
 0xea0   :  { %vm1645_vm8 = vcmp.eq.f32.partialorder %v1642_v34, %v1644_v37  ;;  %v1650_v41 = vcvt.f32.s32 %v1644_v37 }
 0xea1   :  { %v1646_v39 = vsel %vm1645_vm8, %v1641_v38, inf  ;;  %vm3448_vm8 = vcmp.eq.s32.totalorder %v4578_v57, 4 }
 0xea2   :  { %1647 = vmin.xlane.f32.xlu0 %v1646_v39  ;;  %v1651_v43 = vshll.u32 %v1650_v41, 16 }
 0xf2f   :  { %v1648_v42 = vpop.xlane.xlu0 %1647 }
 0xf30   :  { %v1649_v49 = vcvt.f32.s32 %v1648_v42 }
 0xf32   :  { %v1652_v36 = vadd.s32 %v1651_v43, %v1649_v49 }
 0xf34   :  { %vm1653_vm9 = vcmp.eq.s32.totalorder %v4578_v57, %v1652_v36 }
 0xf35   :  { %v3582_v52 = vsel %vm1653_vm9, 1.0, %v4639_v50  ;;  %vm3454_vm9 = vcmp.eq.s32.totalorder %v4578_v57, 5 }
 0xf36   :  { %v1656_v56 = vpack.c.bf16 %v3582_v52, %v3582_v52  ;;  %v3591_v52 = vld [vmem:[#allocation4 + $0x98] ss:$0 sm:$0xff] }
 0xf38   :  { %3914 = vmatmul.mubr.msk.bf16.vlgmr.msra.gmra.mrb[32].mxu0 %vm151_vm3, %v1656_v56 }
 0xf39   :  { %3918 = vmatpush3.bf16.msra.mxu0 %v4150_v53  ;;  %3921 = vmatprep.mubr.msk.bf16.mxu0 %vm4280_vm2, %v4639_v50 }
 0xf3a   :  { %3919 = vmatprep.subr.bf16.mxu0 %v4639_v50 }
 0xf3d   :  { %3920 = vmatpush3.bf16.msra.mxu0 %v4151_v44 }
 0xf3e   :  { %3933 = vmatprep.subr.bf16.mxu0 %v4639_v50 }
0x100b   :  { %v4647_v59 = vpop.f32.mrb[32].mxu0 }
0x100c   :  { %v1768_v60 = vpack.c.bf16 %v4647_v59, %v4647_v59  ;;  %v3915_v62 = vpop.f32.mrb[33].mxu0 }
0x100d   :  { %v1699_v63 = vpop.f32.mrb[34].mxu0  ;;  %v4156_v62 = vld [vmem:[#allocation2 + $0x230] ss:$8 sps:$4 sm:$0xff]  }
0x100e   :  { %v3916_v1 = vpop.f32.mrb[35].mxu0  ;;  %3922 = vmatmul.mubr.msk.bf16.vlgmr.msra.gmra.mrb[36].mxu0 %vm151_vm3, %v1768_v60  ;;  %v4157_v63 = vld [vmem:[#allocation2 + $0x240] ss:$8 sps:$4 sm:$0xff]  }
0x100f   :  { %3937 = vmatprep.mubr.msk.bf16.mxu0 %vm4280_vm2, %v4639_v50  ;;  %3934 = vmatpush3.bf16.msra.mxu0 %v4154_v9 }
0x1010   :  { %3935 = vmatprep.subr.bf16.mxu0 %v4639_v50 }
0x1013   :  { %3936 = vmatpush3.bf16.msra.mxu0 %v4155_v32  ;;  %v4160_v32 = vld [vmem:[#allocation2 + $0x280] ss:$8 sps:$4 sm:$0xff]  }
0x1014   :  { %3949 = vmatprep.subr.bf16.mxu0 %v4639_v50 }
0x10e1   :  { %v1818_v8 = vpop.f32.mrb[36].mxu0 }
0x10e2   :  { %1827 = vrot.lane.b32.xlu0 %v1818_v8, %s4282_s28  ;;  %1831 = vrot.lane.b32.xlu1 %v1818_v8, %s4281_s27  ;;  %v3923_v10 = vpop.f32.mrb[37].mxu0  ;;  %v1824_v17 = vrot.slane %v1818_v8, 7 }
0x10e3   :  { %v1821_v12 = vpop.f32.mrb[38].mxu0 }
0x10e4   :  { %v3924_v45 = vpop.f32.mrb[39].mxu0  ;;  %v1825_v21 = vmul.f32 %v4545_v3, %v1824_v17 }
0x1154   :  { %v1828_v18 = vpop.permute.xlu0 %1827  ;;  %v1832_v20 = vpop.permute.xlu1 %1831 }
0x1155   :  { %v1834_v19 = vrot.slane %v1832_v20, 1  ;;  %v1830_v25 = vadd.f32 %v1828_v18, %v1825_v21 }
0x1157   :  { %v1835_v26 = vmul.f32 %v4548_v5, %v1834_v19 }
0x1159   :  { %v1836_v28 = vadd.f32 %v1835_v26, %v1830_v25  ;;  %v4158_v25 = vld [vmem:[#allocation2 + $0x250] ss:$8 sps:$4 sm:$0xff]  }
0x115b   :  { %v1842_v29 = vadd.f32 %v3587_v27, %v1836_v28  ;;  %v4159_v28 = vld [vmem:[#allocation2 + $0x260] ss:$8 sps:$4 sm:$0xff]  }
0x115d   :  { %v1843_v30 = vmax.f32 %v1842_v29, 0.0 }
0x115f   :  { %v1848_v31 = vpack.c.bf16 %v1843_v30, %v1843_v30 }
0x1161   :  { %3930 = vmatmul.mubr.msk.bf16.vlgmr.msra.gmra.mrb[48].mxu1 %vm151_vm3, %v1848_v31 }
0x1162   :  { %3945 = vmatprep.mubr.msk.bf16.mxu1 %vm4280_vm2, %v4639_v50  ;;  %3942 = vmatpush3.bf16.msra.mxu1 %v4156_v62 }
0x1163   :  { %3943 = vmatprep.subr.bf16.mxu1 %v4639_v50 }
0x1166   :  { %3944 = vmatpush3.bf16.msra.mxu1 %v4157_v63 }
0x1167   :  { %3955 = vmatprep.subr.bf16.mxu1 %v4639_v50 }
0x1234   :  { %v1898_v33 = vpop.f32.mrb[48].mxu1 }
0x1235   :  { %1911 = vrot.lane.b32.xlu1 %v1898_v33, %s4281_s27  ;;  %v3931_v34 = vpop.f32.mrb[49].mxu1  ;;  %v1904_v38 = vrot.slane %v1898_v33, 7 }
0x1236   :  { %v1901_v35 = vpop.f32.mrb[50].mxu1 }
0x1237   :  { %v3932_v37 = vpop.f32.mrb[51].mxu1  ;;  %v1905_v42 = vmul.f32 %v4545_v3, %v1904_v38  ;;  %v3592_v3 = vld [vmem:[#allocation4 + $0xa0] ss:$0 sm:$0xff] }
0x1239   :  { %1907 = vrot.lane.b32.xlu1 %v1898_v33, %s4282_s28  ;;  %v4161_v33 = vld [vmem:[#allocation2 + $0x270] ss:$8 sps:$4 sm:$0xff]  }
0x12a7   :  { %v1912_v39 = vpop.permute.xlu1 %1911 }
0x12a8   :  { %v1914_v41 = vrot.slane %v1912_v39, 1  ;;  %v4162_v39 = vld [vmem:[#allocation2 + $0x290] ss:$8 sps:$4 sm:$0xff]  }
0x12aa   :  { %v1915_v49 = vmul.f32 %v4548_v5, %v1914_v41  ;;  %v4164_v41 = vld [vmem:[#allocation2 + $0x294] ss:$8 sps:$4 sm:$0xff]  }
0x12ab   :  { %v1908_v43 = vpop.permute.xlu1 %1907 }
0x12ac   :  { %v1910_v36 = vadd.f32 %v1908_v43, %v1905_v42  ;;  %v4167_v42 = vld [vmem:[#allocation2 + $0x2a4] ss:$8 sps:$4 sm:$0xff]   ;;  %v4165_v43 = vld [vmem:[#allocation2 + $0x2a0] ss:$8 sps:$4 sm:$0xff]  }
0x12ae   :  { %v1916_v53 = vadd.f32 %v1915_v49, %v1910_v36  ;;  %v4170_v49 = vld [vmem:[#allocation2 + $0x2b4] ss:$8 sps:$4 sm:$0xff]   ;;  %v4168_v36 = vld [vmem:[#allocation2 + $0x2b0] ss:$8 sps:$4 sm:$0xff]  }
0x12b0   :  { %v1922_v56 = vadd.f32 %v3591_v52, %v1916_v53 }
0x12b2   :  { %v1923_v44 = vmax.f32 %v1922_v56, 0.0 }
0x12b4   :  { %v1928_v60 = vpack.c.bf16 %v1923_v44, %v1923_v44 }
0x12b6   :  { %3938 = vmatmul.mubr.msk.bf16.vlgmr.msra.gmra.mrb[40].mxu0 %vm151_vm3, %v1928_v60 }
0x12b7   :  { %3951 = vmatprep.mubr.msk.bf16.mxu0 %vm4280_vm2, %v4639_v50 }
0x1389   :  { %v1983_v5 = vpop.f32.mrb[40].mxu0 }
0x138a   :  { %v1984_v1 = vadd.f32 %v3592_v3, %v1983_v5  ;;  %v3939_v22 = vpop.f32.mrb[41].mxu0  ;;  %v4173_v5 = vld [vmem:[#allocation2 + $0x2c4] ss:$8 sps:$4 sm:$0xff]  }
0x138b   :  { %v1986_v4 = vpop.f32.mrb[42].mxu0  ;;  %v4171_v22 = vld [vmem:[#allocation2 + $0x2c0] ss:$8 sps:$4 sm:$0xff]  }
0x138c   :  { %v1989_v8 = vadd.f32 %v1984_v1, %v1842_v29  ;;  %v3940_v10 = vpop.f32.mrb[43].mxu0 }
0x138e   :  { %v1994_v12 = vpack.c.bf16 %v1989_v8, %v1989_v8 }
0x1390   :  { %3946 = vmatmul.mubr.msk.bf16.vlgmr.msra.gmra.mrb[52].mxu1 %vm151_vm3, %v1994_v12 }
0x1391   :  { %3957 = vmatprep.mubr.msk.bf16.mxu1 %vm4280_vm2, %v4639_v50 }
0x1463   :  { %v2044_v45 = vpop.f32.mrb[52].mxu1 }
0x1464   :  { %v2050_v17 = vpack.c.bf16 %v2044_v45, %v2044_v45  ;;  %v3947_v18 = vpop.f32.mrb[53].mxu1 }
0x1465   :  { %v2047_v20 = vpop.f32.mrb[54].mxu1 }
0x1466   :  { %2171 = vrot.lane.b32.xlu1 %v2050_v17, %s4281_s27  ;;  %2061 = vrot.lane.b32.xlu0 %v2050_v17, %s4282_s28  ;;  %v3948_v21 = vpop.f32.mrb[55].mxu1  ;;  %v2121_v19 = vsel %vm2067_vm10, %v2050_v17, 0 }
0x1467   :  { %3956 = vmatpush3.bf16.msra.mxu1 %v2121_v19  ;;  %v3607_v21 = vld [vmem:[#allocation4 + $0xa8] ss:$0 sm:$0xff] }
0x1468   :  { %3967 = vmatprep.subr.bf16.mxu1 %v4639_v50 }
0x146a   :  { %2229 = vrot.lane.b32.xlu0 %v2050_v17, %s4283_s29  ;;  %3958 = vmatmul.mubr.msk.bf16.vlgmr.msra.gmra.mrb[56].mxu1 %vm2063_vm13, %v4158_v25 }
0x146b   :  { %3969 = vmatprep.mubr.msk.bf16.mxu1 %vm4280_vm2, %v4639_v50 }
0x14d8   :  { %v2062_v26 = vpop.permute.xlu0 %2061  ;;  %v2172_v29 = vpop.permute.xlu1 %2171 }
0x14d9   :  { %v2069_v27 = vsel %vm2067_vm10, %v2062_v26, 0  ;;  %v2177_v31 = vsel %vm2067_vm10, %v2172_v29, 0 }
0x14da   :  { %3950 = vmatpush3.bf16.msra.mxu0 %v2069_v27 }
0x14db   :  { %3961 = vmatprep.subr.bf16.mxu0 %v4639_v50 }
0x14dc   :  { %v2230_v30 = vpop.permute.xlu0 %2229 }
0x14dd   :  { %v2235_v9 = vsel %vm2067_vm10, %v2230_v30, 0  ;;  %3952 = vmatmul.mubr.msk.bf16.vlgmr.msra.gmra.mrb[44].mxu0 %vm2063_vm13, %v4159_v28  ;;  %vm3460_vm10 = vcmp.eq.s32.totalorder %v4578_v57, 6 }
0x14de   :  { %3962 = vmatpush3.bf16.msra.mxu0 %v2177_v31  ;;  %3968 = vmatpush3.bf16.msra.mxu1 %v2235_v9 }
0x14df   :  { %3963 = vmatprep.mubr.msk.bf16.mxu0 %vm4280_vm2, %v4639_v50  ;;  %2349 = vmatprep.subr.bf16.mxu0 %v4164_v41 }
0x14e1   :  { %3970 = vmatmul.mubr.msk.bf16.vlgmr.msra.gmra.mrb[60].mxu1 %vm2063_vm13, %v4160_v32 }
0x14e2   :  { %2509 = vmatprep.mubr.bf16.mxu1 %v4278_v0 }
0x14e5   :  { %3964 = vmatmul.mubr.msk.bf16.vlgmr.msra.gmra.mrb[48].mxu0 %vm2063_vm13, %v4161_v33  ;;  %v4174_v33 = vld [vmem:[#allocation2 + $0x2d0] ss:$8 sps:$4 sm:$0xff]   ;;  %vm3466_vm13 = vcmp.eq.s32.totalorder %v4578_v57, 7 }
0x14e6   :  { %2381 = vmatprep.mubr.bf16.mxu0 %v4278_v0  ;;  %2350 = vmatpush1.bf16.msra.mxu0 %v4162_v39  ;;  %v4180_v39 = vld [vmem:[#allocation2 + $0x2f0] ss:$8 sps:$4 sm:$0xff]  }
0x14e7   :  { %2351 = vmatprep.subr.bf16.mxu0 %v4167_v42 }
0x14ea   :  { %2352 = vmatpush1.bf16.msra.mxu0 %v4165_v43 }
0x14eb   :  { %2353 = vmatprep.subr.bf16.mxu0 %v4170_v49 }
0x14ee   :  { %2354 = vmatpush1.bf16.msra.mxu0 %v4168_v36 }
0x14ef   :  { %2355 = vmatprep.subr.bf16.mxu0 %v4173_v5 }
0x14f2   :  { %2356 = vmatpush1.bf16.msra.mxu0 %v4171_v22 }
0x14f3   :  { %3973 = vmatprep.subr.bf16.mxu0 %v4639_v50 }
0x153d   :  { %v2157_v34 = vpop.f32.mrb[56].mxu1 }
0x153e   :  { %v3959_v35 = vpop.f32.mrb[57].mxu1 }
0x153f   :  { %v2160_v37 = vpop.f32.mrb[58].mxu1  ;;  %v4179_v35 = vld [vmem:[#allocation2 + $0x2e4] ss:$8 sps:$4 sm:$0xff]  }
0x1540   :  { %v3960_v38 = vpop.f32.mrb[59].mxu1 }
0x1541   :  { %v4182_v38 = vld [vmem:[#allocation2 + $0x2f4] ss:$8 sps:$4 sm:$0xff]  }
0x15b0   :  { %v2105_v52 = vpop.f32.mrb[44].mxu0 }
0x15b1   :  { %v2158_v53 = vadd.f32 %v2157_v34, %v2105_v52  ;;  %v3953_v56 = vpop.f32.mrb[45].mxu0  ;;  %v4176_v34 = vld [vmem:[#allocation2 + $0x2d4] ss:$8 sps:$4 sm:$0xff]  }
0x15b2   :  { %v2108_v44 = vpop.f32.mrb[46].mxu0  ;;  %2477 = vmatprep.subr.bf16.mxu1 %v4176_v34 }
0x15b3   :  { %v2161_v60 = vadd.f32 %v2160_v37, %v2108_v44  ;;  %v3954_v62 = vpop.f32.mrb[47].mxu0  ;;  %2478 = vmatpush1.bf16.msra.mxu1 %v4174_v33  ;;  %v4177_v37 = vld [vmem:[#allocation2 + $0x2e0] ss:$8 sps:$4 sm:$0xff]   ;;  %v4195_v33 = vld [vmem:[#allocation2 + $0x364] ss:$8 sps:$4 sm:$0xff]  }
0x15b4   :  { %v2271_v63 = vpop.f32.mrb[60].mxu1  ;;  %2479 = vmatprep.subr.bf16.mxu1 %v4179_v35 }
0x15b5   :  { %v3971_v3 = vpop.f32.mrb[61].mxu1 }
0x15b6   :  { %v2274_v1 = vpop.f32.mrb[62].mxu1 }
0x15b7   :  { %v3972_v4 = vpop.f32.mrb[63].mxu1  ;;  %2480 = vmatpush1.bf16.msra.mxu1 %v4177_v37 }
0x15b8   :  { %v2213_v8 = vpop.f32.mrb[48].mxu0  ;;  %2481 = vmatprep.subr.bf16.mxu1 %v4182_v38 }
0x15b9   :  { %v2220_v10 = vadd.f32 %v2213_v8, %v2158_v53  ;;  %v3965_v12 = vpop.f32.mrb[49].mxu0  ;;  %v3617_v8 = vld [vmem:[#allocation4 + $0xb0] ss:$0 sm:$0xff] }
0x15ba   :  { %v2216_v45 = vpop.f32.mrb[50].mxu0 }
0x15bb   :  { %v2278_v17 = vadd.f32 %v2271_v63, %v2220_v10  ;;  %v2221_v18 = vadd.f32 %v2216_v45, %v2161_v60  ;;  %v3966_v20 = vpop.f32.mrb[51].mxu0  ;;  %2482 = vmatpush1.bf16.msra.mxu1 %v4180_v39  ;;  %v4193_v39 = vld [vmem:[#allocation2 + $0x360] ss:$8 sps:$4 sm:$0xff]  }
0x15bd   :  { %v2279_v19 = vadd.f32 %v2274_v1, %v2221_v18  ;;  %v2285_v25 = vadd.f32 %v3607_v21, %v2278_v17 }
0x15bf   :  { %v2286_v26 = vadd.f32 %v3607_v21, %v2279_v19 }
0x15c1   :  { %v4101_v27 = vpack.i.bf16 %v2286_v26, %v2285_v25 }
0x15c3   :  { %4102 = vrot.lane.b32.xlu1 %v4101_v27, %s4283_s29  ;;  %v4186_v27 = vld [vmem:[#allocation2 + $0x310] ss:$8 sps:$4 sm:$0xff]  }
0x1635   :  { %v4103_v28 = vpop.permute.xlu1 %4102 }
0x1636   :  { %v4105_v29 = vunpack.i.h.bf16 %v4103_v28  ;;  %v4104_v30 = vunpack.i.l.bf16 %v4103_v28  ;;  %v4187_v28 = vld [vmem:[#allocation2 + $0x320] ss:$8 sps:$4 sm:$0xff]  }
0x1638   :  { %v2296_v31 = vsel %vm151_vm3, %v4621_v11, %v4105_v29  ;;  %v2295_v9 = vsel %vm151_vm3, %v4617_v7, %v4104_v30  ;;  %v4185_v11 = vld [vmem:[#allocation2 + $0x304] ss:$8 sps:$4 sm:$0xff]   ;;  %v4183_v7 = vld [vmem:[#allocation2 + $0x300] ss:$8 sps:$4 sm:$0xff]   ;;  %v4188_v29 = vld [vmem:[#allocation2 + $0x330] ss:$8 sps:$4 sm:$0xff]  }
0x1639   :  { %v2305_v32 = vpack.c.bf16 %v2296_v31, %v2295_v9  ;;  %2483 = vmatprep.subr.bf16.mxu1 %v4185_v11  ;;  %v4189_v30 = vld [vmem:[#allocation2 + $0x340] ss:$8 sps:$4 sm:$0xff]   ;;  %v4190_v9 = vld [vmem:[#allocation2 + $0x350] ss:$8 sps:$4 sm:$0xff]  }
0x163a   :  { %2484 = vmatpush1.bf16.msra.mxu1 %v4183_v7 }
0x163b   :  { %3616 = vmatmul.mubr.msk.bf16.vlgmr.msra.gmra.mrb[52].mxu0 %vm417_vm4, %v2305_v32  ;;  %v4192_v32 = vld [vmem:[#allocation2 + $0x354] ss:$8 sps:$4 sm:$0xff]  }
0x163c   :  { %3981 = vmatprep.mubr.msk.bf16.mxu0 %vm4280_vm2, %v4639_v50  ;;  %3974 = vmatpush3.bf16.msra.mxu0 %v4186_v27  ;;  %vm1474_vm2 = vcmask 7168  }
0x163d   :  { %3975 = vmatprep.subr.bf16.mxu0 %v4639_v50  ;;  %2689 = vmatprep.subr.bf16.mxu1 %v4192_v32 }
0x1640   :  { %3976 = vmatpush3.bf16.msra.mxu0 %v4187_v28 }
0x1641   :  { %3977 = vmatprep.subr.bf16.mxu0 %v4639_v50 }
0x1644   :  { %3978 = vmatpush3.bf16.msra.mxu0 %v4188_v29 }
0x1645   :  { %3979 = vmatprep.subr.bf16.mxu0 %v4639_v50 }
0x1648   :  { %3980 = vmatpush3.bf16.msra.mxu0 %v4189_v30 }
0x170e   :  { %v2383_v41 = vpop.f32.mrb[52].mxu0 }
0x170f   :  { %2400 = vrot.lane.b32.xlu0 %v2383_v41, %s4281_s27  ;;  %v2385_v42 = vpop.f32.mrb[53].mxu0  ;;  %v2392_v49 = vrot.slane %v2383_v41, 7 }
0x1710   :  { %v2387_v43 = vpop.f32.mrb[54].mxu0  ;;  %v2408_v53 = vrot.slane %v2385_v42, 1 }
0x1711   :  { %v2393_v36 = vrot.slane %v2387_v43, 7  ;;  %2402 = vrot.lane.b32.xlu1 %v2387_v43, %s4281_s27  ;;  %v2389_v52 = vpop.f32.mrb[55].mxu0 }
0x1712   :  { %v2409_v56 = vrot.slane %v2389_v52, 1 }
0x1713   :  { %v2395_v44 = vsel %vm468_vm5, %v2393_v36, %v2392_v49  ;;  %v2394_v60 = vsel %vm468_vm5, %v2392_v49, %v2393_v36 }
0x1714   :  { %v2410_v62 = vsel %vm506_vm6, %v2408_v53, %v2409_v56  ;;  %v2411_v63 = vsel %vm506_vm6, %v2409_v56, %v2408_v53  ;;  %v2396_v3 = vmul.f32 %v4444_v46, %v2395_v44  ;;  %v2397_v4 = vmul.f32 %v4450_v48, %v2394_v60  ;;  %v3627_v44 = vld [vmem:[#allocation4 + $0xb8] ss:$0 sm:$0xff] }
0x1715   :  { %v2412_v22 = vmul.f32 %v4447_v47, %v2410_v62  ;;  %v2413_v17 = vmul.f32 %v4454_v51, %v2411_v63 }
0x1781   :  { %v2401_v5 = vpop.permute.xlu0 %2400 }
0x1782   :  { %v2406_v1 = vadd.f32 %v2401_v5, %v2396_v3 }
0x1783   :  { %v2403_v10 = vpop.permute.xlu1 %2402 }
0x1784   :  { %v2414_v12 = vadd.f32 %v2412_v22, %v2406_v1  ;;  %v2407_v45 = vadd.f32 %v2403_v10, %v2397_v4 }
0x1786   :  { %v4719_v18 = vadd.f32 %v3617_v8, %v2414_v12  ;;  %v2415_v20 = vadd.f32 %v2413_v17, %v2407_v45  ;;  %v4198_v12 = vld [vmem:[#allocation2 + $0x374] ss:$8 sps:$4 sm:$0xff]   ;;  %v4196_v45 = vld [vmem:[#allocation2 + $0x370] ss:$8 sps:$4 sm:$0xff]  }
0x1787   :  { %v3628_v17 = vld [vmem:[#allocation4 + $0xc0] ss:$0 sm:$0xff] }
0x1788   :  { %v4721_v21 = vadd.f32 %v3617_v8, %v2415_v20  ;;  %v2423_v19 = vmax.f32 %v4719_v18, 0.0 }
0x178a   :  { %v2424_v25 = vmax.f32 %v4721_v21, 0.0 }
0x178c   :  { %v2433_v26 = vpack.c.bf16 %v2424_v25, %v2423_v19 }
0x178e   :  { %3626 = vmatmul.mubr.msk.bf16.vlgmr.msra.gmra.mrb[64].mxu1 %vm417_vm4, %v2433_v26 }
0x178f   :  { %2721 = vmatprep.mubr.bf16.mxu1 %v4278_v0  ;;  %2690 = vmatpush1.bf16.msra.mxu1 %v4190_v9 }
0x1790   :  { %2691 = vmatprep.subr.bf16.mxu1 %v4195_v33 }
0x1793   :  { %2692 = vmatpush1.bf16.msra.mxu1 %v4193_v39 }
0x1794   :  { %2693 = vmatprep.subr.bf16.mxu1 %v4198_v12 }
0x1797   :  { %2694 = vmatpush1.bf16.msra.mxu1 %v4196_v45 }
0x1861   :  { %v2511_v31 = vpop.f32.mrb[64].mxu1 }
0x1862   :  { %2528 = vrot.lane.b32.xlu0 %v2511_v31, %s4281_s27  ;;  %v2513_v0 = vpop.f32.mrb[65].mxu1  ;;  %v2520_v35 = vrot.slane %v2511_v31, 7  ;;  %v4202_v31 = vld [vmem:[#allocation2 + $0x3b0] ss:$8 sps:$4 sm:$0xff]  }
0x1863   :  { %v2515_v34 = vpop.f32.mrb[66].mxu1  ;;  %v2536_v11 = vrot.slane %v2513_v0, 1 }
0x1864   :  { %v2521_v37 = vrot.slane %v2515_v34, 7  ;;  %2530 = vrot.lane.b32.xlu1 %v2515_v34, %s4281_s27  ;;  %v2517_v38 = vpop.f32.mrb[67].mxu1 }
0x1865   :  { %v2537_v50 = vrot.slane %v2517_v38, 1  ;;  %v1490_v38 = vsel %vm151_vm3, %v4484_v54, 0.0 }
0x1866   :  { %v2523_v7 = vsel %vm468_vm5, %v2521_v37, %v2520_v35  ;;  %v2522_v41 = vsel %vm468_vm5, %v2520_v35, %v2521_v37  ;;  %v1702_v37 = vsub.f32 %v4647_v59, %v4600_v2  ;;  %v4203_v59 = vld [vmem:[#allocation2 + $0x3c0] ss:$8 sps:$4 sm:$0xff]  }
0x1867   :  { %v2538_v42 = vsel %vm506_vm6, %v2536_v11, %v2537_v50  ;;  %v2539_v43 = vsel %vm506_vm6, %v2537_v50, %v2536_v11  ;;  %v2524_v49 = vmul.f32 %v4444_v46, %v2523_v7  ;;  %v2525_v56 = vmul.f32 %v4450_v48, %v2522_v41  ;;  %v4199_v48 = vld [vmem:[#allocation2 + $0x380] ss:$8 sps:$4 sm:$0xff]  }
0x1868   :  { %v2540_v53 = vmul.f32 %v4447_v47, %v2538_v42  ;;  %v2541_v3 = vmul.f32 %v4454_v51, %v2539_v43  ;;  %v4201_v47 = vld [vmem:[#allocation2 + $0x384] ss:$8 sps:$4 sm:$0xff]   ;;  %v1475_v11 = vsel %vm1474_vm2, %v4580_v58, 0.0  ;;  %v1703_v7 = vmul.f32 %v1702_v37, %v1702_v37  ;;  %v4204_v42 = vld [vmem:[#allocation2 + $0x390] ss:$8 sps:$4 sm:$0xff]  }
0x1869   :  { %2695 = vmatprep.subr.bf16.mxu1 %v4201_v47  ;;  %v4205_v58 = vld [vmem:[#allocation2 + $0x3a0] ss:$8 sps:$4 sm:$0xff]   ;;  %v4206_v43 = vld [vmem:[#allocation2 + $0x3d0] ss:$8 sps:$4 sm:$0xff]  }
0x186a   :  { %2696 = vmatpush1.bf16.msra.mxu1 %v4199_v48  ;;  %v1704_v41 = vsel %vm151_vm3, %v1703_v7, 0.0  ;;  %v3659_v37 = vld [vmem:[#allocation4 + $0xc8] ss:$0 sm:$0xff] }
0x18d4   :  { %v2529_v36 = vpop.permute.xlu0 %2528 }
0x18d5   :  { %v2534_v52 = vadd.f32 %v2529_v36, %v2524_v49  ;;  %v4210_v49 = vld [vmem:[#allocation2 + $0x410] ss:$8 sps:$4 sm:$0xff]   ;;  %v4211_v36 = vld [vmem:[#allocation2 + $0x420] ss:$8 sps:$4 sm:$0xff]  }
0x18d6   :  { %v2531_v60 = vpop.permute.xlu1 %2530  ;;  %4009 = vmatprep.subr.bf16.mxu1 %v4210_v49 }
0x18d7   :  { %v2542_v62 = vadd.f32 %v2540_v53, %v2534_v52  ;;  %v2535_v63 = vadd.f32 %v2531_v60, %v2525_v56  ;;  %v4207_v53 = vld [vmem:[#allocation2 + $0x3e0] ss:$8 sps:$4 sm:$0xff]   ;;  %v4208_v56 = vld [vmem:[#allocation2 + $0x3f0] ss:$8 sps:$4 sm:$0xff]  }
0x18d9   :  { %v2549_v5 = vadd.f32 %v3627_v44, %v2542_v62  ;;  %v2543_v1 = vadd.f32 %v2541_v3, %v2535_v63 }
0x18db   :  { %v2550_v22 = vadd.f32 %v3627_v44, %v2543_v1  ;;  %v2551_v4 = vmax.f32 %v2549_v5, 0.0  ;;  %v4209_v44 = vld [vmem:[#allocation2 + $0x400] ss:$8 sps:$4 sm:$0xff]  }
0x18dd   :  { %v2552_v8 = vmax.f32 %v2550_v22, 0.0 }
0x18df   :  { %v2561_v10 = vpack.c.bf16 %v2552_v8, %v2551_v4 }
0x18e1   :  { %3982 = vmatmul.mubr.msk.bf16.vlgmr.msra.gmra.mrb[56].mxu0 %vm417_vm4, %v2561_v10 }
0x18e2   :  { %3987 = vmatprep.mubr.msk.bf16.mxu0 %vm815_vm11, %v4202_v31 }
0x19b4   :  { %v2628_v20 = vpop.f32.mrb[56].mxu0 }
0x19b5   :  { %v2629_v19 = vadd.f32 %v3628_v17, %v2628_v20  ;;  %v3983_v51 = vpop.f32.mrb[57].mxu0 }
0x19b6   :  { %v2631_v25 = vpop.f32.mrb[58].mxu0 }
0x19b7   :  { %v2632_v26 = vadd.f32 %v3628_v17, %v2631_v25  ;;  %v3984_v27 = vpop.f32.mrb[59].mxu0  ;;  %v2635_v28 = vadd.f32 %v2629_v19, %v4719_v18  ;;  %v1491_v18 = vsel %vm151_vm3, %v4486_v55, 0.0 }
0x19b8   :  { %v1492_v39 = vadd.f32 %v1491_v18, %v1490_v38  ;;  %v1715_v18 = vsel %vm1474_vm2, %v4630_v6, 0.0 }
0x19b9   :  { %v2636_v29 = vadd.f32 %v2632_v26, %v4721_v21  ;;  %v1476_v21 = vsel %vm1474_vm2, %v4585_v61, 0.0  ;;  %v1728_v61 = vsel %vm151_vm3, %v4600_v2, 0.0 }
0x19ba   :  { %v1477_v50 = vadd.f32 %v1476_v21, %v1475_v11 }
0x19bb   :  { %v2645_v30 = vpack.c.bf16 %v2636_v29, %v2635_v28  ;;  %v4212_v28 = vld [vmem:[#allocation2 + $0x430] ss:$8 sps:$4 sm:$0xff]   ;;  %v4213_v29 = vld [vmem:[#allocation2 + $0x440] ss:$8 sps:$4 sm:$0xff]  }
0x19bd   :  { %3642 = vmatmul.mubr.msk.bf16.vlgmr.msra.gmra.mrb[68].mxu1 %vm417_vm4, %v2645_v30 }
0x19be   :  { %4010 = vmatpush3.bf16.msra.mxu1 %v4210_v49 }
0x19bf   :  { %4011 = vmatprep.subr.bf16.mxu1 %v4211_v36 }
0x19c2   :  { %4012 = vmatpush3.bf16.msra.mxu1 %v4211_v36 }
0x19c3   :  { %4013 = vmatprep.subr.bf16.mxu1 %v4212_v28 }
0x19c6   :  { %4014 = vmatpush3.bf16.msra.mxu1 %v4212_v28 }
0x19c7   :  { %4015 = vmatprep.subr.bf16.mxu1 %v4213_v29 }
0x19ca   :  { %4016 = vmatpush3.bf16.msra.mxu1 %v4213_v29 }
0x1a90   :  { %v2723_v9 = vpop.f32.mrb[68].mxu1 }
0x1a91   :  { %v2725_v32 = vpop.f32.mrb[69].mxu1 }
0x1a92   :  { %v2727_v0 = vpop.f32.mrb[70].mxu1 }
0x1a93   :  { %v2732_v33 = vpack.c.bf16 %v2727_v0, %v2723_v9  ;;  %v2729_v34 = vpop.f32.mrb[71].mxu1 }
0x1a94   :  { %v2733_v35 = vpack.c.bf16 %v2729_v34, %v2725_v32 }
0x1a95   :  { %2753 = vrot.lane.b32.xlu0 %v2732_v33, %s4281_s27 }
0x1a96   :  { %2964 = vrot.lane.b32.xlu1 %v2733_v35, %s4281_s27 }
0x1ab4   :  { %1464 = vadd.xlane.f32.xlu0 %v4627_v23 }
0x1ab8   :  { %1493 = vadd.xlane.f32.xlu0 %v1492_v39 }
0x1aba   :  { %1478 = vadd.xlane.f32.xlu1 %v1477_v50 }
0x1abe   :  { %1705 = vadd.xlane.f32.xlu1 %v1704_v41 }
0x1ac2   :  { %1729 = vadd.xlane.f32.xlu1 %v1728_v61 }
0x1b07   :  { %v2754_v23 = vpop.permute.xlu0 %2753 }
0x1b08   :  { %3985 = vmatprep.subr.bf16.mxu0 %v2754_v23  ;;  %v2965_v52 = vpop.permute.xlu1 %2964 }
0x1b09   :  { %3986 = vmatpush3.bf16.msra.mxu0 %v2754_v23 }
0x1b0a   :  { %3991 = vmatprep.subr.bf16.mxu0 %v2732_v33 }
0x1b0c   :  { %3988 = vmatmul.mubr.msk.bf16.vlgmr.msra.gmra.mrb[60].mxu0 %vm815_vm11, %v4203_v59 }
0x1b0d   :  { %3992 = vmatpush3.bf16.msra.mxu0 %v2732_v33  ;;  %3993 = vmatprep.mubr.msk.bf16.mxu0 %vm815_vm11, %v4204_v42 }
0x1b0e   :  { %3997 = vmatprep.subr.bf16.mxu0 %v2733_v35 }
0x1b18   :  { %3994 = vmatmul.mubr.msk.bf16.vlgmr.msra.gmra.mrb[60].mxu0 %vm815_vm11, %v4205_v58 }
0x1b19   :  { %3998 = vmatpush3.bf16.msra.mxu0 %v2733_v35  ;;  %3999 = vmatprep.mubr.msk.bf16.mxu0 %vm815_vm11, %v4206_v43 }
0x1b1a   :  { %4003 = vmatprep.subr.bf16.mxu0 %v2965_v52 }
0x1b24   :  { %4000 = vmatmul.mubr.msk.bf16.vlgmr.msra.gmra.mrb[60].mxu0 %vm815_vm11, %v4207_v53 }
0x1b25   :  { %4004 = vmatpush3.bf16.msra.mxu0 %v2965_v52  ;;  %4005 = vmatprep.mubr.msk.bf16.mxu0 %vm815_vm11, %v4208_v56 }
0x1b30   :  { %4006 = vmatmul.mubr.msk.bf16.vlgmr.msra.gmra.mrb[60].mxu0 %vm815_vm11, %v4209_v44 }
0x1b41   :  { %v1465_v60 = vpop.xlane.xlu0 %1464 }
0x1b42   :  { %v1466_v62 = vrot.slane %v1465_v60, 4 }
0x1b44   :  { %v1467_v63 = vadd.f32 %v1466_v62, %v1465_v60 }
0x1b45   :  { %v1494_v3 = vpop.xlane.xlu0 %1493 }
0x1b46   :  { %v1468_v5 = vrot.slane %v1467_v63, 2  ;;  %v1495_v1 = vrot.slane %v1494_v3, 4 }
0x1b47   :  { %v1479_v22 = vpop.xlane.xlu1 %1478 }
0x1b48   :  { %v1496_v4 = vadd.f32 %v1495_v1, %v1494_v3  ;;  %v1480_v8 = vrot.slane %v1479_v22, 4  ;;  %v1469_v10 = vadd.f32 %v1468_v5, %v1467_v63 }
0x1b4a   :  { %v1497_v12 = vrot.slane %v1496_v4, 2  ;;  %v1481_v45 = vadd.f32 %v1480_v8, %v1479_v22  ;;  %v1470_v47 = vrot.slane %v1469_v10, 1 }
0x1b4b   :  { %v1706_v36 = vpop.xlane.xlu1 %1705 }
0x1b4c   :  { %v1482_v48 = vrot.slane %v1481_v45, 2  ;;  %v1471_v17 = vadd.f32 %v1470_v47, %v1469_v10  ;;  %v1498_v20 = vadd.f32 %v1497_v12, %v1496_v4  ;;  %v1707_v56 = vrot.slane %v1706_v36, 4 }
0x1b4e   :  { %4055 = vpush %v1471_v17  ;;  %v1483_v19 = vadd.f32 %v1482_v48, %v1481_v45  ;;  %v1499_v51 = vrot.slane %v1498_v20, 1  ;;  %v1708_v62 = vadd.f32 %v1707_v56, %v1706_v36  ;;  %v4829_v36 = vld [vmem:[#allocation4 + $0xd0] ss:$0 sm:$0xff] }
0x1b4f   :  { %v1730_v53 = vpop.xlane.xlu1 %1729 }
0x1b50   :  { %v1484_v25 = vrot.slane %v1483_v19, 1  ;;  %v1500_v27 = vadd.f32 %v1499_v51, %v1498_v20  ;;  %v1731_v60 = vrot.slane %v1730_v53, 4  ;;  %v1709_v1 = vrot.slane %v1708_v62, 2 }
0x1b51   :  { %v4285_v20 = vmov 4  }
0x1b52   :  { %v1485_v26 = vadd.f32 %v1484_v25, %v1483_v19  ;;  %v1732_v5 = vadd.f32 %v1731_v60, %v1730_v53  ;;  %v1710_v8 = vadd.f32 %v1709_v1, %v1708_v62  ;;  %4106 = vset.pattern.permute.xlu1 %v4285_v20  ;;  %4107 = vset.pattern.permute.xlu0 %v4285_v20 }
0x1b54   :  { %4057 = vpush %v1485_v26  ;;  %v1733_v4 = vrot.slane %v1732_v5, 2  ;;  %v1711_v47 = vrot.slane %v1710_v8, 1 }
0x1b55   :  { %4059 = vpush %v1500_v27 }
0x1b56   :  { %v1734_v12 = vadd.f32 %v1733_v4, %v1732_v5  ;;  %v1712_v27 = vadd.f32 %v1711_v47, %v1710_v8 }
0x1b58   :  { %v1735_v51 = vrot.slane %v1734_v12, 1 }
0x1b5a   :  { %v1736_v29 = vadd.f32 %v1735_v51, %v1734_v12  ;;  %v3133_v12 = vadd.s32 24, %v4423_v24 }
0x1b5c   :  { %v3667_v20 = vadd.s32 4294967280, %v3133_v12 }
0x1b7f   :  { %s4772_s5 = spop %4055 }
0x1b85   :  { %s4774_s6 = spop %4057 }
0x1b86   :  { %s4060_s7 = spop %4059  ;;  %s1489_s21 = smul.f32 0.0625, %s4774_s6 }
0x1b87   :  { %s1504_s8 = smul.f32 0.001953125, %s4060_s7 }
0x1b89   :  { %v1505_v30 = vstv %s1504_s8 }
0x1b8a   :  { %v1506_v31 = vsub.f32 %v4484_v54, %v1505_v30  ;;  %v1507_v9 = vsub.f32 %v4486_v55, %v1505_v30 }
0x1b8c   :  { %v1508_v32 = vmul.f32 %v1506_v31, %v1506_v31  ;;  %v1509_v0 = vmul.f32 %v1507_v9, %v1507_v9 }
0x1b8e   :  { %v1510_v33 = vsel %vm151_vm3, %v1508_v32, 0.0  ;;  %v1511_v34 = vsel %vm151_vm3, %v1509_v0, 0.0 }
0x1b8f   :  { %v1512_v35 = vadd.f32 %v1511_v34, %v1510_v33 }
0x1b91   :  { %1513 = vadd.xlane.f32.xlu0 %v1512_v35 }
0x1b95   :  { %1716 = vadd.xlane.f32.xlu0 %v1715_v18 }
0x1c03   :  { %v4007_v21 = vpop.f32.mrb[60].mxu0 }
0x1c04   :  { %v3007_v38 = vpop.f32.mrb[61].mxu0  ;;  %v3033_v54 = vadd.f32 %v4007_v21, %v3659_v37 }
0x1c05   :  { %v4008_v39 = vpop.f32.mrb[62].mxu0  ;;  %v3031_v50 = vadd.f32 %v3659_v37, %v3007_v38 }
0x1c06   :  { %v3034_v11 = vadd.f32 %v4008_v39, %v3659_v37  ;;  %v3010_v55 = vpop.f32.mrb[63].mxu0  ;;  %v4221_v39 = vld [vmem:[%s4967_s0] sm:$0xff] }
0x1c07   :  { %v3032_v7 = vadd.f32 %v3659_v37, %v3010_v55 }
0x1c08   :  { %v3044_v41 = vpack.c.bf16 %v3034_v11, %v3033_v54  ;;  %v4222_v54 = vld [vmem:[%s4967_s0 + $0x8] sm:$0xff] }
0x1c09   :  { %v3043_v61 = vpack.c.bf16 %v3032_v7, %v3031_v50  ;;  %v4223_v7 = vld [vmem:[%s4967_s0 + $0x10] sm:$0xff] }
0x1c0b   :  { %4017 = vmatprep.mubr.msk.bf16.mxu1 %vm417_vm4, %v3043_v61  ;;  %v4224_v61 = vld [vmem:[%s4967_s0 + $0x18] sm:$0xff] }
0x1c0c   :  { %4018 = vmatmul.mubr.msk.bf16.vlgmr.msra.gmra.mrb[72].mxu1 %vm417_vm4, %v3044_v41 }
0x1c1e   :  { %v1514_v23 = vpop.xlane.xlu0 %1513 }
0x1c1f   :  { %v1515_v59 = vrot.slane %v1514_v23, 4 }
0x1c21   :  { %v1516_v42 = vadd.f32 %v1515_v59, %v1514_v23 }
0x1c22   :  { %v1717_v52 = vpop.xlane.xlu0 %1716 }
0x1c23   :  { %v1517_v6 = vrot.slane %v1516_v42, 2  ;;  %v1718_v44 = vrot.slane %v1717_v52, 4 }
0x1c25   :  { %v1518_v58 = vadd.f32 %v1517_v6, %v1516_v42  ;;  %v1719_v63 = vadd.f32 %v1718_v44, %v1717_v52 }
0x1c27   :  { %v1519_v43 = vrot.slane %v1518_v58, 1  ;;  %v1720_v22 = vrot.slane %v1719_v63, 2 }
0x1c29   :  { %v1520_v49 = vadd.f32 %v1519_v43, %v1518_v58  ;;  %v1721_v10 = vadd.f32 %v1720_v22, %v1719_v63  ;;  %v4854_v22 = vld [vmem:[%s4970_s3 + $0x8] sm:$0xff] }
0x1c2b   :  { %4061 = vpush %v1520_v49  ;;  %v1722_v17 = vrot.slane %v1721_v10, 1 }
0x1c2d   :  { %v1723_v28 = vadd.f32 %v1722_v17, %v1721_v10 }
0x1c5c   :  { %s4062_s1 = spop %4061 }
0x1c5d   :  { %v1522_v3 = vstv %s4062_s1 }
0x1c5e   :  { %4214 = vrsqrt.f32 %v1522_v3  ;;  %vm1525_vm4 = vcmp.eq.f32.partialorder %v1522_v3, inf  ;;  %v1528_v19 = vand.u32 2147483648, %v1522_v3  ;;  %vm1527_vm11 = vcmp.eq.f32.partialorder %v1522_v3, 0.0 }
0x1c68   :  { %v4215_v45 = vpop.eup %4214 }
0x1c69   :  { %v1524_v48 = vmul.f32 %v4215_v45, %v1522_v3 }
0x1c6b   :  { %v1526_v25 = vsel %vm1525_vm4, %v1522_v3, %v1524_v48  ;;  %vm3487_vm4 = vcmask 122880  }
0x1c6c   :  { %v1529_v26 = vsel %vm1527_vm11, %v1528_v19, %v1526_v25  ;;  %v3221_v25 = vadd.s32 1, %v3667_v20 }
0x1c6d   :  { %4063 = vpush %v1529_v26 }
0x1c6e   :  { %4065 = vpush %v1712_v27 }
0x1c6f   :  { %4067 = vpush %v1723_v28 }
0x1c70   :  { %4069 = vpush %v1736_v29 }
0x1c9e   :  { %s4797_s11 = spop %4063 }
0x1c9f   :  { %s4802_s2 = spop %4065 }
0x1ca0   :  { %s4804_s14 = spop %4067 }
0x1ca1   :  { %s4070_s17 = spop %4069 }
0x1ca2   :  { %s1740_s18 = smul.f32 0.00390625, %s4070_s17 }
0x1ca3   :  { %s1473_s17 = smul.f32 0.001953125, %s4772_s5 }
0x1ca4   :  { %v1741_v11 = vstv %s1740_s18  ;;  %s1714_s18 = smul.f32 0.00390625, %s4802_s2 }
0x1ca5   :  { %v1742_v55 = vsub.f32 %v4600_v2, %v1741_v11  ;;  %s1727_s5 = smul.f32 0.125, %s4804_s14 }
0x1ca6   :  { %s1531_s2 = smul.f32 0.044194173, %s4797_s11 }
0x1ca7   :  { %v1743_v50 = vmul.f32 %v1742_v55, %v1742_v55 }
0x1ca9   :  { %v1744_v41 = vsel %vm151_vm3, %v1743_v50, 0.0 }
0x1cdf   :  { %v4019_v30 = vpop.f32.mrb[72].mxu1 }
0x1ce0   :  { %3202 = vrot.lane.b32.xlu1 %v4019_v30, %s4286_s9  ;;  %v3109_v31 = vpop.f32.mrb[73].mxu1  ;;  %v3126_v0 = vrot.slane %v4019_v30, 7 }
0x1ce1   :  { %v3124_v9 = vrot.slane %v3109_v31, 7  ;;  %3182 = vrot.lane.b32.xlu0 %v3109_v31, %s4287_s10  ;;  %v4020_v32 = vpop.f32.mrb[74].mxu1 }
0x1ce2   :  { %v3127_v33 = vrot.slane %v4020_v32, 7  ;;  %v3112_v34 = vpop.f32.mrb[75].mxu1 }
0x1ce3   :  { %v3125_v35 = vrot.slane %v3112_v34, 7 }
0x1ce4   :  { %3198 = vrot.lane.b32.xlu1 %v3109_v31, %s4286_s9  ;;  %v3131_v18 = vsel %vm468_vm5, %v3127_v33, %v3124_v9  ;;  %v4789_v21 = vsel %vm468_vm5, %v3126_v0, %v3127_v33 }
0x1ce5   :  { %3200 = vrot.lane.b32.xlu0 %v3112_v34, %s4286_s9  ;;  %v3129_v37 = vsel %vm468_vm5, %v3125_v35, %v3126_v0  ;;  %v4795_v38 = vsel %vm468_vm5, %v3124_v9, %v3125_v35  ;;  %v3174_v42 = vmul.f32 %v4444_v46, %v3131_v18  ;;  %v3132_v46 = vadd.s32 16, %v4423_v24 }
0x1ce6   :  { %vm3229_vm5 = vcmp.lt.s32.totalorder %v3221_v25, 16  ;;  %v3219_v18 = vadd.s32 1, %v4438_v40 }
0x1ce7   :  { %v3666_v44 = vadd.s32 4294967280, %v3132_v46  ;;  %v3671_v31 = vsel %vm3229_vm5, 1.0, %v4854_v22 }
0x1ce8   :  { %3204 = vrot.lane.b32.xlu1 %v4020_v32, %s4286_s9  ;;  %vm3227_vm14 = vcmp.lt.s32.totalorder %v3219_v18, 16 }
0x1ce9   :  { %v3152_v62 = vadd.s32 4294967295, %v3666_v44  ;;  %v3670_v55 = vsel %vm3227_vm14, 1.0, %v4854_v22 }
0x1ceb   :  { %vm3156_vm3 = vcmp.ge.s32.totalorder %v3152_v62, 0 }
0x1cec   :  { %3302 = vperm.xlu1 %4106, %v4221_v39   ;;  %v3669_v4 = vsel %vm3156_vm3, 1.0, %v4854_v22 }
0x1ced   :  { %v3176_v10 = vmul.f32 %v3669_v4, %v3129_v37 }
0x1cf0   :  { %3306 = vperm.xlu1 %4106, %v4222_v54  }
0x1cf4   :  { %3186 = vrot.lane.b32.xlu1 %v4019_v30, %s4287_s10 }
0x1cf8   :  { %3263 = vrot.lane.b32.xlu1 %v4221_v39, %s4288_s19 }
0x1cfc   :  { %3265 = vrot.lane.b32.xlu1 %v4222_v54, %s4288_s19 }
0x1d00   :  { %3310 = vperm.xlu1 %4106, %v4223_v7  }
0x1d04   :  { %3188 = vrot.lane.b32.xlu1 %v4020_v32, %s4287_s10  ;;  %1745 = vadd.xlane.f32.xlu0 %v1744_v41 }
0x1d08   :  { %3314 = vperm.xlu1 %4106, %v4224_v61  }
0x1d0c   :  { %3269 = vrot.lane.b32.xlu1 %v4224_v61, %s4288_s19 }
0x1d10   :  { %3325 = vrot.lane.b32.xlu1 %v4348_v13, %s4289_s24 }
0x1d14   :  { %3184 = vrot.lane.b32.xlu1 %v3112_v34, %s4287_s10 }
0x1d18   :  { %3327 = vrot.lane.b32.xlu1 %v4350_v14, %s4289_s24 }
0x1d1a   :  { %3267 = vrot.lane.b32.xlu0 %v4223_v7, %s4288_s19 }
0x1d1c   :  { %3329 = vrot.lane.b32.xlu1 %v4352_v15, %s4289_s24 }
0x1d20   :  { %3331 = vrot.lane.b32.xlu1 %v4354_v16, %s4289_s24 }
0x1d52   :  { %v3203_v2 = vpop.permute.xlu1 %3202 }
0x1d53   :  { %v3183_v23 = vpop.permute.xlu0 %3182 }
0x1d54   :  { %v3194_v49 = vadd.f32 %v3183_v23, %v3174_v42 }
0x1d56   :  { %v3199_v59 = vpop.permute.xlu1 %3198 }
0x1d57   :  { %v3210_v6 = vrot.slane %v3199_v59, 1  ;;  %v3201_v58 = vpop.permute.xlu0 %3200 }
0x1d58   :  { %v3211_v43 = vrot.slane %v3201_v58, 1 }
0x1d5a   :  { %v3216_v52 = vsel %vm506_vm6, %v3210_v6, %v3211_v43  ;;  %v3205_v60 = vpop.permute.xlu1 %3204 }
0x1d5b   :  { %v3246_v53 = vadd.f32 %v3216_v52, %v3194_v49  ;;  %v3213_v8 = vrot.slane %v3205_v60, 1 }
0x1d5d   :  { %v4834_v56 = vadd.f32 %v4829_v36, %v3246_v53  ;;  %v3217_v30 = vsel %vm506_vm6, %v3213_v8, %v3210_v6 }
0x1d5e   :  { %v3245_v32 = vmul.f32 %v3671_v31, %v3217_v30 }
0x1d5f   :  { %3483 = vst.msk [vmem:[%s4970_s3] sm:$0xff] %vm63_vm1, %v4834_v56  ;;  %v3297_v63 = vsub.f32 %v4834_v56, %v4348_v13  ;;  %v3212_v13 = vrot.slane %v3203_v2, 1 }
0x1d61   :  { %v3214_v48 = vsel %vm506_vm6, %v3212_v13, %v3213_v8  ;;  %v3215_v54 = vsel %vm506_vm6, %v3211_v43, %v3212_v13 }
0x1d62   :  { %v3243_v2 = vmul.f32 %v3670_v55, %v3215_v54 }
0x1d6b   :  { %v4844_v3 = vpop.permute.xlu1 %3302 }
0x1d6c   :  { %v4847_v5 = vmul.f32 %v4844_v3, %v3297_v63 }
0x1d6e   :  { %v3345_v46 = vmul.f32 %v4847_v5, %v4847_v5  ;;  %v3403_v62 = vand.u32 2147483647, %v4847_v5 }
0x1d6f   :  { %v4849_v1 = vpop.permute.xlu1 %3306 }
0x1d70   :  { %v3349_v12 = vsel %vm63_vm1, %v3345_v46, 0.0  ;;  %v3407_v5 = vsel %vm63_vm1, %v3403_v62, 0.0 }
0x1d73   :  { %v3187_v45 = vpop.permute.xlu1 %3186 }
0x1d74   :  { %v3196_v47 = vadd.f32 %v3187_v45, %v3176_v10 }
0x1d76   :  { %v3248_v17 = vadd.f32 %v3214_v48, %v3196_v47 }
0x1d77   :  { %v3264_v19 = vpop.permute.xlu1 %3263 }
0x1d78   :  { %v3257_v51 = vadd.f32 %v4829_v36, %v3248_v17 }
0x1d7a   :  { %3485 = vst.msk [vmem:[%s4970_s3 + $0x10] sm:$0xff] %vm63_vm1, %v3257_v51  ;;  %v3299_v27 = vsub.f32 %v3257_v51, %v4352_v15 }
0x1d7b   :  { %v3266_v26 = vpop.permute.xlu1 %3265 }
0x1d7c   :  { %v3276_v50 = vsel %vm1474_vm2, %v3266_v26, 0.0 }
0x1d7f   :  { %v3311_v28 = vpop.permute.xlu1 %3310 }
0x1d80   :  { %v4866_v29 = vmul.f32 %v3311_v28, %v3299_v27 }
0x1d82   :  { %v3405_v13 = vand.u32 2147483647, %v4866_v29 }
0x1d83   :  { %v3189_v9 = vpop.permute.xlu1 %3188 }
0x1d84   :  { %v3197_v0 = vadd.f32 %v3189_v9, %v4789_v21  ;;  %v3410_v31 = vsel %vm63_vm1, %v3405_v13, 0.0 }
0x1d86   :  { %v3249_v33 = vadd.f32 %v3245_v32, %v3197_v0 }
0x1d87   :  { %v4872_v34 = vpop.permute.xlu1 %3314 }
0x1d88   :  { %v4875_v35 = vadd.f32 %v4829_v36, %v3249_v33 }
0x1d8a   :  { %3486 = vst.msk [vmem:[%s4970_s3 + $0x18] sm:$0xff] %vm63_vm1, %v4875_v35  ;;  %v3300_v15 = vsub.f32 %v4875_v35, %v4354_v16  ;;  %v3275_v16 = vsel %vm1474_vm2, %v3264_v19, 0.0 }
0x1d8b   :  { %v3270_v37 = vpop.permute.xlu1 %3269  ;;  %v3277_v23 = vadd.f32 %v3276_v50, %v3275_v16 }
0x1d8c   :  { %v4886_v21 = vmul.f32 %v4872_v34, %v3300_v15  ;;  %v3280_v49 = vsel %vm1474_vm2, %v3270_v37, 0.0 }
0x1d8e   :  { %v3406_v17 = vand.u32 2147483647, %v4886_v21 }
0x1d8f   :  { %v3326_v39 = vpop.permute.xlu1 %3325 }
0x1d90   :  { %v3337_v63 = vsub.f32 %v4834_v56, %v3326_v39  ;;  %v3348_v56 = vmul.f32 %v4886_v21, %v4886_v21  ;;  %v3412_v18 = vsel %vm63_vm1, %v3406_v17, 0.0 }
0x1d91   :  { %v1746_v11 = vpop.xlane.xlu0 %1745 }
0x1d92   :  { %v1747_v7 = vrot.slane %v1746_v11, 4  ;;  %v3341_v20 = vmul.f32 %v3337_v63, %v4844_v3  ;;  %v3354_v32 = vsel %vm63_vm1, %v3348_v56, 0.0 }
0x1d93   :  { %v3185_v41 = vpop.permute.xlu1 %3184 }
0x1d94   :  { %v1748_v61 = vadd.f32 %v1747_v7, %v1746_v11  ;;  %v3195_v40 = vadd.f32 %v3185_v41, %v4795_v38  ;;  %v3366_v3 = vmul.f32 %v3341_v20, %v3341_v20 }
0x1d95   :  { %v3268_v59 = vpop.permute.xlu0 %3267 }
0x1d96   :  { %v1749_v42 = vrot.slane %v1748_v61, 2  ;;  %v3247_v6 = vadd.f32 %v3243_v2, %v3195_v40  ;;  %v3278_v24 = vsel %vm1474_vm2, %v3268_v59, 0.0  ;;  %vm3472_vm2 = vcmp.eq.s32.totalorder %v4578_v57, 8 }
0x1d97   :  { %v3279_v58 = vadd.f32 %v3278_v24, %v3277_v23  ;;  %v3328_v43 = vpop.permute.xlu1 %3327 }
0x1d98   :  { %v3256_v52 = vadd.f32 %v4829_v36, %v3247_v6  ;;  %v1750_v53 = vadd.f32 %v1749_v42, %v1748_v61 }
0x1d99   :  { %v3281_v44 = vadd.f32 %v3280_v49, %v3279_v58 }
0x1d9a   :  { %v3298_v38 = vsub.f32 %v3256_v52, %v4350_v14  ;;  %3484 = vst.msk [vmem:[%s4970_s3 + $0x8] sm:$0xff] %vm63_vm1, %v3256_v52  ;;  %v1751_v60 = vrot.slane %v1750_v53, 1  ;;  %v3347_v14 = vmul.f32 %v4866_v29, %v4866_v29  ;;  %v3338_v19 = vsub.f32 %v3256_v52, %v3328_v43 }
0x1d9b   :  { %v3330_v4 = vpop.permute.xlu1 %3329  ;;  %3282 = vadd.xlane.f32.xlu0 %v3281_v44 }
0x1d9c   :  { %v3339_v36 = vsub.f32 %v3257_v51, %v3330_v4  ;;  %v1752_v8 = vadd.f32 %v1751_v60, %v1750_v53  ;;  %v3318_v10 = vmul.f32 %v4849_v1, %v3298_v38  ;;  %v3352_v30 = vsel %vm63_vm1, %v3347_v14, 0.0 }
0x1d9d   :  { %v3342_v33 = vmul.f32 %v3338_v19, %v4849_v1 }
0x1d9e   :  { %v3343_v45 = vmul.f32 %v3339_v36, %v3311_v28  ;;  %4071 = vpush %v1752_v8  ;;  %v3346_v47 = vmul.f32 %v3318_v10, %v3318_v10  ;;  %v3404_v48 = vand.u32 2147483647, %v3318_v10 }
0x1d9f   :  { %v3332_v27 = vpop.permute.xlu1 %3331  ;;  %v3367_v39 = vmul.f32 %v3342_v33, %v3342_v33 }
0x1da0   :  { %v3368_v51 = vmul.f32 %v3343_v45, %v3343_v45  ;;  %v3350_v25 = vsel %vm63_vm1, %v3346_v47, 0.0  ;;  %v3408_v26 = vsel %vm63_vm1, %v3404_v48, 0.0  ;;  %v3340_v15 = vsub.f32 %v4875_v35, %v3332_v27 }
0x1da1   :  { %v3351_v28 = vadd.f32 %v3350_v25, %v3349_v12  ;;  %v3409_v29 = vadd.f32 %v3408_v26, %v3407_v5 }
0x1da2   :  { %3378 = vrot.lane.b32.xlu1 %v3368_v51, %s4288_s19  ;;  %v3344_v54 = vmul.f32 %v3340_v15, %v4872_v34  ;;  %v3676_v15 = vsel %vm3442_vm12, 1.0, %v4854_v22 }
0x1da3   :  { %v3353_v9 = vadd.f32 %v3352_v30, %v3351_v28  ;;  %v3411_v0 = vadd.f32 %v3410_v31, %v3409_v29  ;;  %v3674_v31 = vsel %vm3430_vm0, 1.0, %v4854_v22 }
0x1da4   :  { %v3369_v11 = vmul.f32 %v3344_v54, %v3344_v54  ;;  %v3451_v54 = vstv %s1489_s21 }
0x1da5   :  { %v3355_v37 = vadd.f32 %v3354_v32, %v3353_v9  ;;  %v3413_v21 = vadd.f32 %v3412_v18, %v3411_v0  ;;  %v3675_v9 = vsel %vm3436_vm7, 1.0, %v4854_v22  ;;  %v3439_v32 = vstv %s1473_s17 }
0x1da6   :  { %3374 = vrot.lane.b32.xlu1 %v3366_v3, %s4288_s19  ;;  %v3445_v18 = vstv %s1714_s18 }
0x1daa   :  { %3376 = vrot.lane.b32.xlu1 %v3367_v39, %s4288_s19  ;;  %v3677_v39 = vsel %vm3448_vm8, 1.0, %v4854_v22 }
0x1dae   :  { %3380 = vrot.lane.b32.xlu1 %v3369_v11, %s4288_s19  ;;  %v3446_v11 = vmul.f32 %v3676_v15, %v3445_v18 }
0x1dcf   :  { %s4072_s1 = spop %4071 }
0x1dd0   :  { %v1754_v55 = vstv %s4072_s1 }
0x1dd1   :  { %4216 = vrsqrt.f32 %v1754_v55  ;;  %vm1757_vm6 = vcmp.eq.f32.partialorder %v1754_v55, inf  ;;  %v1760_v50 = vand.u32 2147483648, %v1754_v55  ;;  %vm1759_vm15 = vcmp.eq.f32.partialorder %v1754_v55, 0.0 }
0x1dd2   :  { %3356 = vadd.xlane.f32.xlu1 %v3355_v37  ;;  %v3440_v37 = vmul.f32 %v3675_v9, %v3439_v32 }
0x1ddb   :  { %v4217_v1 = vpop.eup %4216 }
0x1ddc   :  { %v1756_v35 = vmul.f32 %v4217_v1, %v1754_v55  ;;  %v3678_v1 = vsel %vm3454_vm9, 1.0, %v4854_v22 }
0x1dde   :  { %v1758_v7 = vsel %vm1757_vm6, %v1754_v55, %v1756_v35  ;;  %v3457_v35 = vstv %s1727_s5 }
0x1ddf   :  { %v1761_v41 = vsel %vm1759_vm15, %v1760_v50, %v1758_v7  ;;  %v3452_v50 = vmul.f32 %v3677_v39, %v3451_v54 }
0x1de0   :  { %4073 = vpush %v1761_v41  ;;  %v3679_v41 = vsel %vm3460_vm10, 1.0, %v4854_v22 }
0x1e11   :  { %s4933_s9 = spop %4073 }
0x1e12   :  { %s1763_s22 = smul.f32 0.0625, %s4933_s9 }
0x1e14   :  { %v3379_v16 = vpop.permute.xlu1 %3378 }
0x1e15   :  { %v3389_v59 = vsel %vm63_vm1, %v3379_v16, 0.0  ;;  %v3463_v16 = vstv %s1531_s2 }
0x1e18   :  { %v3375_v61 = vpop.permute.xlu1 %3374 }
0x1e19   :  { %v3386_v40 = vsel %vm63_vm1, %v3375_v61, 0.0  ;;  %v3458_v61 = vmul.f32 %v3678_v1, %v3457_v35 }
0x1e1c   :  { %v3377_v34 = vpop.permute.xlu1 %3376 }
0x1e1d   :  { %v3387_v2 = vsel %vm63_vm1, %v3377_v34, 0.0 }
0x1e1e   :  { %v3388_v23 = vadd.f32 %v3387_v2, %v3386_v40  ;;  %v3680_v40 = vsel %vm3466_vm13, 1.0, %v4854_v22  ;;  %v3469_v2 = vstv %s1763_s22 }
0x1e20   :  { %v3381_v42 = vpop.permute.xlu1 %3380  ;;  %v3390_v6 = vadd.f32 %v3389_v59, %v3388_v23  ;;  %v3464_v23 = vmul.f32 %v3679_v41, %v3463_v16 }
0x1e21   :  { %v3391_v24 = vsel %vm63_vm1, %v3381_v42, 0.0  ;;  %vm3424_vm1 = vcmp.eq.s32.totalorder %v4578_v57, 0  ;;  %v3681_v42 = vsel %vm3472_vm2, 1.0, %v4854_v22 }
0x1e22   :  { %v3392_v58 = vadd.f32 %v3391_v24, %v3390_v6  ;;  %v3673_v29 = vsel %vm3424_vm1, 1.0, %v4854_v22  ;;  %v3470_v24 = vmul.f32 %v3680_v40, %v3469_v2 }
0x1e24   :  { %3393 = vadd.xlane.f32.xlu0 %v3392_v58 }
0x1e28   :  { %v3283_v43 = vpop.xlane.xlu0 %3282  ;;  %3414 = vadd.xlane.f32.xlu0 %v3413_v21 }
0x1e29   :  { %v3284_v49 = vrot.slane %v3283_v43, 4 }
0x1e2b   :  { %v3285_v52 = vadd.f32 %v3284_v49, %v3283_v43 }
0x1e2d   :  { %v3286_v53 = vrot.slane %v3285_v52, 2 }
0x1e2f   :  { %v3287_v46 = vadd.f32 %v3286_v53, %v3285_v52 }
0x1e31   :  { %v3288_v44 = vrot.slane %v3287_v46, 1 }
0x1e33   :  { %v3289_v38 = vadd.f32 %v3288_v44, %v3287_v46 }
0x1e35   :  { %4075 = vpush %v3289_v38 }
0x1e5f   :  { %v3357_v60 = vpop.xlane.xlu1 %3356 }
0x1e60   :  { %v3358_v62 = vrot.slane %v3357_v60, 4 }
0x1e62   :  { %v3359_v63 = vadd.f32 %v3358_v62, %v3357_v60 }
0x1e64   :  { %v3360_v4 = vrot.slane %v3359_v63, 2 }
0x1e66   :  { %s4076_s10 = spop %4075  ;;  %v3361_v8 = vadd.f32 %v3360_v4, %v3359_v63 }
0x1e67   :  { %s3291_s12 = smul.f32 4.0, %s4076_s10 }
0x1e68   :  { %v3362_v10 = vrot.slane %v3361_v8, 1 }
0x1e69   :  { %p3292_p2 = scmp.gt.f32.partialorder %s3291_s12, 0.0 }
0x1e6a   :  { %v3363_v14 = vadd.f32 %v3362_v10, %v3361_v8 }
0x1e6b   :  { %s4974_s12 = smov (!%p3292_p2, %s3291_s12), 1.0 }
0x1e6c   :  { %v3294_v36 = vstv %s4974_s12 }
0x1e6d   :  { %4218 = vrcp.f32 %v3294_v36 }
0x1e77   :  { %v4219_v12 = vpop.eup %4218 }
0x1e78   :  { %4077 = vpush %v4219_v12 }
0x1e79   :  { %4079 = vpush %v3363_v14 }
0x1ea9   :  { %s4935_s13 = spop %4077 }
0x1eaa   :  { %s4080_s15 = spop %4079 }
0x1eab   :  { %s3365_s16 = smul.f32 %s4080_s15, %s4935_s13 }
0x1ead   :  { %v3427_v30 = vstv %s3365_s16 }
0x1eae   :  { %v3428_v3 = vmul.f32 %v3673_v29, %v3427_v30 }
0x1eb1   :  { %v3394_v13 = vpop.xlane.xlu0 %3393 }
0x1eb2   :  { %v3395_v45 = vrot.slane %v3394_v13, 4 }
0x1eb4   :  { %v3396_v47 = vadd.f32 %v3395_v45, %v3394_v13 }
0x1eb5   :  { %v3415_v48 = vpop.xlane.xlu0 %3414 }
0x1eb6   :  { %v3397_v5 = vrot.slane %v3396_v47, 2  ;;  %v3416_v56 = vrot.slane %v3415_v48, 4 }
0x1eb8   :  { %v3417_v17 = vadd.f32 %v3416_v56, %v3415_v48  ;;  %v3398_v20 = vadd.f32 %v3397_v5, %v3396_v47 }
0x1eba   :  { %v3418_v19 = vrot.slane %v3417_v17, 2  ;;  %v3399_v51 = vrot.slane %v3398_v20, 1 }
0x1ebc   :  { %v3419_v25 = vadd.f32 %v3418_v19, %v3417_v17  ;;  %v3400_v26 = vadd.f32 %v3399_v51, %v3398_v20 }
0x1ebe   :  { %4081 = vpush %v3400_v26  ;;  %v3420_v27 = vrot.slane %v3419_v25, 1 }
0x1ec0   :  { %v3421_v28 = vadd.f32 %v3420_v27, %v3419_v25 }
0x1ec2   :  { %4083 = vpush %v3421_v28 }
0x1eef   :  { %s4082_s19 = spop %4081 }
0x1ef0   :  { %s3402_s20 = smul.f32 %s4082_s19, %s4935_s13 }
0x1ef2   :  { %v3433_v0 = vstv %s3402_s20 }
0x1ef3   :  { %v3434_v33 = vmul.f32 %v3674_v31, %v3433_v0  ;;  %s4084_s6 = spop %4083 }
0x1ef4   :  { %s3423_s14 = smul.f32 %s4084_s6, %s4935_s13 }
0x1ef5   :  { %v3435_v21 = vadd.f32 %v3434_v33, %v3428_v3 }
0x1ef6   :  { %v3475_v6 = vstv %s3423_s14 }
0x1ef7   :  { %v3441_v55 = vadd.f32 %v3440_v37, %v3435_v21  ;;  %v3476_v49 = vmul.f32 %v3681_v42, %v3475_v6 }
0x1ef9   :  { %v3447_v7 = vadd.f32 %v3446_v11, %v3441_v55 }
0x1efb   :  { %v3453_v34 = vadd.f32 %v3452_v50, %v3447_v7 }
0x1efd   :  { %v3459_v59 = vadd.f32 %v3458_v61, %v3453_v34 }
0x1eff   :  { %v3465_v58 = vadd.f32 %v3464_v23, %v3459_v59 }
0x1f01   :  { %v3471_v43 = vadd.f32 %v3470_v24, %v3465_v58 }
0x1f03   :  { %v3477_v52 = vadd.f32 %v3476_v49, %v3471_v43 }
0x1f05   :  { %3488 = vst.msk [vmem:[%s4970_s3 + $0x20] sm:$0x1] %vm3487_vm4, %v3477_v52 }
0x1f06   :  { %3493 = vsyncpa [#allocation3], 1 }
0x1f07   :  { %3494 = vsyncpa [#allocation5], 1 }

</bundles_post_ra>
